<compile_context>
chip_gen: v5e
topology: v5e:2x2
jax: 0.10.0
libtpu: 0.0.40
codegen_flags: <defaults>
</compile_context>

<pallas_src>
import jax
import jax.numpy as jnp
from jax import lax
from jax.experimental import pallas as pl
from jax.experimental.pallas import tpu as pltpu


def _pad_hw(x):
    """Zero-pad the two leading spatial dims of an (H, W, C) value by 1."""
    H, W, C = x.shape
    zc = jnp.zeros((H, 1, C), x.dtype)
    x = jnp.concatenate([zc, x, zc], axis=1)            # (H, W+2, C)
    zr = jnp.zeros((1, W + 2, C), x.dtype)
    return jnp.concatenate([zr, x, zr], axis=0)         # (H+2, W+2, C)


def _im2col_3x3(xp, H, W):
    """(H+2, W+2, C) padded image -> (H*W, 9*C) patches, column order (kh, kw, c)."""
    C = xp.shape[-1]
    cols = [xp[kh:kh + H, kw:kw + W, :].reshape(H * W, C)
            for kh in range(3) for kw in range(3)]
    return jnp.concatenate(cols, axis=-1)


def _double_conv_kernel(x_ref, w1_ref, s1_ref, w2_ref, s2_ref, o_ref):
    # x_ref:  (1, H, W, Cin)    NHWC input tile (one batch element)
    # w1_ref: (9*Cin, Cmid)     conv1 weights, BN1 scale folded in
    # s1_ref: (1, Cmid)         conv1 bias + BN1 shift (folded)
    # w2_ref: (Cout, 9*Cmid)    conv2 weights (transposed), BN2 scale folded in
    # s2_ref: (Cout, 1)         conv2 bias + BN2 shift (folded)
    # o_ref:  (1, Cout, H*W)    flat-NCHW output tile (lane-dense store)
    _, H, W, _ = x_ref.shape
    Cmid = w1_ref.shape[1]

    x = x_ref[0].astype(jnp.float32)                       # (H, W, Cin)

    # conv1 + BN1 + ReLU: one (H*W, 9*Cin) x (9*Cin, Cmid) MXU matmul.
    p1 = _im2col_3x3(_pad_hw(x), H, W)                     # (H*W, 9*Cin)
    y1 = jnp.dot(p1, w1_ref[...], preferred_element_type=jnp.float32)
    y1 = jnp.maximum(y1 + s1_ref[...], 0.0)                # (H*W, Cmid)

    # conv2 + BN2 + ReLU, computed transposed so the result is (Cout, H*W):
    # lane-dense store and already flat NCHW.
    p2 = _im2col_3x3(_pad_hw(y1.reshape(H, W, Cmid)), H, W)   # (H*W, 9*Cmid)
    y2 = lax.dot_general(w2_ref[...], p2,
                         dimension_numbers=(((1,), (1,)), ((), ())),
                         preferred_element_type=jnp.float32)  # (Cout, H*W)
    y2 = jnp.maximum(y2 + s2_ref[...], 0.0)

    o_ref[0] = y2.astype(o_ref.dtype)


def fold_bn(bias, gamma, beta, mean, var, eps=1e-5):
    """Fold conv bias + BatchNorm(eval) into per-channel scale/shift."""
    scale = gamma / jnp.sqrt(var + eps)
    shift = beta + scale * (bias - mean)
    return scale, shift


def double_conv(x_nchw, params, eps=1e-5):
    """(N, Cin, H, W) -> (N, Cout, H, W); (Conv3x3 -> BN(eval) -> ReLU) x 2."""
    N, Cin, H, W = x_nchw.shape
    w1, w2 = params["w1"], params["w2"]          # HWIO (3, 3, Ci, Co)
    Cmid, Cout = w1.shape[-1], w2.shape[-1]

    s1, sh1 = fold_bn(params["b1"], params["g1"], params["beta1"],
                      params["m1"], params["v1"], eps)
    s2, sh2 = fold_bn(params["b2"], params["g2"], params["beta2"],
                      params["m2"], params["v2"], eps)

    # Fold BN scales into the tiny conv weights outside the kernel.
    w1f = (w1.reshape(9 * Cin, Cmid) * s1[None, :]).astype(jnp.float32)
    w2f = (jnp.transpose(w2, (3, 0, 1, 2)).reshape(Cout, 9 * Cmid)
           * s2[:, None]).astype(jnp.float32)
    sh1 = sh1.reshape(1, Cmid).astype(jnp.float32)
    sh2 = sh2.reshape(Cout, 1).astype(jnp.float32)

    # Single layout change at entry; the kernel emits flat NCHW directly.
    x_nhwc = jnp.transpose(x_nchw, (0, 2, 3, 1))

    out_flat = pl.pallas_call(
        _double_conv_kernel,
        out_shape=jax.ShapeDtypeStruct((N, Cout, H * W), x_nchw.dtype),
        grid_spec=pltpu.PrefetchScalarGridSpec(
            num_scalar_prefetch=0,
            grid=(N,),
            in_specs=[
                pl.BlockSpec((1, H, W, Cin), lambda n: (n, 0, 0, 0)),
                pl.BlockSpec((9 * Cin, Cmid), lambda n: (0, 0)),
                pl.BlockSpec((1, Cmid), lambda n: (0, 0)),
                pl.BlockSpec((Cout, 9 * Cmid), lambda n: (0, 0)),
                pl.BlockSpec((Cout, 1), lambda n: (0, 0)),
            ],
            out_specs=pl.BlockSpec((1, Cout, H * W), lambda n: (n, 0, 0)),
        ),
        compiler_params=pltpu.CompilerParams(
            dimension_semantics=("parallel",)),
    )(x_nhwc, w1f, sh1, w2f, sh2)

    return out_flat.reshape(N, Cout, H, W)


def _reference(x_nchw, params):
    """Pure-JAX reference (lax.conv) for a correctness check."""
    def conv(x, w_hwio, b):
        w_oihw = jnp.transpose(w_hwio, (3, 2, 0, 1))
        y = lax.conv_general_dilated(
            x, w_oihw, window_strides=(1, 1), padding="SAME",
            dimension_numbers=("NCHW", "OIHW", "NCHW"))
        return y + b[None, :, None, None]

    def bn_relu(y, g, beta, m, v, eps=1e-5):
        g = g[None, :, None, None]
        beta = beta[None, :, None, None]
        m = m[None, :, None, None]
        v = v[None, :, None, None]
        return jnp.maximum((y - m) / jnp.sqrt(v + eps) * g + beta, 0.0)

    y = conv(x_nchw, params["w1"], params["b1"])
    y = bn_relu(y, params["g1"], params["beta1"], params["m1"], params["v1"])
    y = conv(y, params["w2"], params["b2"])
    y = bn_relu(y, params["g2"], params["beta2"], params["m2"], params["v2"])
    return y


def init_params(key, in_channels, mid_channels, out_channels):
    ks = jax.random.split(key, 12)
    p = {
        # conv1: Conv2d(in, mid, k=3, pad=1) -- stored HWIO (3,3,Cin,Cmid)
        "w1": 0.1 * jax.random.normal(ks[0], (3, 3, in_channels, mid_channels),
                                      jnp.float32),
        "b1": 0.1 * jax.random.normal(ks[1], (mid_channels,), jnp.float32),
        "g1": 1.0 + 0.1 * jax.random.normal(ks[2], (mid_channels,), jnp.float32),
        "beta1": 0.1 * jax.random.normal(ks[3], (mid_channels,), jnp.float32),
        "m1": 0.05 * jax.random.normal(ks[4], (mid_channels,), jnp.float32),
        "v1": 1.0 + 0.1 * jax.random.uniform(ks[5], (mid_channels,), jnp.float32),
        # conv2: Conv2d(mid, out, k=3, pad=1)
        "w2": 0.1 * jax.random.normal(ks[6], (3, 3, mid_channels, out_channels),
                                      jnp.float32),
        "b2": 0.1 * jax.random.normal(ks[7], (out_channels,), jnp.float32),
        "g2": 1.0 + 0.1 * jax.random.normal(ks[8], (out_channels,), jnp.float32),
        "beta2": 0.1 * jax.random.normal(ks[9], (out_channels,), jnp.float32),
        "m2": 0.05 * jax.random.normal(ks[10], (out_channels,), jnp.float32),
        "v2": 1.0 + 0.1 * jax.random.uniform(ks[11], (out_channels,), jnp.float32),
    }
    return p


if __name__ == "__main__":
    key = jax.random.PRNGKey(0)
    kx, kp = jax.random.split(key)

    N, Cin, H, W = 2, 4, 16, 16
    Cmid, Cout = 8, 8  # mid_channels defaults to out_channels

    x = jax.random.normal(kx, (N, Cin, H, W), jnp.float32)
    params = init_params(kp, Cin, Cmid, Cout)

    out = jax.jit(double_conv)(x, params)
    out = jax.block_until_ready(out)

    ref = _reference(x, params)
    assert out.shape == (N, Cout, H, W)
    assert jnp.allclose(out, ref, atol=1e-4, rtol=1e-4), "mismatch vs reference"

    print("KERNEL_OK")
</pallas_src>

<mosaic_0001>
module attributes {stable_mosaic.version = 11 : i64} {
  func.func @_double_conv_kernel(%arg0: i32, %arg1: memref<1x16x16x4xf32, #tpu.memory_space<vmem>>, %arg2: memref<36x8xf32, #tpu.memory_space<vmem>>, %arg3: memref<1x8xf32, #tpu.memory_space<vmem>>, %arg4: memref<8x72xf32, #tpu.memory_space<vmem>>, %arg5: memref<8x1xf32, #tpu.memory_space<vmem>>, %arg6: memref<1x8x256xf32, #tpu.memory_space<vmem>>) attributes {dimension_semantics = [#tpu.dimension_semantics<parallel>], iteration_bounds = array<i64: 2>, scalar_prefetch = 0 : i64, scratch_operands = 0 : i64, tpu.core_type = #tpu.core_type<tc>, window_params = [{transform_indices = @transform_0, window_bounds = array<i64: 1, 16, 16, 4>}, {pipeline_mode = #tpu.pipeline_mode<synchronous>, transform_indices = @transform_1, window_bounds = array<i64: 36, 8>}, {pipeline_mode = #tpu.pipeline_mode<synchronous>, transform_indices = @transform_2, window_bounds = array<i64: 1, 8>}, {pipeline_mode = #tpu.pipeline_mode<synchronous>, transform_indices = @transform_3, window_bounds = array<i64: 8, 72>}, {pipeline_mode = #tpu.pipeline_mode<synchronous>, transform_indices = @transform_4, window_bounds = array<i64: 8, 1>}, {transform_indices = @transform_5, window_bounds = array<i64: 1, 8, 256>}]} {
    %c0 = arith.constant 0 : index
    %c0_0 = arith.constant 0 : index
    %c0_1 = arith.constant 0 : index
    %c0_2 = arith.constant 0 : index
    %0 = vector.load %arg1[%c0, %c0_0, %c0_1, %c0_2] : memref<1x16x16x4xf32, #tpu.memory_space<vmem>>, vector<1x16x16x4xf32>
    %1 = vector.shape_cast %0 : vector<1x16x16x4xf32> to vector<16x16x4xf32>
    %cst = arith.constant 0.000000e+00 : f32
    %2 = vector.broadcast %cst : f32 to vector<16x1x4xf32>
    %3 = tpu.concatenate %2, %1, %2 in 1 : vector<16x1x4xf32>, vector<16x16x4xf32>, vector<16x1x4xf32> -> vector<16x18x4xf32>
    %cst_3 = arith.constant 0.000000e+00 : f32
    %4 = vector.broadcast %cst_3 : f32 to vector<1x18x4xf32>
    %5 = tpu.concatenate %4, %3, %4 in 0 : vector<1x18x4xf32>, vector<16x18x4xf32>, vector<1x18x4xf32> -> vector<18x18x4xf32>
    %6 = vector.extract_strided_slice %5 {offsets = [0, 0, 0], sizes = [16, 16, 4], strides = [1, 1, 1]} : vector<18x18x4xf32> to vector<16x16x4xf32>
    %7 = vector.shape_cast %6 : vector<16x16x4xf32> to vector<256x4xf32>
    %8 = vector.extract_strided_slice %5 {offsets = [0, 1, 0], sizes = [16, 16, 4], strides = [1, 1, 1]} : vector<18x18x4xf32> to vector<16x16x4xf32>
    %9 = vector.shape_cast %8 : vector<16x16x4xf32> to vector<256x4xf32>
    %10 = vector.extract_strided_slice %5 {offsets = [0, 2, 0], sizes = [16, 16, 4], strides = [1, 1, 1]} : vector<18x18x4xf32> to vector<16x16x4xf32>
    %11 = vector.shape_cast %10 : vector<16x16x4xf32> to vector<256x4xf32>
    %12 = vector.extract_strided_slice %5 {offsets = [1, 0, 0], sizes = [16, 16, 4], strides = [1, 1, 1]} : vector<18x18x4xf32> to vector<16x16x4xf32>
    %13 = vector.shape_cast %12 : vector<16x16x4xf32> to vector<256x4xf32>
    %14 = vector.extract_strided_slice %5 {offsets = [1, 1, 0], sizes = [16, 16, 4], strides = [1, 1, 1]} : vector<18x18x4xf32> to vector<16x16x4xf32>
    %15 = vector.shape_cast %14 : vector<16x16x4xf32> to vector<256x4xf32>
    %16 = vector.extract_strided_slice %5 {offsets = [1, 2, 0], sizes = [16, 16, 4], strides = [1, 1, 1]} : vector<18x18x4xf32> to vector<16x16x4xf32>
    %17 = vector.shape_cast %16 : vector<16x16x4xf32> to vector<256x4xf32>
    %18 = vector.extract_strided_slice %5 {offsets = [2, 0, 0], sizes = [16, 16, 4], strides = [1, 1, 1]} : vector<18x18x4xf32> to vector<16x16x4xf32>
    %19 = vector.shape_cast %18 : vector<16x16x4xf32> to vector<256x4xf32>
    %20 = vector.extract_strided_slice %5 {offsets = [2, 1, 0], sizes = [16, 16, 4], strides = [1, 1, 1]} : vector<18x18x4xf32> to vector<16x16x4xf32>
    %21 = vector.shape_cast %20 : vector<16x16x4xf32> to vector<256x4xf32>
    %22 = vector.extract_strided_slice %5 {offsets = [2, 2, 0], sizes = [16, 16, 4], strides = [1, 1, 1]} : vector<18x18x4xf32> to vector<16x16x4xf32>
    %23 = vector.shape_cast %22 : vector<16x16x4xf32> to vector<256x4xf32>
    %24 = tpu.concatenate %7, %9, %11, %13, %15, %17, %19, %21, %23 in 1 : vector<256x4xf32>, vector<256x4xf32>, vector<256x4xf32>, vector<256x4xf32>, vector<256x4xf32>, vector<256x4xf32>, vector<256x4xf32>, vector<256x4xf32>, vector<256x4xf32> -> vector<256x36xf32>
    %c0_4 = arith.constant 0 : index
    %c0_5 = arith.constant 0 : index
    %25 = vector.load %arg2[%c0_4, %c0_5] : memref<36x8xf32, #tpu.memory_space<vmem>>, vector<36x8xf32>
    %cst_6 = arith.constant dense<0.000000e+00> : vector<256x8xf32>
    %26 = tpu.matmul %24, %25, %cst_6 {dimension_numbers = #tpu.dot_dimension_numbers<[1], [0], [0], [1], [0, 0, 1, 1], [], []>} : vector<256x36xf32>, vector<36x8xf32>, vector<256x8xf32> -> vector<256x8xf32>
    %c0_7 = arith.constant 0 : index
    %c0_8 = arith.constant 0 : index
    %27 = vector.load %arg3[%c0_7, %c0_8] : memref<1x8xf32, #tpu.memory_space<vmem>>, vector<1x8xf32>
    %28 = vector.broadcast %27 : vector<1x8xf32> to vector<256x8xf32>
    %29 = arith.addf %26, %28 : vector<256x8xf32>
    %cst_9 = arith.constant 0.000000e+00 : f32
    %30 = vector.broadcast %cst_9 : f32 to vector<256x8xf32>
    %31 = arith.maximumf %29, %30 : vector<256x8xf32>
    %32 = vector.shape_cast %31 : vector<256x8xf32> to vector<16x16x8xf32>
    %cst_10 = arith.constant 0.000000e+00 : f32
    %33 = vector.broadcast %cst_10 : f32 to vector<16x1x8xf32>
    %34 = tpu.concatenate %33, %32, %33 in 1 : vector<16x1x8xf32>, vector<16x16x8xf32>, vector<16x1x8xf32> -> vector<16x18x8xf32>
    %cst_11 = arith.constant 0.000000e+00 : f32
    %35 = vector.broadcast %cst_11 : f32 to vector<1x18x8xf32>
    %36 = tpu.concatenate %35, %34, %35 in 0 : vector<1x18x8xf32>, vector<16x18x8xf32>, vector<1x18x8xf32> -> vector<18x18x8xf32>
    %37 = vector.extract_strided_slice %36 {offsets = [0, 0, 0], sizes = [16, 16, 8], strides = [1, 1, 1]} : vector<18x18x8xf32> to vector<16x16x8xf32>
    %38 = vector.shape_cast %37 : vector<16x16x8xf32> to vector<256x8xf32>
    %39 = vector.extract_strided_slice %36 {offsets = [0, 1, 0], sizes = [16, 16, 8], strides = [1, 1, 1]} : vector<18x18x8xf32> to vector<16x16x8xf32>
    %40 = vector.shape_cast %39 : vector<16x16x8xf32> to vector<256x8xf32>
    %41 = vector.extract_strided_slice %36 {offsets = [0, 2, 0], sizes = [16, 16, 8], strides = [1, 1, 1]} : vector<18x18x8xf32> to vector<16x16x8xf32>
    %42 = vector.shape_cast %41 : vector<16x16x8xf32> to vector<256x8xf32>
    %43 = vector.extract_strided_slice %36 {offsets = [1, 0, 0], sizes = [16, 16, 8], strides = [1, 1, 1]} : vector<18x18x8xf32> to vector<16x16x8xf32>
    %44 = vector.shape_cast %43 : vector<16x16x8xf32> to vector<256x8xf32>
    %45 = vector.extract_strided_slice %36 {offsets = [1, 1, 0], sizes = [16, 16, 8], strides = [1, 1, 1]} : vector<18x18x8xf32> to vector<16x16x8xf32>
    %46 = vector.shape_cast %45 : vector<16x16x8xf32> to vector<256x8xf32>
    %47 = vector.extract_strided_slice %36 {offsets = [1, 2, 0], sizes = [16, 16, 8], strides = [1, 1, 1]} : vector<18x18x8xf32> to vector<16x16x8xf32>
    %48 = vector.shape_cast %47 : vector<16x16x8xf32> to vector<256x8xf32>
    %49 = vector.extract_strided_slice %36 {offsets = [2, 0, 0], sizes = [16, 16, 8], strides = [1, 1, 1]} : vector<18x18x8xf32> to vector<16x16x8xf32>
    %50 = vector.shape_cast %49 : vector<16x16x8xf32> to vector<256x8xf32>
    %51 = vector.extract_strided_slice %36 {offsets = [2, 1, 0], sizes = [16, 16, 8], strides = [1, 1, 1]} : vector<18x18x8xf32> to vector<16x16x8xf32>
    %52 = vector.shape_cast %51 : vector<16x16x8xf32> to vector<256x8xf32>
    %53 = vector.extract_strided_slice %36 {offsets = [2, 2, 0], sizes = [16, 16, 8], strides = [1, 1, 1]} : vector<18x18x8xf32> to vector<16x16x8xf32>
    %54 = vector.shape_cast %53 : vector<16x16x8xf32> to vector<256x8xf32>
    %55 = tpu.concatenate %38, %40, %42, %44, %46, %48, %50, %52, %54 in 1 : vector<256x8xf32>, vector<256x8xf32>, vector<256x8xf32>, vector<256x8xf32>, vector<256x8xf32>, vector<256x8xf32>, vector<256x8xf32>, vector<256x8xf32>, vector<256x8xf32> -> vector<256x72xf32>
    %c0_12 = arith.constant 0 : index
    %c0_13 = arith.constant 0 : index
    %56 = vector.load %arg4[%c0_12, %c0_13] : memref<8x72xf32, #tpu.memory_space<vmem>>, vector<8x72xf32>
    %cst_14 = arith.constant dense<0.000000e+00> : vector<8x256xf32>
    %57 = tpu.matmul %56, %55, %cst_14 {dimension_numbers = #tpu.dot_dimension_numbers<[1], [1], [0], [0], [0, 0, 1, 0], [], []>} : vector<8x72xf32>, vector<256x72xf32>, vector<8x256xf32> -> vector<8x256xf32>
    %c0_15 = arith.constant 0 : index
    %c0_16 = arith.constant 0 : index
    %58 = vector.load %arg5[%c0_15, %c0_16] : memref<8x1xf32, #tpu.memory_space<vmem>>, vector<8x1xf32>
    %59 = vector.broadcast %58 : vector<8x1xf32> to vector<8x256xf32>
    %60 = arith.addf %57, %59 : vector<8x256xf32>
    %cst_17 = arith.constant 0.000000e+00 : f32
    %61 = vector.broadcast %cst_17 : f32 to vector<8x256xf32>
    %62 = arith.maximumf %60, %61 : vector<8x256xf32>
    %c0_18 = arith.constant 0 : index
    %c0_19 = arith.constant 0 : index
    %c0_20 = arith.constant 0 : index
    %63 = vector.load %arg6[%c0_18, %c0_19, %c0_20] : memref<1x8x256xf32, #tpu.memory_space<vmem>>, vector<1x8x256xf32>
    %64 = vector.shape_cast %63 : vector<1x8x256xf32> to vector<8x256xf32>
    %65 = vector.shape_cast %62 : vector<8x256xf32> to vector<1x8x256xf32>
    tpu.vector_store %arg6[%c0_18, %c0_19, %c0_20], %65 {strides = array<i32>} : memref<1x8x256xf32, #tpu.memory_space<vmem>>, vector<1x8x256xf32>,
    return
  }
  func.func @transform_0(%arg0: i32) -> (i32, i32, i32, i32) {
    %c0_i32 = arith.constant 0 : i32
    %c0_i32_0 = arith.constant 0 : i32
    %c0_i32_1 = arith.constant 0 : i32
    %c0_i32_2 = arith.constant 0 : i32
    return %arg0, %c0_i32, %c0_i32_0, %c0_i32_1 : i32, i32, i32, i32
  }
  func.func @transform_1(%arg0: i32) -> (i32, i32) {
    %c0_i32 = arith.constant 0 : i32
    %c0_i32_0 = arith.constant 0 : i32
    %c0_i32_1 = arith.constant 0 : i32
    return %c0_i32, %c0_i32_0 : i32, i32
  }
  func.func @transform_2(%arg0: i32) -> (i32, i32) {
    %c0_i32 = arith.constant 0 : i32
    %c0_i32_0 = arith.constant 0 : i32
    %c0_i32_1 = arith.constant 0 : i32
    return %c0_i32, %c0_i32_0 : i32, i32
  }
  func.func @transform_3(%arg0: i32) -> (i32, i32) {
    %c0_i32 = arith.constant 0 : i32
    %c0_i32_0 = arith.constant 0 : i32
    %c0_i32_1 = arith.constant 0 : i32
    return %c0_i32, %c0_i32_0 : i32, i32
  }
  func.func @transform_4(%arg0: i32) -> (i32, i32) {
    %c0_i32 = arith.constant 0 : i32
    %c0_i32_0 = arith.constant 0 : i32
    %c0_i32_1 = arith.constant 0 : i32
    return %c0_i32, %c0_i32_0 : i32, i32
  }
  func.func @transform_5(%arg0: i32) -> (i32, i32, i32) {
    %c0_i32 = arith.constant 0 : i32
    %c0_i32_0 = arith.constant 0 : i32
    %c0_i32_1 = arith.constant 0 : i32
    return %arg0, %c0_i32, %c0_i32_0 : i32, i32, i32
  }
}

</mosaic_0001>

<bundles_post_ra>
// kernel: double_conv.1
= control target key start
LH: loop header
LB: loop body
LE: loop exit
PB: predicated region body
PF: predicated region fallthrough
CT: control target
= control target key end

     0   :  { %s3625_s18 = smov 0   ;;  %s7475_s0 = inlined_call_operand.vmem [shape: f32[2,16,16,4], index: 0, kind: input, shape index: {}]   ;;  %s7476_s1 = inlined_call_operand.vmem [shape: f32[36,8], index: 1, kind: input, shape index: {}]   ;;  %s7477_s2 = inlined_call_operand.vmem [shape: f32[1,8], index: 2, kind: input, shape index: {}]   ;;  %s7478_s3 = inlined_call_operand.vmem [shape: f32[8,72], index: 3, kind: input, shape index: {}]   ;;  %s7479_s4 = inlined_call_operand.vmem [shape: f32[8,1], index: 4, kind: input, shape index: {}]   ;;  %s7480_s5 = inlined_call_operand.vmem [shape: f32[2,8,256], index: 5, kind: output, shape index: {}]  }
   0x1 LB: > { %s3454_s19 = sadd.s32 4294967295, %s3579_s18   ;;  %p3458_p0 = scmp.ge.s32.totalorder %s3579_s18, 1  ;;  %s3579_s18 = sphi %s3625_s18, %s15_s18  }
   0x2   : > { %p187_p1 = scmp.lt.s32.totalorder %s3579_s18, 3 }
   0x4   : > { %p188_p2 = pnand %p3458_p0, %p187_p1 }
   0x6   : > { %191 = sbr.rel (%p188_p2) target bundleno = 1834 (0x72a), region = 40 }
   0xb   : > { %p215_p3 = scmp.lt.s32.totalorder %s3454_s19, 1  ;;  %v7481_v0 = vmov 0.0   ;;  %s3582_s20 = smov 4   ;;  %vm289_vm0 = vcmask 1040384   ;;  %vm448_vm1 = vcmask 1046528   ;;  %vm526_vm2 = vcmask 1045504  }
   0xc   : > { %v3634_v1 = vrot.slane %v7481_v0, 1  ;;  %s3583_s25 = smov 8   ;;  %s3584_s26 = smov 12   ;;  %vm1737_vm3 = vcmask 1043456   ;;  %vm1369_vm4 = vcmask 31744   ;;  %vm1433_vm5 = vcmask 97280  }
   0xd   : > { %s8602_s19 = smov (!%p215_p3, %s3454_s19), 1  ;;  %s3585_s27 = smov 16   ;;  %vm1401_vm6 = vcmask 64512   ;;  %vm1466_vm7 = vcmask 130048   ;;  %vm1532_vm8 = vcmask 195584   ;;  %vm1499_vm9 = vcmask 162816  }
   0xe   : > { %7710 = vst [vmem:[#allocation2_spill] sm:$0xff] %v3634_v1  ;;  %616 = vrot.lane.b32.xlu0 %v3634_v1, %s3582_s20  ;;  %s3532_s21 = sshll.u32 %s8602_s19, 8  ;;  %s3586_s28 = smov 20   ;;  %vm1565_vm10 = vcmask 228352   ;;  %vm1640_vm11 = vcmask 293888   ;;  %vm1598_vm12 = vcmask 261120  }
   0xf   : > { %s3644_s24 = scalar_lea.vmem %s7475_s0, %s3532_s21  ;;  %s3587_s29 = smov 24   ;;  %vm3116_vm13 = vcmask 326656   ;;  %vm3149_vm14 = vcmask 392192   ;;  %vm3182_vm15 = vcmask 457728  }
  0x10   : > { %v227_v2 = vld [vmem:[%s3644_s24 + $0x10] sm:$0xff]  ;;  %v228_v3 = vld [vmem:[%s3644_s24 + $0x18] sm:$0xff]  ;;  %v225_v4 = vld [vmem:[%s3644_s24] sm:$0xff]  ;;  %s3588_s30 = smov 28   ;;  %s3589_s6 = smov 32  }
  0x11   : > { %v293_v5 = vrot.slane %v227_v2, 7  ;;  %v294_v6 = vrot.slane %v228_v3, 7  ;;  %v226_v7 = vld [vmem:[%s3644_s24 + $0x8] sm:$0xff]  ;;  %v290_v8 = vrot.slane %v225_v4, 7  ;;  %v229_v9 = vld [vmem:[%s3644_s24 + $0x20] sm:$0xff]  ;;  %v231_v28 = vld [vmem:[%s3644_s24 + $0x30] sm:$0xff] }
  0x12   : > { %v230_v10 = vld [vmem:[%s3644_s24 + $0x28] sm:$0xff]  ;;  %v291_v11 = vrot.slane %v226_v7, 7  ;;  %v296_v12 = vrot.slane %v229_v9, 7  ;;  %v232_v29 = vld [vmem:[%s3644_s24 + $0x38] sm:$0xff]  ;;  %v233_v33 = vld [vmem:[%s3644_s24 + $0x40] sm:$0xff]  ;;  %v299_v39 = vrot.slane %v231_v28, 7 }
  0x13   : > { %v297_v13 = vrot.slane %v230_v10, 7  ;;  %v3653_v14 = vsel %vm289_vm0, %v293_v5, %v294_v6  ;;  %v3656_v15 = vsel %vm289_vm0, %v294_v6, 0.0  ;;  %v3659_v16 = vsel %vm289_vm0, 0.0, %v290_v8  ;;  %v234_v34 = vld [vmem:[%s3644_s24 + $0x48] sm:$0xff]  ;;  %v235_v48 = vld [vmem:[%s3644_s24 + $0x50] sm:$0xff]  ;;  %v236_v52 = vld [vmem:[%s3644_s24 + $0x58] sm:$0xff] }
  0x14   : > { %7711 = vst [vmem:[#allocation3_spill] sm:$0xff] %v3659_v16  ;;  %v457_v17 = vrot.slane %v3653_v14, 1  ;;  %v459_v18 = vrot.slane %v3656_v15, 1  ;;  %v3664_v19 = vsel %vm289_vm0, %v290_v8, %v291_v11  ;;  %v3667_v20 = vsel %vm289_vm0, %v291_v11, 0.0  ;;  %v237_v3 = vld [vmem:[%s3644_s24 + $0x60] sm:$0xff]  ;;  %v238_v6 = vld [vmem:[%s3644_s24 + $0x68] sm:$0xff] }
  0x15   : > { %7712 = vst [vmem:[#allocation4_spill] sm:$0xff] %v3664_v19  ;;  %v452_v21 = vrot.slane %v3664_v19, 1  ;;  %v454_v22 = vrot.slane %v3667_v20, 1  ;;  %v451_v23 = vrot.slane %v3659_v16, 1  ;;  %v3673_v24 = vsel %vm289_vm0, %v296_v12, %v297_v13  ;;  %v239_v7 = vld [vmem:[%s3644_s24 + $0x70] sm:$0xff]  ;;  %v240_v8 = vld [vmem:[%s3644_s24 + $0x78] sm:$0xff] }
  0x16   : > { %v3676_v25 = vsel %vm448_vm1, %v457_v17, %v459_v18  ;;  %v3679_v26 = vsel %vm289_vm0, 0.0, %v296_v12  ;;  %v3682_v27 = vsel %vm289_vm0, 0.0, %v293_v5  ;;  %v3695_v32 = vsel %vm289_vm0, %v297_v13, 0.0  ;;  %s3590_s21 = smov 40   ;;  %s3591_s22 = smov 48  }
  0x17   : > { %624 = vrot.lane.b32.xlu2 %v3676_v25, %s3582_s20  ;;  %v3689_v30 = vsel %vm448_vm1, %v452_v21, %v454_v22  ;;  %v3692_v31 = vsel %vm448_vm1, %v451_v23, %v452_v21  ;;  %v461_v35 = vrot.slane %v3679_v26, 1  ;;  %v462_v36 = vrot.slane %v3673_v24, 1  ;;  %s3592_s23 = smov 64  }
  0x18   : > { %620 = vrot.lane.b32.xlu1 %v3689_v30, %s3582_s20  ;;  %618 = vrot.lane.b32.xlu0 %v3692_v31, %s3582_s20  ;;  %v456_v37 = vrot.slane %v3682_v27, 1  ;;  %v464_v38 = vrot.slane %v3695_v32, 1  ;;  %v300_v40 = vrot.slane %v232_v29, 7  ;;  %v302_v41 = vrot.slane %v233_v33, 7 }
  0x19   : > { %v303_v42 = vrot.slane %v234_v34, 7  ;;  %v3708_v43 = vsel %vm448_vm1, %v461_v35, %v462_v36  ;;  %v3724_v49 = vsel %vm289_vm0, 0.0, %v299_v39  ;;  %v305_v55 = vrot.slane %v235_v48, 7 }
  0x1a   : > { %v3711_v44 = vsel %vm448_vm1, %v456_v37, %v457_v17  ;;  %v3714_v45 = vsel %vm448_vm1, %v462_v36, %v464_v38  ;;  %v3717_v46 = vsel %vm289_vm0, %v299_v39, %v300_v40  ;;  %v3720_v47 = vsel %vm289_vm0, %v300_v40, 0.0  ;;  %v241_v37 = vld [vmem:[%s3644_s24 + $0x80] sm:$0xff]  ;;  %v242_v38 = vld [vmem:[%s3644_s24 + $0x88] sm:$0xff] }
  0x1b   : > { %7713 = vst [vmem:[#allocation5_spill] sm:$0xff] %v3717_v46  ;;  %v3727_v50 = vsel %vm289_vm0, %v302_v41, %v303_v42  ;;  %v3730_v51 = vsel %vm289_vm0, 0.0, %v302_v41  ;;  %v467_v53 = vrot.slane %v3717_v46, 1  ;;  %v469_v54 = vrot.slane %v3720_v47, 1 }
  0x1c   : > { %7714 = vst [vmem:[#allocation6_spill] sm:$0xff] %v3727_v50  ;;  %v466_v56 = vrot.slane %v3724_v49, 1  ;;  %v471_v57 = vrot.slane %v3730_v51, 1  ;;  %v472_v58 = vrot.slane %v3727_v50, 1  ;;  %v306_v59 = vrot.slane %v236_v52, 7 }
  0x1d   : > { %7715 = vst [vmem:[#allocation7_spill] sm:$0xff] %v3730_v51  ;;  %v3745_v60 = vsel %vm448_vm1, %v467_v53, %v469_v54  ;;  %v3757_v2 = vsel %vm289_vm0, 0.0, %v305_v55  ;;  %v3761_v4 = vsel %vm289_vm0, %v303_v42, 0.0  ;;  %v308_v11 = vrot.slane %v237_v3, 7 }
  0x1e   : > { %7716 = vst [vmem:[#allocation8_spill] sm:$0xff] %v3745_v60  ;;  %v3748_v61 = vsel %vm448_vm1, %v466_v56, %v467_v53  ;;  %v3751_v62 = vsel %vm448_vm1, %v471_v57, %v472_v58  ;;  %v3754_v63 = vsel %vm289_vm0, %v305_v55, %v306_v59  ;;  %v3764_v5 = vsel %vm289_vm0, %v306_v59, 0.0 }
  0x1f   : > { %626 = vrot.lane.b32.xlu2 %v3708_v43, %s3582_s20  ;;  %7717 = vst [vmem:[#allocation9_spill] sm:$0xff] %v3748_v61  ;;  %v476_v9 = vrot.slane %v3757_v2, 1  ;;  %v477_v10 = vrot.slane %v3754_v63, 1  ;;  %v474_v12 = vrot.slane %v3761_v4, 1  ;;  %v479_v13 = vrot.slane %v3764_v5, 1 }
  0x20   : > { %622 = vrot.lane.b32.xlu1 %v3711_v44, %s3582_s20  ;;  %628 = vrot.lane.b32.xlu0 %v3714_v45, %s3582_s20  ;;  %7718 = vst [vmem:[#allocation10_spill] sm:$0xff] %v3751_v62  ;;  %v309_v17 = vrot.slane %v238_v6, 7  ;;  %v311_v18 = vrot.slane %v239_v7, 7  ;;  %v312_v21 = vrot.slane %v240_v8, 7  ;;  %v3783_v23 = vsel %vm289_vm0, 0.0, %v308_v11  ;;  %v243_v6 = vld [vmem:[%s3644_s24 + $0x90] sm:$0xff] }
  0x21   : > { %v3780_v22 = vsel %vm448_vm1, %v476_v9, %v477_v10  ;;  %v3786_v28 = vsel %vm448_vm1, %v472_v58, %v474_v12  ;;  %v3789_v29 = vsel %vm448_vm1, %v477_v10, %v479_v13  ;;  %v481_v41 = vrot.slane %v3783_v23, 1  ;;  %v244_v7 = vld [vmem:[%s3644_s24 + $0x98] sm:$0xff]  ;;  %v245_v8 = vld [vmem:[%s3644_s24 + $0xa0] sm:$0xff]  ;;  %v246_v9 = vld [vmem:[%s3644_s24 + $0xa8] sm:$0xff] }
  0x22   : > { %7719 = vst [vmem:[#allocation11_spill] sm:$0xff] %v3780_v22  ;;  %v3792_v33 = vsel %vm289_vm0, %v308_v11, %v309_v17  ;;  %v3795_v34 = vsel %vm289_vm0, %v309_v17, 0.0  ;;  %v3798_v35 = vsel %vm289_vm0, %v311_v18, %v312_v21  ;;  %v3801_v36 = vsel %vm289_vm0, 0.0, %v311_v18 }
  0x23   : > { %7720 = vst [vmem:[#allocation12_spill] sm:$0xff] %v3786_v28  ;;  %v482_v39 = vrot.slane %v3792_v33, 1  ;;  %v484_v40 = vrot.slane %v3795_v34, 1  ;;  %v486_v42 = vrot.slane %v3801_v36, 1  ;;  %v487_v48 = vrot.slane %v3798_v35, 1 }
  0x24   : > { %7721 = vst [vmem:[#allocation13_spill] sm:$0xff] %v3789_v29  ;;  %v314_v52 = vrot.slane %v241_v37, 7  ;;  %v315_v53 = vrot.slane %v242_v38, 7  ;;  %v3820_v55 = vsel %vm289_vm0, %v312_v21, 0.0  ;;  %v317_v17 = vrot.slane %v243_v6, 7 }
  0x25   : > { %7722 = vst [vmem:[#allocation14_spill] sm:$0xff] %v3798_v35  ;;  %v3817_v54 = vsel %vm448_vm1, %v482_v39, %v484_v40  ;;  %v3823_v56 = vsel %vm448_vm1, %v481_v41, %v482_v39  ;;  %v3826_v57 = vsel %vm448_vm1, %v486_v42, %v487_v48  ;;  %v489_v12 = vrot.slane %v3820_v55, 1 }
  0x26   : > { %7723 = vst [vmem:[#allocation15_spill] sm:$0xff] %v3817_v54  ;;  %v3829_v58 = vsel %vm289_vm0, %v314_v52, %v315_v53  ;;  %v3832_v59 = vsel %vm289_vm0, 0.0, %v314_v52  ;;  %v3835_v3 = vsel %vm289_vm0, %v315_v53, 0.0  ;;  %v318_v18 = vrot.slane %v244_v7, 7  ;;  %v248_v7 = vld [vmem:[%s3644_s24 + $0xb8] sm:$0xff] }
  0x27   : > { %632 = vrot.lane.b32.xlu2 %v3745_v60, %s3582_s20  ;;  %7724 = vst [vmem:[#allocation16_spill] sm:$0xff] %v3823_v56  ;;  %v491_v10 = vrot.slane %v3832_v59, 1  ;;  %v492_v11 = vrot.slane %v3829_v58, 1  ;;  %v494_v13 = vrot.slane %v3835_v3, 1  ;;  %v320_v21 = vrot.slane %v245_v8, 7 }
  0x28   : > { %630 = vrot.lane.b32.xlu1 %v3748_v61, %s3582_s20  ;;  %634 = vrot.lane.b32.xlu0 %v3751_v62, %s3582_s20  ;;  %7725 = vst [vmem:[#allocation17_spill] sm:$0xff] %v3826_v57  ;;  %v321_v37 = vrot.slane %v246_v9, 7  ;;  %v3855_v39 = vsel %vm448_vm1, %v487_v48, %v489_v12  ;;  %v3861_v41 = vsel %vm289_vm0, %v317_v17, %v318_v18  ;;  %v3864_v42 = vsel %vm289_vm0, %v318_v18, 0.0  ;;  %v247_v48 = vld [vmem:[%s3644_s24 + $0xb0] sm:$0xff] }
  0x29   : > { %7726 = vst [vmem:[#allocation18_spill] sm:$0xff] %v3829_v58  ;;  %v3852_v38 = vsel %vm448_vm1, %v491_v10, %v492_v11  ;;  %v3858_v40 = vsel %vm448_vm1, %v492_v11, %v494_v13  ;;  %v3867_v52 = vsel %vm289_vm0, 0.0, %v317_v17  ;;  %v3873_v6 = vsel %vm289_vm0, 0.0, %v320_v21 }
  0x2a   : > { %7727 = vst [vmem:[#allocation19_spill] sm:$0xff] %v3832_v59  ;;  %v3870_v53 = vsel %vm289_vm0, %v320_v21, %v321_v37  ;;  %v497_v8 = vrot.slane %v3861_v41, 1  ;;  %v499_v9 = vrot.slane %v3864_v42, 1  ;;  %v496_v10 = vrot.slane %v3867_v52, 1 }
  0x2b   : > { %7728 = vst [vmem:[#allocation20_spill] sm:$0xff] %v3852_v38  ;;  %v501_v11 = vrot.slane %v3873_v6, 1  ;;  %v502_v12 = vrot.slane %v3870_v53, 1  ;;  %v323_v13 = vrot.slane %v247_v48, 7  ;;  %v324_v17 = vrot.slane %v248_v7, 7  ;;  %v249_v7 = vld [vmem:[%s3644_s24 + $0xc0] sm:$0xff] }
  0x2c   : > { %7729 = vst [vmem:[#allocation21_spill] sm:$0xff] %v3855_v39  ;;  %v3889_v18 = vsel %vm448_vm1, %v497_v8, %v499_v9  ;;  %v3892_v21 = vsel %vm448_vm1, %v496_v10, %v497_v8  ;;  %v250_v9 = vld [vmem:[%s3644_s24 + $0xc8] sm:$0xff]  ;;  %v251_v8 = vld [vmem:[%s3644_s24 + $0xd0] sm:$0xff]  ;;  %v252_v10 = vld [vmem:[%s3644_s24 + $0xd8] sm:$0xff] }
  0x2d   : > { %7730 = vst [vmem:[#allocation22_spill] sm:$0xff] %v3858_v40  ;;  %v3895_v0 = vsel %vm448_vm1, %v501_v11, %v502_v12  ;;  %v3907_v48 = vsel %vm289_vm0, %v324_v17, 0.0 }
  0x2e   : > { %7731 = vst [vmem:[#allocation23_spill] sm:$0xff] %v3867_v52 }
  0x2f   : > { %638 = vrot.lane.b32.xlu2 %v3780_v22, %s3582_s20  ;;  %7732 = vst [vmem:[#allocation24_spill] sm:$0xff] %v3870_v53 }
  0x30   : > { %636 = vrot.lane.b32.xlu1 %v3786_v28, %s3582_s20  ;;  %640 = vrot.lane.b32.xlu0 %v3789_v29, %s3582_s20  ;;  %7733 = vst [vmem:[#allocation25_spill] sm:$0xff] %v3873_v6 }
  0x31   : > { %7734 = vst [vmem:[#allocation26_spill] sm:$0xff] %v3889_v18 }
  0x32   : > { %7735 = vst [vmem:[#allocation27_spill] sm:$0xff] %v3892_v21 }
  0x33   : > { %7736 = vst [vmem:[#allocation28_spill] sm:$0xff] %v3895_v0 }
  0x37   : > { %644 = vrot.lane.b32.xlu2 %v3817_v54, %s3582_s20  ;;  %v330_v54 = vrot.slane %v252_v10, 7  ;;  %v254_v10 = vld [vmem:[%s3644_s24 + $0xe8] sm:$0xff] }
  0x38   : > { %642 = vrot.lane.b32.xlu1 %v3823_v56, %s3582_s20  ;;  %646 = vrot.lane.b32.xlu0 %v3826_v57, %s3582_s20  ;;  %v326_v57 = vrot.slane %v249_v7, 7  ;;  %v329_v56 = vrot.slane %v251_v8, 7 }
  0x39   : > { %v3976_v60 = vsel %vm289_vm0, %v330_v54, 0.0 }
  0x3a   : > { %v3939_v7 = vsel %vm289_vm0, 0.0, %v326_v57  ;;  %v3945_v8 = vsel %vm289_vm0, 0.0, %v329_v56 }
  0x3b   : > { %7743 = vst [vmem:[#allocation35_spill] sm:$0xff] %v3939_v7 }
  0x3c   : > { %7745 = vst [vmem:[#allocation37_spill] sm:$0xff] %v3945_v8 }
  0x3f   : > { %650 = vrot.lane.b32.xlu2 %v3852_v38, %s3582_s20  ;;  %v3904_v38 = vsel %vm289_vm0, %v321_v37, 0.0 }
  0x40   : > { %648 = vrot.lane.b32.xlu1 %v3855_v39, %s3582_s20  ;;  %652 = vrot.lane.b32.xlu0 %v3858_v40, %s3582_s20  ;;  %v3898_v40 = vsel %vm289_vm0, %v323_v13, %v324_v17  ;;  %v3901_v39 = vsel %vm289_vm0, 0.0, %v323_v13  ;;  %v504_v13 = vrot.slane %v3904_v38, 1  ;;  %v509_v17 = vrot.slane %v3907_v48, 1 }
  0x41   : > { %7737 = vst [vmem:[#allocation29_spill] sm:$0xff] %v3898_v40  ;;  %v506_v11 = vrot.slane %v3901_v39, 1  ;;  %v507_v37 = vrot.slane %v3898_v40, 1 }
  0x42   : > { %7738 = vst [vmem:[#allocation30_spill] sm:$0xff] %v3901_v39 }
  0x43   : > { %v3924_v29 = vsel %vm448_vm1, %v506_v11, %v507_v37  ;;  %v511_v11 = vrot.slane %v3939_v7, 1 }
  0x44   : > { %7739 = vst [vmem:[#allocation31_spill] sm:$0xff] %v3924_v29 }
  0x47   : > { %656 = vrot.lane.b32.xlu2 %v3889_v18, %s3582_s20  ;;  %v327_v18 = vrot.slane %v250_v9, 7  ;;  %v3942_v9 = vsel %vm289_vm0, %v329_v56, %v330_v54  ;;  %v516_v56 = vrot.slane %v3945_v8, 1 }
  0x48   : > { %654 = vrot.lane.b32.xlu1 %v3892_v21, %s3582_s20  ;;  %658 = vrot.lane.b32.xlu0 %v3895_v0, %s3582_s20  ;;  %v3927_v21 = vsel %vm448_vm1, %v502_v12, %v504_v13  ;;  %v3930_v0 = vsel %vm448_vm1, %v507_v37, %v509_v17  ;;  %7744 = vst [vmem:[#allocation36_spill] sm:$0xff] %v3942_v9  ;;  %v253_v12 = vld [vmem:[%s3644_s24 + $0xe0] sm:$0xff]  ;;  %v517_v37 = vrot.slane %v3942_v9, 1  ;;  %v333_v17 = vrot.slane %v254_v10, 7 }
  0x49   : > { %7740 = vst [vmem:[#allocation32_spill] sm:$0xff] %v3927_v21  ;;  %v3933_v28 = vsel %vm289_vm0, %v326_v57, %v327_v18  ;;  %v3936_v22 = vsel %vm289_vm0, %v327_v18, 0.0  ;;  %v332_v13 = vrot.slane %v253_v12, 7 }
  0x4a   : > { %7741 = vst [vmem:[#allocation33_spill] sm:$0xff] %v3930_v0  ;;  %v512_v57 = vrot.slane %v3933_v28, 1  ;;  %v514_v18 = vrot.slane %v3936_v22, 1  ;;  %v3979_v12 = vsel %vm289_vm0, %v333_v17, 0.0 }
  0x4b   : > { %7742 = vst [vmem:[#allocation34_spill] sm:$0xff] %v3933_v28  ;;  %v3970_v62 = vsel %vm289_vm0, %v332_v13, %v333_v17  ;;  %v3973_v61 = vsel %vm289_vm0, 0.0, %v332_v13  ;;  %v524_v54 = vrot.slane %v3979_v12, 1  ;;  %v529_v17 = vrot.slane %v3659_v16, 2 }
  0x4c   : > { %7748 = vst [vmem:[#allocation40_spill] sm:$0xff] %v3970_v62  ;;  %v521_v10 = vrot.slane %v3973_v61, 1 }
  0x4d   : > { %7749 = vst [vmem:[#allocation41_spill] sm:$0xff] %v3973_v61 }
  0x4f   : > { %662 = vrot.lane.b32.xlu2 %v3924_v29, %s3582_s20  ;;  %v3961_v29 = vsel %vm448_vm1, %v512_v57, %v514_v18  ;;  %v519_v18 = vrot.slane %v3976_v60, 1 }
  0x50   : > { %660 = vrot.lane.b32.xlu1 %v3927_v21, %s3582_s20  ;;  %664 = vrot.lane.b32.xlu0 %v3930_v0, %s3582_s20  ;;  %v3964_v21 = vsel %vm448_vm1, %v511_v11, %v512_v57  ;;  %v3967_v0 = vsel %vm448_vm1, %v516_v56, %v517_v37  ;;  %v522_v57 = vrot.slane %v3970_v62, 1 }
  0x51   : > { %7746 = vst [vmem:[#allocation38_spill] sm:$0xff] %v3964_v21  ;;  %v3995_v56 = vsel %vm448_vm1, %v517_v37, %v519_v18  ;;  %v532_v37 = vrot.slane %v3667_v20, 2  ;;  %v535_v20 = vrot.slane %v3653_v14, 2 }
  0x52   : > { %7747 = vst [vmem:[#allocation39_spill] sm:$0xff] %v3967_v0  ;;  %v3992_v11 = vsel %vm448_vm1, %v521_v10, %v522_v57  ;;  %v3998_v13 = vsel %vm448_vm1, %v522_v57, %v524_v54  ;;  %v530_v10 = vrot.slane %v3664_v19, 2 }
  0x53   : > { %7750 = vst [vmem:[#allocation42_spill] sm:$0xff] %v3992_v11 }
  0x54   : > { %7751 = vst [vmem:[#allocation43_spill] sm:$0xff] %v3995_v56  ;;  %v4013_v57 = vsel %vm526_vm2, %v529_v17, %v530_v10  ;;  %v4018_v54 = vsel %vm526_vm2, %v530_v10, %v532_v37  ;;  %v537_v17 = vrot.slane %v3656_v15, 2  ;;  %v540_v10 = vrot.slane %v3673_v24, 2 }
  0x55   : > { %7754 = vst [vmem:[#allocation45_spill] sm:$0xff] %v4018_v54  ;;  %v544_v15 = vrot.slane %v3724_v49, 2 }
  0x56   : > { %v4031_v37 = vsel %vm526_vm2, %v535_v20, %v537_v17  ;;  %v545_v17 = vrot.slane %v3717_v46, 2 }
  0x57   : > { %668 = vrot.lane.b32.xlu2 %v3961_v29, %s3582_s20  ;;  %7755 = vst [vmem:[#allocation46_spill] sm:$0xff] %v4031_v37 }
  0x58   : > { %666 = vrot.lane.b32.xlu1 %v3964_v21, %s3582_s20  ;;  %670 = vrot.lane.b32.xlu0 %v3967_v0, %s3582_s20  ;;  %v7752_v0 = vmov 0.0  }
  0x59   : > { %v4009_v21 = vrot.slane %v7752_v0, 2  ;;  %v534_v0 = vrot.slane %v3682_v27, 2 }
  0x5b   : > { %7753 = vst [vmem:[#allocation44_spill] sm:$0xff] %v4009_v21  ;;  %v3566_v18 = vpack.i.bf16 %v3634_v1, %v4009_v21  ;;  %v539_v21 = vrot.slane %v3679_v26, 2  ;;  %v4034_v1 = vsel %vm526_vm2, %v534_v0, %v535_v20  ;;  %v542_v0 = vrot.slane %v3695_v32, 2 }
  0x5c   : > { %7756 = vst [vmem:[#allocation47_spill] sm:$0xff] %v4034_v1  ;;  %v4052_v20 = vsel %vm526_vm2, %v544_v15, %v545_v17  ;;  %v550_v32 = vrot.slane %v3727_v50, 2 }
  0x5d   : > { %7758 = vst [vmem:[#allocation49_spill] sm:$0xff] %v4052_v20 }
  0x5f   : > { %674 = vrot.lane.b32.xlu2 %v3992_v11, %s3582_s20 }
  0x60   : > { %672 = vrot.lane.b32.xlu1 %v3995_v56, %s3582_s20  ;;  %676 = vrot.lane.b32.xlu0 %v3998_v13, %s3582_s20 }
  0x67   : > { %711 = vrot.lane.b32.xlu2 %v4013_v57, %s3583_s25 }
  0x68   : > { %3567 = vrot.lane.b32.xlu1 %v3566_v18, %s3583_s25  ;;  %713 = vrot.lane.b32.xlu0 %v4018_v54, %s3583_s25  ;;  %v4037_v18 = vsel %vm526_vm2, %v539_v21, %v540_v10  ;;  %v547_v21 = vrot.slane %v3720_v47, 2  ;;  %v552_v47 = vrot.slane %v3761_v4, 2 }
  0x6f   : > { %717 = vrot.lane.b32.xlu2 %v4031_v37, %s3583_s25  ;;  %v4055_v37 = vsel %vm526_vm2, %v540_v10, %v542_v0  ;;  %v549_v10 = vrot.slane %v3730_v51, 2  ;;  %v555_v0 = vrot.slane %v3754_v63, 2 }
  0x70   : > { %715 = vrot.lane.b32.xlu1 %v4034_v1, %s3583_s25  ;;  %719 = vrot.lane.b32.xlu0 %v4037_v18, %s3583_s25  ;;  %7759 = vst [vmem:[#allocation50_spill] sm:$0xff] %v4055_v37  ;;  %v4058_v1 = vsel %vm526_vm2, %v545_v17, %v547_v21  ;;  %v554_v17 = vrot.slane %v3757_v2, 2  ;;  %v4074_v21 = vsel %vm526_vm2, %v550_v32, %v552_v47  ;;  %v559_v47 = vrot.slane %v3783_v23, 2 }
  0x71   : > { %v4047_v54 = vpop.permute.xlu2 %624  ;;  %7760 = vst [vmem:[#allocation51_spill] sm:$0xff] %v4058_v1 }
  0x72   : > { %7757 = vst [vmem:[#allocation48_spill] sm:$0xff] %v4047_v54  ;;  %v4077_v54 = vsel %vm526_vm2, %v549_v10, %v550_v32  ;;  %v557_v10 = vrot.slane %v3764_v5, 2  ;;  %v565_v5 = vrot.slane %v3798_v35, 2 }
  0x73   : > { %7762 = vst [vmem:[#allocation53_spill] sm:$0xff] %v4074_v21 }
  0x74   : > { %7763 = vst [vmem:[#allocation54_spill] sm:$0xff] %v4077_v54 }
  0x77   : > { %723 = vrot.lane.b32.xlu2 %v4052_v20, %s3583_s25 }
  0x78   : > { %721 = vrot.lane.b32.xlu1 %v4055_v37, %s3583_s25  ;;  %725 = vrot.lane.b32.xlu0 %v4058_v1, %s3583_s25  ;;  %v4080_v1 = vsel %vm526_vm2, %v554_v17, %v555_v0  ;;  %v562_v17 = vrot.slane %v3795_v34, 2  ;;  %v567_v34 = vrot.slane %v3820_v55, 2 }
  0x79   : > { %v4068_v15 = vpop.permute.xlu2 %626  ;;  %7764 = vst [vmem:[#allocation55_spill] sm:$0xff] %v4080_v1 }
  0x7a   : > { %7761 = vst [vmem:[#allocation52_spill] sm:$0xff] %v4068_v15  ;;  %v560_v15 = vrot.slane %v3792_v33, 2 }
  0x7f   : > { %729 = vrot.lane.b32.xlu2 %v4074_v21, %s3583_s25  ;;  %v4097_v21 = vsel %vm526_vm2, %v559_v47, %v560_v15 }
  0x80   : > { %727 = vrot.lane.b32.xlu1 %v4077_v54, %s3583_s25  ;;  %731 = vrot.lane.b32.xlu0 %v4080_v1, %s3583_s25  ;;  %v4088_v4 = vpop.permute.xlu0 %616  ;;  %7767 = vst [vmem:[#allocation58_spill] sm:$0xff] %v4097_v21  ;;  %v4100_v54 = vsel %vm526_vm2, %v555_v0, %v557_v10  ;;  %v4103_v1 = vsel %vm526_vm2, %v560_v15, %v562_v17  ;;  %v564_v0 = vrot.slane %v3801_v36, 2  ;;  %v569_v15 = vrot.slane %v3832_v59, 2 }
  0x81   : > { %7765 = vst [vmem:[#allocation56_spill] sm:$0xff] %v4088_v4  ;;  %v4092_v32 = vpop.permute.xlu2 %632  ;;  %v570_v10 = vrot.slane %v3829_v58, 2  ;;  %v4123_v4 = vsel %vm526_vm2, %v565_v5, %v567_v34  ;;  %v575_v34 = vrot.slane %v3861_v41, 2 }
  0x82   : > { %7766 = vst [vmem:[#allocation57_spill] sm:$0xff] %v4092_v32 }
  0x83   : > { %7768 = vst [vmem:[#allocation59_spill] sm:$0xff] %v4100_v54  ;;  %v4129_v55 = vsel %vm526_vm2, %v569_v15, %v570_v10 }
  0x84   : > { %7769 = vst [vmem:[#allocation60_spill] sm:$0xff] %v4103_v1 }
  0x85   : > { %7773 = vst [vmem:[#allocation64_spill] sm:$0xff] %v4123_v4 }
  0x86   : > { %7775 = vst [vmem:[#allocation66_spill] sm:$0xff] %v4129_v55 }
  0x87   : > { %735 = vrot.lane.b32.xlu2 %v4097_v21, %s3583_s25 }
  0x88   : > { %733 = vrot.lane.b32.xlu1 %v4100_v54, %s3583_s25  ;;  %737 = vrot.lane.b32.xlu0 %v4103_v1, %s3583_s25  ;;  %v4126_v1 = vsel %vm526_vm2, %v564_v0, %v565_v5  ;;  %v572_v5 = vrot.slane %v3835_v3, 2  ;;  %v577_v0 = vrot.slane %v3864_v42, 2  ;;  %v580_v3 = vrot.slane %v3870_v53, 2 }
  0x89   : > { %v4113_v47 = vpop.permute.xlu2 %638  ;;  %7774 = vst [vmem:[#allocation65_spill] sm:$0xff] %v4126_v1  ;;  %v582_v42 = vrot.slane %v3904_v38, 2 }
  0x8a   : > { %7770 = vst [vmem:[#allocation61_spill] sm:$0xff] %v4113_v47  ;;  %v4118_v17 = vpop.permute.xlu1 %620  ;;  %v4120_v32 = vpop.permute.xlu0 %618  ;;  %v574_v47 = vrot.slane %v3867_v52, 2 }
  0x8b   : > { %7771 = vst [vmem:[#allocation62_spill] sm:$0xff] %v4118_v17 }
  0x8c   : > { %7772 = vst [vmem:[#allocation63_spill] sm:$0xff] %v4120_v32 }
  0x8f   : > { %741 = vrot.lane.b32.xlu2 %v4123_v4, %s3583_s25  ;;  %v4148_v4 = vsel %vm526_vm2, %v574_v47, %v575_v34 }
  0x90   : > { %739 = vrot.lane.b32.xlu1 %v4126_v1, %s3583_s25  ;;  %743 = vrot.lane.b32.xlu0 %v4129_v55, %s3583_s25  ;;  %7779 = vst [vmem:[#allocation70_spill] sm:$0xff] %v4148_v4  ;;  %v4151_v1 = vsel %vm526_vm2, %v570_v10, %v572_v5  ;;  %v4154_v55 = vsel %vm526_vm2, %v575_v34, %v577_v0  ;;  %v579_v10 = vrot.slane %v3873_v6, 2  ;;  %v584_v34 = vrot.slane %v3901_v39, 2 }
  0x91   : > { %v4139_v17 = vpop.permute.xlu2 %644  ;;  %7780 = vst [vmem:[#allocation71_spill] sm:$0xff] %v4151_v1  ;;  %v585_v5 = vrot.slane %v3898_v40, 2 }
  0x92   : > { %7776 = vst [vmem:[#allocation67_spill] sm:$0xff] %v4139_v17  ;;  %v4143_v15 = vpop.permute.xlu1 %622  ;;  %v4145_v32 = vpop.permute.xlu0 %628  ;;  %v4174_v17 = vsel %vm526_vm2, %v580_v3, %v582_v42  ;;  %v590_v42 = vrot.slane %v3933_v28, 2 }
  0x93   : > { %7777 = vst [vmem:[#allocation68_spill] sm:$0xff] %v4143_v15  ;;  %v4177_v15 = vsel %vm526_vm2, %v579_v10, %v580_v3  ;;  %v4180_v38 = vsel %vm526_vm2, %v584_v34, %v585_v5  ;;  %v587_v3 = vrot.slane %v3907_v48, 2  ;;  %v592_v10 = vrot.slane %v3936_v22, 2 }
  0x94   : > { %7778 = vst [vmem:[#allocation69_spill] sm:$0xff] %v4145_v32  ;;  %v595_v22 = vrot.slane %v3942_v9, 2  ;;  %v597_v48 = vrot.slane %v3976_v60, 2 }
  0x95   : > { %7781 = vst [vmem:[#allocation72_spill] sm:$0xff] %v4154_v55 }
  0x96   : > { %7785 = vst [vmem:[#allocation76_spill] sm:$0xff] %v4174_v17 }
  0x97   : > { %747 = vrot.lane.b32.xlu2 %v4148_v4, %s3583_s25  ;;  %7786 = vst [vmem:[#allocation77_spill] sm:$0xff] %v4177_v15 }
  0x98   : > { %745 = vrot.lane.b32.xlu1 %v4151_v1, %s3583_s25  ;;  %749 = vrot.lane.b32.xlu0 %v4154_v55, %s3583_s25  ;;  %7787 = vst [vmem:[#allocation78_spill] sm:$0xff] %v4180_v38  ;;  %v4202_v55 = vsel %vm526_vm2, %v585_v5, %v587_v3  ;;  %v594_v5 = vrot.slane %v3945_v8, 2  ;;  %v600_v3 = vrot.slane %v3970_v62, 2 }
  0x99   : > { %v4164_v47 = vpop.permute.xlu2 %650 }
  0x9a   : > { %7782 = vst [vmem:[#allocation73_spill] sm:$0xff] %v4164_v47  ;;  %v4169_v0 = vpop.permute.xlu1 %630  ;;  %v4171_v32 = vpop.permute.xlu0 %634 }
  0x9b   : > { %7783 = vst [vmem:[#allocation74_spill] sm:$0xff] %v4169_v0 }
  0x9c   : > { %7784 = vst [vmem:[#allocation75_spill] sm:$0xff] %v4171_v32  ;;  %v589_v32 = vrot.slane %v3939_v7, 2 }
  0x9f   : > { %753 = vrot.lane.b32.xlu2 %v4174_v17, %s3583_s25  ;;  %v4199_v17 = vsel %vm526_vm2, %v589_v32, %v590_v42 }
  0xa0   : > { %751 = vrot.lane.b32.xlu1 %v4177_v15, %s3583_s25  ;;  %755 = vrot.lane.b32.xlu0 %v4180_v38, %s3583_s25  ;;  %v4205_v38 = vsel %vm526_vm2, %v590_v42, %v592_v10  ;;  %v599_v42 = vrot.slane %v3973_v61, 2 }
  0xa1   : > { %v4190_v47 = vpop.permute.xlu2 %656 }
  0xa2   : > { %7788 = vst [vmem:[#allocation79_spill] sm:$0xff] %v4190_v47  ;;  %v4194_v34 = vpop.permute.xlu1 %636  ;;  %v4196_v0 = vpop.permute.xlu0 %640  ;;  %v4225_v47 = vsel %vm526_vm2, %v595_v22, %v597_v48  ;;  %v4231_v60 = vsel %vm526_vm2, %v599_v42, %v600_v3  ;;  %v602_v48 = vrot.slane %v3979_v12, 2 }
  0xa3   : > { %7789 = vst [vmem:[#allocation80_spill] sm:$0xff] %v4194_v34 }
  0xa4   : > { %7790 = vst [vmem:[#allocation81_spill] sm:$0xff] %v4196_v0  ;;  %v4228_v0 = vsel %vm526_vm2, %v594_v5, %v595_v22  ;;  %v4247_v5 = vsel %vm526_vm2, %v600_v3, %v602_v48 }
  0xa5   : > { %7794 = vst [vmem:[#allocation85_spill] sm:$0xff] %v4225_v47 }
  0xa6   : > { %7795 = vst [vmem:[#allocation86_spill] sm:$0xff] %v4228_v0 }
  0xa7   : > { %759 = vrot.lane.b32.xlu2 %v4199_v17, %s3583_s25 }
  0xa8   : > { %757 = vrot.lane.b32.xlu1 %v4202_v55, %s3583_s25  ;;  %761 = vrot.lane.b32.xlu0 %v4205_v38, %s3583_s25 }
  0xa9   : > { %v4215_v32 = vpop.permute.xlu2 %662 }
  0xaa   : > { %7791 = vst [vmem:[#allocation82_spill] sm:$0xff] %v4215_v32  ;;  %v4220_v10 = vpop.permute.xlu1 %642  ;;  %v4222_v34 = vpop.permute.xlu0 %646 }
  0xab   : > { %7792 = vst [vmem:[#allocation83_spill] sm:$0xff] %v4220_v10 }
  0xac   : > { %7793 = vst [vmem:[#allocation84_spill] sm:$0xff] %v4222_v34 }
  0xaf   : > { %765 = vrot.lane.b32.xlu2 %v4225_v47, %s3583_s25 }
  0xb0   : > { %763 = vrot.lane.b32.xlu1 %v4228_v0, %s3583_s25  ;;  %767 = vrot.lane.b32.xlu0 %v4231_v60, %s3583_s25 }
  0xb1   : > { %v4239_v32 = vpop.permute.xlu2 %668 }
  0xb2   : > { %7796 = vst [vmem:[#allocation87_spill] sm:$0xff] %v4239_v32  ;;  %v4242_v34 = vpop.permute.xlu1 %648  ;;  %v4244_v22 = vpop.permute.xlu0 %652 }
  0xb3   : > { %7797 = vst [vmem:[#allocation88_spill] sm:$0xff] %v4242_v34 }
  0xb4   : > { %7798 = vst [vmem:[#allocation89_spill] sm:$0xff] %v4244_v22 }
  0xb7   : > { %802 = vrot.lane.b32.xlu2 %v3659_v16, %s3584_s26 }
  0xb8   : > { %769 = vrot.lane.b32.xlu1 %v4247_v5, %s3583_s25  ;;  %804 = vrot.lane.b32.xlu0 %v3664_v19, %s3584_s26  ;;  %v4359_v19 = vld [vmem:[%s3644_s24 + $0xf8] sm:$0xff] }
  0xb9   : > { %v4255_v42 = vpop.permute.xlu2 %674 }
  0xba   : > { %7799 = vst [vmem:[#allocation90_spill] sm:$0xff] %v4255_v42  ;;  %v4257_v12 = vpop.permute.xlu1 %654  ;;  %v4259_v32 = vpop.permute.xlu0 %658 }
  0xbb   : > { %7800 = vst [vmem:[#allocation91_spill] sm:$0xff] %v4257_v12 }
  0xbc   : > { %7801 = vst [vmem:[#allocation92_spill] sm:$0xff] %v4259_v32 }
  0xbf   : > { %808 = vrot.lane.b32.xlu2 %v3653_v14, %s3584_s26 }
  0xc0   : > { %806 = vrot.lane.b32.xlu1 %v3682_v27, %s3584_s26  ;;  %810 = vrot.lane.b32.xlu0 %v3679_v26, %s3584_s26 }
  0xc1   : > { %v4267_v3 = vpop.permute.xlu2 %711 }
  0xc2   : > { %7802 = vst [vmem:[#allocation93_spill] sm:$0xff] %v4267_v3  ;;  %v4269_v48 = vpop.permute.xlu1 %660  ;;  %v4271_v22 = vpop.permute.xlu0 %664 }
  0xc3   : > { %7803 = vst [vmem:[#allocation94_spill] sm:$0xff] %v4269_v48 }
  0xc4   : > { %7804 = vst [vmem:[#allocation95_spill] sm:$0xff] %v4271_v22 }
  0xc7   : > { %814 = vrot.lane.b32.xlu2 %v3724_v49, %s3584_s26 }
  0xc8   : > { %812 = vrot.lane.b32.xlu1 %v3673_v24, %s3584_s26  ;;  %816 = vrot.lane.b32.xlu0 %v3717_v46, %s3584_s26 }
  0xc9   : > { %v4279_v42 = vpop.permute.xlu2 %717 }
  0xca   : > { %7805 = vst [vmem:[#allocation96_spill] sm:$0xff] %v4279_v42  ;;  %v4281_v12 = vpop.permute.xlu1 %666  ;;  %v4283_v34 = vpop.permute.xlu0 %670 }
  0xcb   : > { %7806 = vst [vmem:[#allocation97_spill] sm:$0xff] %v4281_v12 }
  0xcc   : > { %7807 = vst [vmem:[#allocation98_spill] sm:$0xff] %v4283_v34 }
  0xcf   : > { %820 = vrot.lane.b32.xlu2 %v3727_v50, %s3584_s26 }
  0xd0   : > { %818 = vrot.lane.b32.xlu1 %v3730_v51, %s3584_s26  ;;  %822 = vrot.lane.b32.xlu0 %v3757_v2, %s3584_s26 }
  0xd1   : > { %v4291_v22 = vpop.permute.xlu2 %723 }
  0xd2   : > { %7808 = vst [vmem:[#allocation99_spill] sm:$0xff] %v4291_v22  ;;  %v4293_v48 = vpop.permute.xlu1 %672  ;;  %v4295_v32 = vpop.permute.xlu0 %676 }
  0xd3   : > { %7809 = vst [vmem:[#allocation100_spill] sm:$0xff] %v4293_v48 }
  0xd4   : > { %7810 = vst [vmem:[#allocation101_spill] sm:$0xff] %v4295_v32 }
  0xd7   : > { %826 = vrot.lane.b32.xlu2 %v3783_v23, %s3584_s26 }
  0xd8   : > { %824 = vrot.lane.b32.xlu1 %v3754_v63, %s3584_s26  ;;  %828 = vrot.lane.b32.xlu0 %v3792_v33, %s3584_s26 }
  0xd9   : > { %v4303_v34 = vpop.permute.xlu2 %729 }
  0xda   : > { %7811 = vst [vmem:[#allocation102_spill] sm:$0xff] %v4303_v34  ;;  %v4305_v12 = vpop.permute.xlu1 %3567  ;;  %v4307_v10 = vpop.permute.xlu0 %713 }
  0xdb   : > { %7812 = vst [vmem:[#allocation103_spill] sm:$0xff] %v4305_v12 }
  0xdc   : > { %7813 = vst [vmem:[#allocation104_spill] sm:$0xff] %v4307_v10 }
  0xdf   : > { %832 = vrot.lane.b32.xlu2 %v3798_v35, %s3584_s26 }
  0xe0   : > { %830 = vrot.lane.b32.xlu1 %v3801_v36, %s3584_s26  ;;  %834 = vrot.lane.b32.xlu0 %v3832_v59, %s3584_s26 }
  0xe1   : > { %v4315_v32 = vpop.permute.xlu2 %735 }
  0xe2   : > { %7814 = vst [vmem:[#allocation105_spill] sm:$0xff] %v4315_v32  ;;  %v4317_v48 = vpop.permute.xlu1 %715  ;;  %v4319_v22 = vpop.permute.xlu0 %719 }
  0xe3   : > { %7815 = vst [vmem:[#allocation106_spill] sm:$0xff] %v4317_v48 }
  0xe4   : > { %7816 = vst [vmem:[#allocation107_spill] sm:$0xff] %v4319_v22 }
  0xe7   : > { %838 = vrot.lane.b32.xlu2 %v3867_v52, %s3584_s26 }
  0xe8   : > { %836 = vrot.lane.b32.xlu1 %v3829_v58, %s3584_s26  ;;  %840 = vrot.lane.b32.xlu0 %v3861_v41, %s3584_s26 }
  0xe9   : > { %v4327_v34 = vpop.permute.xlu2 %741 }
  0xea   : > { %7817 = vst [vmem:[#allocation108_spill] sm:$0xff] %v4327_v34  ;;  %v4329_v42 = vpop.permute.xlu1 %721  ;;  %v4331_v32 = vpop.permute.xlu0 %725 }
  0xeb   : > { %7818 = vst [vmem:[#allocation109_spill] sm:$0xff] %v4329_v42 }
  0xec   : > { %7819 = vst [vmem:[#allocation110_spill] sm:$0xff] %v4331_v32 }
  0xef   : > { %844 = vrot.lane.b32.xlu2 %v3870_v53, %s3584_s26 }
  0xf0   : > { %842 = vrot.lane.b32.xlu1 %v3873_v6, %s3584_s26  ;;  %846 = vrot.lane.b32.xlu0 %v3901_v39, %s3584_s26 }
  0xf1   : > { %v4339_v22 = vpop.permute.xlu2 %747 }
  0xf2   : > { %7820 = vst [vmem:[#allocation111_spill] sm:$0xff] %v4339_v22  ;;  %v4341_v48 = vpop.permute.xlu1 %727  ;;  %v4343_v10 = vpop.permute.xlu0 %731  ;;  %v255_v22 = vld [vmem:[%s3644_s24 + $0xf0] sm:$0xff]  ;;  %s3593_s24 = smov 56  }
  0xf3   : > { %7821 = vst [vmem:[#allocation112_spill] sm:$0xff] %v4341_v48  ;;  %v335_v48 = vrot.slane %v255_v22, 7 }
  0xf4   : > { %7822 = vst [vmem:[#allocation113_spill] sm:$0xff] %v4343_v10 }
  0xf5   : > { %v4375_v3 = vsel %vm289_vm0, 0.0, %v335_v48 }
  0xf7   : > { %850 = vrot.lane.b32.xlu2 %v3939_v7, %s3584_s26 }
  0xf8   : > { %848 = vrot.lane.b32.xlu1 %v3898_v40, %s3584_s26  ;;  %852 = vrot.lane.b32.xlu0 %v3933_v28, %s3584_s26 }
  0xf9   : > { %v4351_v32 = vpop.permute.xlu2 %753 }
  0xfa   : > { %7823 = vst [vmem:[#allocation114_spill] sm:$0xff] %v4351_v32  ;;  %v4353_v34 = vpop.permute.xlu1 %733  ;;  %v4355_v42 = vpop.permute.xlu0 %737  ;;  %v7556_v32 = vrot.slane %v4359_v19, 7 }
  0xfb   : > { %7824 = vst [vmem:[#allocation115_spill] sm:$0xff] %v4353_v34 }
  0xfc   : > { %7825 = vst [vmem:[#allocation116_spill] sm:$0xff] %v4355_v42  ;;  %v4380_v16 = vsel %vm289_vm0, %v335_v48, %v7556_v32 }
  0xff   : > { %856 = vrot.lane.b32.xlu2 %v3942_v9, %s3584_s26 }
 0x100   : > { %854 = vrot.lane.b32.xlu1 %v3945_v8, %s3584_s26  ;;  %858 = vrot.lane.b32.xlu0 %v3973_v61, %s3584_s26 }
 0x101   : > { %v4367_v10 = vpop.permute.xlu2 %759 }
 0x102   : > { %7826 = vst [vmem:[#allocation117_spill] sm:$0xff] %v4367_v10  ;;  %v4370_v34 = vpop.permute.xlu1 %739  ;;  %v4372_v42 = vpop.permute.xlu0 %743 }
 0x103   : > { %7827 = vst [vmem:[#allocation118_spill] sm:$0xff] %v4370_v34 }
 0x104   : > { %7828 = vst [vmem:[#allocation119_spill] sm:$0xff] %v4372_v42 }
 0x107   : > { %862 = vrot.lane.b32.xlu2 %v4375_v3, %s3584_s26 }
 0x108   : > { %860 = vrot.lane.b32.xlu1 %v3970_v62, %s3584_s26  ;;  %864 = vrot.lane.b32.xlu0 %v4380_v16, %s3584_s26 }
 0x109   : > { %v4388_v22 = vpop.permute.xlu2 %765 }
 0x10a   : > { %7829 = vst [vmem:[#allocation120_spill] sm:$0xff] %v4388_v22  ;;  %v4390_v10 = vpop.permute.xlu1 %745  ;;  %v4392_v42 = vpop.permute.xlu0 %749 }
 0x10b   : > { %7830 = vst [vmem:[#allocation121_spill] sm:$0xff] %v4390_v10  ;;  %v7838_v10 = vld [vmem:[#allocation8_spill] sm:$0xff] }
 0x10c   : > { %7831 = vst [vmem:[#allocation122_spill] sm:$0xff] %v4392_v42 }
 0x10f   : > { %900 = vrot.lane.b32.xlu2 %v3689_v30, %s3585_s27 }
 0x110   : > { %898 = vrot.lane.b32.xlu1 %v3692_v31, %s3585_s27  ;;  %902 = vrot.lane.b32.xlu0 %v3711_v44, %s3585_s27 }
 0x111   : > { %v4400_v48 = vpop.permute.xlu2 %802 }
 0x112   : > { %7832 = vst [vmem:[#allocation123_spill] sm:$0xff] %v4400_v48  ;;  %v4402_v32 = vpop.permute.xlu1 %751  ;;  %v4404_v34 = vpop.permute.xlu0 %755 }
 0x113   : > { %7833 = vst [vmem:[#allocation124_spill] sm:$0xff] %v4402_v32  ;;  %v7840_v32 = vld [vmem:[#allocation10_spill] sm:$0xff] }
 0x114   : > { %7834 = vst [vmem:[#allocation125_spill] sm:$0xff] %v4404_v34  ;;  %v7839_v34 = vld [vmem:[#allocation9_spill] sm:$0xff] }
 0x117   : > { %906 = vrot.lane.b32.xlu2 %v3708_v43, %s3585_s27 }
 0x118   : > { %904 = vrot.lane.b32.xlu1 %v3676_v25, %s3585_s27  ;;  %908 = vrot.lane.b32.xlu0 %v3714_v45, %s3585_s27 }
 0x119   : > { %v4412_v30 = vpop.permute.xlu2 %808 }
 0x11a   : > { %7835 = vst [vmem:[#allocation126_spill] sm:$0xff] %v4412_v30  ;;  %v4414_v31 = vpop.permute.xlu1 %757  ;;  %v4416_v22 = vpop.permute.xlu0 %761  ;;  %v7844_v30 = vld [vmem:[#allocation11_spill] sm:$0xff] }
 0x11b   : > { %7836 = vst [vmem:[#allocation127_spill] sm:$0xff] %v4414_v31  ;;  %v7846_v31 = vld [vmem:[#allocation13_spill] sm:$0xff] }
 0x11c   : > { %7837 = vst [vmem:[#allocation128_spill] sm:$0xff] %v4416_v22  ;;  %v7845_v22 = vld [vmem:[#allocation12_spill] sm:$0xff] }
 0x11f   : > { %912 = vrot.lane.b32.xlu2 %v7838_v10, %s3585_s27 }
 0x120   : > { %910 = vrot.lane.b32.xlu1 %v7839_v34, %s3585_s27  ;;  %914 = vrot.lane.b32.xlu0 %v7840_v32, %s3585_s27 }
 0x121   : > { %v4424_v42 = vpop.permute.xlu2 %814 }
 0x122   : > { %7841 = vst [vmem:[#allocation129_spill] sm:$0xff] %v4424_v42  ;;  %v4426_v48 = vpop.permute.xlu1 %763  ;;  %v4428_v12 = vpop.permute.xlu0 %767  ;;  %v7850_v42 = vld [vmem:[#allocation15_spill] sm:$0xff] }
 0x123   : > { %7842 = vst [vmem:[#allocation130_spill] sm:$0xff] %v4426_v48  ;;  %v7852_v48 = vld [vmem:[#allocation17_spill] sm:$0xff] }
 0x124   : > { %7843 = vst [vmem:[#allocation131_spill] sm:$0xff] %v4428_v12  ;;  %v7851_v12 = vld [vmem:[#allocation16_spill] sm:$0xff] }
 0x127   : > { %918 = vrot.lane.b32.xlu2 %v7844_v30, %s3585_s27 }
 0x128   : > { %916 = vrot.lane.b32.xlu1 %v7845_v22, %s3585_s27  ;;  %920 = vrot.lane.b32.xlu0 %v7846_v31, %s3585_s27 }
 0x129   : > { %v4436_v10 = vpop.permute.xlu2 %820 }
 0x12a   : > { %7847 = vst [vmem:[#allocation132_spill] sm:$0xff] %v4436_v10  ;;  %v4438_v34 = vpop.permute.xlu1 %769  ;;  %v4440_v32 = vpop.permute.xlu0 %804  ;;  %v7856_v10 = vld [vmem:[#allocation20_spill] sm:$0xff] }
 0x12b   : > { %7848 = vst [vmem:[#allocation133_spill] sm:$0xff] %v4438_v34  ;;  %v7857_v34 = vld [vmem:[#allocation21_spill] sm:$0xff] }
 0x12c   : > { %7849 = vst [vmem:[#allocation134_spill] sm:$0xff] %v4440_v32  ;;  %v7858_v32 = vld [vmem:[#allocation22_spill] sm:$0xff] }
 0x12f   : > { %924 = vrot.lane.b32.xlu2 %v7850_v42, %s3585_s27 }
 0x130   : > { %922 = vrot.lane.b32.xlu1 %v7851_v12, %s3585_s27  ;;  %926 = vrot.lane.b32.xlu0 %v7852_v48, %s3585_s27 }
 0x131   : > { %v4448_v30 = vpop.permute.xlu2 %826 }
 0x132   : > { %7853 = vst [vmem:[#allocation135_spill] sm:$0xff] %v4448_v30  ;;  %v4450_v22 = vpop.permute.xlu1 %806  ;;  %v4452_v31 = vpop.permute.xlu0 %810  ;;  %v7862_v30 = vld [vmem:[#allocation26_spill] sm:$0xff] }
 0x133   : > { %7854 = vst [vmem:[#allocation136_spill] sm:$0xff] %v4450_v22  ;;  %v7864_v22 = vld [vmem:[#allocation28_spill] sm:$0xff] }
 0x134   : > { %7855 = vst [vmem:[#allocation137_spill] sm:$0xff] %v4452_v31  ;;  %v7863_v31 = vld [vmem:[#allocation27_spill] sm:$0xff] }
 0x137   : > { %930 = vrot.lane.b32.xlu2 %v7856_v10, %s3585_s27 }
 0x138   : > { %928 = vrot.lane.b32.xlu1 %v7857_v34, %s3585_s27  ;;  %932 = vrot.lane.b32.xlu0 %v7858_v32, %s3585_s27 }
 0x139   : > { %v4460_v42 = vpop.permute.xlu2 %832 }
 0x13a   : > { %7859 = vst [vmem:[#allocation138_spill] sm:$0xff] %v4460_v42  ;;  %v4462_v12 = vpop.permute.xlu1 %812  ;;  %v4464_v48 = vpop.permute.xlu0 %816  ;;  %v7868_v42 = vld [vmem:[#allocation31_spill] sm:$0xff] }
 0x13b   : > { %7860 = vst [vmem:[#allocation139_spill] sm:$0xff] %v4462_v12  ;;  %v7870_v12 = vld [vmem:[#allocation33_spill] sm:$0xff] }
 0x13c   : > { %7861 = vst [vmem:[#allocation140_spill] sm:$0xff] %v4464_v48  ;;  %v7869_v48 = vld [vmem:[#allocation32_spill] sm:$0xff] }
 0x13f   : > { %936 = vrot.lane.b32.xlu2 %v7862_v30, %s3585_s27 }
 0x140   : > { %934 = vrot.lane.b32.xlu1 %v7863_v31, %s3585_s27  ;;  %938 = vrot.lane.b32.xlu0 %v7864_v22, %s3585_s27 }
 0x141   : > { %v4472_v10 = vpop.permute.xlu2 %838 }
 0x142   : > { %7865 = vst [vmem:[#allocation141_spill] sm:$0xff] %v4472_v10  ;;  %v4474_v34 = vpop.permute.xlu1 %818  ;;  %v4476_v32 = vpop.permute.xlu0 %822  ;;  %v7875_v10 = vld [vmem:[#allocation39_spill] sm:$0xff] }
 0x143   : > { %7866 = vst [vmem:[#allocation142_spill] sm:$0xff] %v4474_v34 }
 0x144   : > { %7867 = vst [vmem:[#allocation143_spill] sm:$0xff] %v4476_v32  ;;  %v7874_v32 = vld [vmem:[#allocation38_spill] sm:$0xff] }
 0x147   : > { %942 = vrot.lane.b32.xlu2 %v7868_v42, %s3585_s27 }
 0x148   : > { %940 = vrot.lane.b32.xlu1 %v7869_v48, %s3585_s27  ;;  %944 = vrot.lane.b32.xlu0 %v7870_v12, %s3585_s27 }
 0x149   : > { %v4484_v30 = vpop.permute.xlu2 %844 }
 0x14a   : > { %7871 = vst [vmem:[#allocation31_spill] sm:$0xff] %v4484_v30  ;;  %v4486_v31 = vpop.permute.xlu1 %824  ;;  %v4488_v22 = vpop.permute.xlu0 %828  ;;  %v7879_v30 = vrot.slane %v4359_v19, 7  ;;  %v606_v19 = vrot.slane %v4375_v3, 1 }
 0x14b   : > { %7872 = vst [vmem:[#allocation144_spill] sm:$0xff] %v4486_v31 }
 0x14c   : > { %7873 = vst [vmem:[#allocation145_spill] sm:$0xff] %v4488_v22  ;;  %v4505_v31 = vsel %vm289_vm0, %v7879_v30, 0.0 }
 0x14f   : > { %948 = vrot.lane.b32.xlu2 %v3961_v29, %s3585_s27 }
 0x150   : > { %946 = vrot.lane.b32.xlu1 %v7874_v32, %s3585_s27  ;;  %950 = vrot.lane.b32.xlu0 %v7875_v10, %s3585_s27 }
 0x151   : > { %v4496_v34 = vpop.permute.xlu2 %850 }
 0x152   : > { %7876 = vst [vmem:[#allocation38_spill] sm:$0xff] %v4496_v34  ;;  %v4498_v48 = vpop.permute.xlu1 %830  ;;  %v4500_v12 = vpop.permute.xlu0 %834  ;;  %v607_v34 = vrot.slane %v4380_v16, 1 }
 0x153   : > { %7877 = vst [vmem:[#allocation39_spill] sm:$0xff] %v4498_v48  ;;  %v609_v48 = vrot.slane %v4505_v31, 1 }
 0x154   : > { %7878 = vst [vmem:[#allocation146_spill] sm:$0xff] %v4500_v12 }
 0x157   : > { %954 = vrot.lane.b32.xlu2 %v3992_v11, %s3585_s27  ;;  %v4523_v11 = vsel %vm448_vm1, %v607_v34, %v609_v48  ;;  %v7888_v48 = vld [vmem:[#allocation47_spill] sm:$0xff] }
 0x158   : > { %952 = vrot.lane.b32.xlu1 %v3995_v56, %s3585_s27  ;;  %956 = vrot.lane.b32.xlu0 %v3998_v13, %s3585_s27  ;;  %7883 = vst [vmem:[#allocation150_spill] sm:$0xff] %v4523_v11  ;;  %v4526_v56 = vsel %vm448_vm1, %v606_v19, %v607_v34  ;;  %v7889_v34 = vld [vmem:[#allocation45_spill] sm:$0xff]  ;;  %v7890_v19 = vld [vmem:[#allocation46_spill] sm:$0xff] }
 0x159   : > { %v4515_v22 = vpop.permute.xlu2 %856  ;;  %7884 = vst [vmem:[#allocation151_spill] sm:$0xff] %v4526_v56 }
 0x15a   : > { %7880 = vst [vmem:[#allocation147_spill] sm:$0xff] %v4515_v22  ;;  %v4518_v12 = vpop.permute.xlu1 %836  ;;  %v4520_v30 = vpop.permute.xlu0 %840 }
 0x15b   : > { %7881 = vst [vmem:[#allocation148_spill] sm:$0xff] %v4518_v12 }
 0x15c   : > { %7882 = vst [vmem:[#allocation149_spill] sm:$0xff] %v4520_v30 }
 0x15f   : > { %960 = vrot.lane.b32.xlu2 %v4523_v11, %s3585_s27 }
 0x160   : > { %958 = vrot.lane.b32.xlu1 %v4526_v56, %s3585_s27  ;;  %994 = vrot.lane.b32.xlu0 %v4013_v57, %s3586_s28 }
 0x161   : > { %v4534_v22 = vpop.permute.xlu2 %862 }
 0x162   : > { %7885 = vst [vmem:[#allocation152_spill] sm:$0xff] %v4534_v22  ;;  %v4536_v12 = vpop.permute.xlu1 %842  ;;  %v4538_v30 = vpop.permute.xlu0 %846 }
 0x163   : > { %7886 = vst [vmem:[#allocation153_spill] sm:$0xff] %v4536_v12 }
 0x164   : > { %7887 = vst [vmem:[#allocation154_spill] sm:$0xff] %v4538_v30  ;;  %v7897_v30 = vld [vmem:[#allocation54_spill] sm:$0xff] }
 0x167   : > { %998 = vrot.lane.b32.xlu2 %v7888_v48, %s3586_s28 }
 0x168   : > { %996 = vrot.lane.b32.xlu1 %v7889_v34, %s3586_s28  ;;  %1000 = vrot.lane.b32.xlu0 %v7890_v19, %s3586_s28 }
 0x169   : > { %v4546_v56 = vpop.permute.xlu2 %900 }
 0x16a   : > { %7891 = vst [vmem:[#allocation47_spill] sm:$0xff] %v4546_v56  ;;  %v4548_v11 = vpop.permute.xlu1 %848  ;;  %v4550_v57 = vpop.permute.xlu0 %852 }
 0x16b   : > { %7892 = vst [vmem:[#allocation45_spill] sm:$0xff] %v4548_v11  ;;  %v7899_v11 = vld [vmem:[#allocation53_spill] sm:$0xff] }
 0x16c   : > { %7893 = vst [vmem:[#allocation46_spill] sm:$0xff] %v4550_v57  ;;  %v7898_v57 = vld [vmem:[#allocation51_spill] sm:$0xff] }
 0x16f   : > { %1004 = vrot.lane.b32.xlu2 %v4055_v37, %s3586_s28 }
 0x170   : > { %1002 = vrot.lane.b32.xlu1 %v4037_v18, %s3586_s28  ;;  %1006 = vrot.lane.b32.xlu0 %v4052_v20, %s3586_s28 }
 0x171   : > { %v4558_v22 = vpop.permute.xlu2 %906 }
 0x172   : > { %7894 = vst [vmem:[#allocation155_spill] sm:$0xff] %v4558_v22  ;;  %v4560_v34 = vpop.permute.xlu1 %854  ;;  %v4562_v12 = vpop.permute.xlu0 %858 }
 0x173   : > { %7895 = vst [vmem:[#allocation156_spill] sm:$0xff] %v4560_v34 }
 0x174   : > { %7896 = vst [vmem:[#allocation157_spill] sm:$0xff] %v4562_v12  ;;  %v7903_v12 = vld [vmem:[#allocation55_spill] sm:$0xff] }
 0x177   : > { %1010 = vrot.lane.b32.xlu2 %v7897_v30, %s3586_s28 }
 0x178   : > { %1008 = vrot.lane.b32.xlu1 %v7898_v57, %s3586_s28  ;;  %1012 = vrot.lane.b32.xlu0 %v7899_v11, %s3586_s28 }
 0x179   : > { %v4570_v56 = vpop.permute.xlu2 %912 }
 0x17a   : > { %7900 = vst [vmem:[#allocation51_spill] sm:$0xff] %v4570_v56  ;;  %v4572_v37 = vpop.permute.xlu1 %860  ;;  %v4574_v20 = vpop.permute.xlu0 %864  ;;  %v7907_v56 = vld [vmem:[#allocation65_spill] sm:$0xff] }
 0x17b   : > { %7901 = vst [vmem:[#allocation53_spill] sm:$0xff] %v4572_v37  ;;  %v7909_v37 = vld [vmem:[#allocation64_spill] sm:$0xff] }
 0x17c   : > { %7902 = vst [vmem:[#allocation158_spill] sm:$0xff] %v4574_v20  ;;  %v7908_v20 = vld [vmem:[#allocation60_spill] sm:$0xff] }
 0x17f   : > { %1016 = vrot.lane.b32.xlu2 %v4100_v54, %s3586_s28 }
 0x180   : > { %1014 = vrot.lane.b32.xlu1 %v7903_v12, %s3586_s28  ;;  %1018 = vrot.lane.b32.xlu0 %v4097_v21, %s3586_s28 }
 0x181   : > { %v4582_v34 = vpop.permute.xlu2 %918 }
 0x182   : > { %7904 = vst [vmem:[#allocation159_spill] sm:$0xff] %v4582_v34  ;;  %v4584_v22 = vpop.permute.xlu1 %898  ;;  %v4586_v30 = vpop.permute.xlu0 %902  ;;  %v7913_v34 = vld [vmem:[#allocation66_spill] sm:$0xff] }
 0x183   : > { %7905 = vst [vmem:[#allocation160_spill] sm:$0xff] %v4584_v22 }
 0x184   : > { %7906 = vst [vmem:[#allocation161_spill] sm:$0xff] %v4586_v30 }
 0x187   : > { %1022 = vrot.lane.b32.xlu2 %v7907_v56, %s3586_s28 }
 0x188   : > { %1020 = vrot.lane.b32.xlu1 %v7908_v20, %s3586_s28  ;;  %1024 = vrot.lane.b32.xlu0 %v7909_v37, %s3586_s28 }
 0x189   : > { %v4594_v54 = vpop.permute.xlu2 %924 }
 0x18a   : > { %7910 = vst [vmem:[#allocation60_spill] sm:$0xff] %v4594_v54  ;;  %v4596_v12 = vpop.permute.xlu1 %904  ;;  %v4598_v21 = vpop.permute.xlu0 %908  ;;  %v7918_v54 = vld [vmem:[#allocation76_spill] sm:$0xff] }
 0x18b   : > { %7911 = vst [vmem:[#allocation64_spill] sm:$0xff] %v4596_v12 }
 0x18c   : > { %7912 = vst [vmem:[#allocation162_spill] sm:$0xff] %v4598_v21  ;;  %v7917_v21 = vld [vmem:[#allocation72_spill] sm:$0xff] }
 0x18f   : > { %1028 = vrot.lane.b32.xlu2 %v4151_v1, %s3586_s28 }
 0x190   : > { %1026 = vrot.lane.b32.xlu1 %v7913_v34, %s3586_s28  ;;  %1030 = vrot.lane.b32.xlu0 %v4148_v4, %s3586_s28 }
 0x191   : > { %v4606_v30 = vpop.permute.xlu2 %930 }
 0x192   : > { %7914 = vst [vmem:[#allocation66_spill] sm:$0xff] %v4606_v30  ;;  %v4608_v22 = vpop.permute.xlu1 %910  ;;  %v4610_v56 = vpop.permute.xlu0 %914 }
 0x193   : > { %7915 = vst [vmem:[#allocation163_spill] sm:$0xff] %v4608_v22 }
 0x194   : > { %7916 = vst [vmem:[#allocation164_spill] sm:$0xff] %v4610_v56  ;;  %v7922_v56 = vld [vmem:[#allocation78_spill] sm:$0xff] }
 0x197   : > { %1034 = vrot.lane.b32.xlu2 %v4177_v15, %s3586_s28 }
 0x198   : > { %1032 = vrot.lane.b32.xlu1 %v7917_v21, %s3586_s28  ;;  %1036 = vrot.lane.b32.xlu0 %v7918_v54, %s3586_s28 }
 0x199   : > { %v4618_v12 = vpop.permute.xlu2 %936 }
 0x19a   : > { %7919 = vst [vmem:[#allocation72_spill] sm:$0xff] %v4618_v12  ;;  %v4620_v1 = vpop.permute.xlu1 %916  ;;  %v4622_v4 = vpop.permute.xlu0 %920  ;;  %v612_v12 = vrot.slane %v4380_v16, 2 }
 0x19b   : > { %7920 = vst [vmem:[#allocation76_spill] sm:$0xff] %v4620_v1 }
 0x19c   : > { %7921 = vst [vmem:[#allocation165_spill] sm:$0xff] %v4622_v4  ;;  %v611_v4 = vrot.slane %v4375_v3, 2 }
 0x19f   : > { %1040 = vrot.lane.b32.xlu2 %v4202_v55, %s3586_s28 }
 0x1a0   : > { %1038 = vrot.lane.b32.xlu1 %v7922_v56, %s3586_s28  ;;  %1042 = vrot.lane.b32.xlu0 %v4199_v17, %s3586_s28 }
 0x1a1   : > { %v4630_v30 = vpop.permute.xlu2 %942 }
 0x1a2   : > { %7923 = vst [vmem:[#allocation78_spill] sm:$0xff] %v4630_v30  ;;  %v4632_v22 = vpop.permute.xlu1 %922  ;;  %v4634_v15 = vpop.permute.xlu0 %926 }
 0x1a3   : > { %7924 = vst [vmem:[#allocation166_spill] sm:$0xff] %v4632_v22 }
 0x1a4   : > { %7925 = vst [vmem:[#allocation167_spill] sm:$0xff] %v4634_v15  ;;  %v4651_v15 = vsel %vm526_vm2, %v611_v4, %v612_v12 }
 0x1a7   : > { %1046 = vrot.lane.b32.xlu2 %v4228_v0, %s3586_s28 }
 0x1a8   : > { %1044 = vrot.lane.b32.xlu1 %v4205_v38, %s3586_s28  ;;  %1048 = vrot.lane.b32.xlu0 %v4225_v47, %s3586_s28 }
 0x1a9   : > { %v4644_v1 = vpop.permute.xlu2 %948 }
 0x1aa   : > { %7926 = vst [vmem:[#allocation168_spill] sm:$0xff] %v4644_v1  ;;  %v4646_v30 = vpop.permute.xlu1 %928  ;;  %v4648_v22 = vpop.permute.xlu0 %932  ;;  %v614_v1 = vrot.slane %v4505_v31, 2 }
 0x1ab   : > { %7927 = vst [vmem:[#allocation169_spill] sm:$0xff] %v4646_v30 }
 0x1ac   : > { %7928 = vst [vmem:[#allocation170_spill] sm:$0xff] %v4648_v22  ;;  %v4667_v4 = vsel %vm526_vm2, %v612_v12, %v614_v1 }
 0x1af   : > { %1052 = vrot.lane.b32.xlu2 %v4247_v5, %s3586_s28 }
 0x1b0   : > { %1050 = vrot.lane.b32.xlu1 %v4231_v60, %s3586_s28  ;;  %1054 = vrot.lane.b32.xlu0 %v4651_v15, %s3586_s28 }
 0x1b1   : > { %v4659_v0 = vpop.permute.xlu2 %954 }
 0x1b2   : > { %7929 = vst [vmem:[#allocation171_spill] sm:$0xff] %v4659_v0  ;;  %v4662_v47 = vpop.permute.xlu1 %934  ;;  %v4664_v30 = vpop.permute.xlu0 %938 }
 0x1b3   : > { %7930 = vst [vmem:[#allocation172_spill] sm:$0xff] %v4662_v47 }
 0x1b4   : > { %7931 = vst [vmem:[#allocation173_spill] sm:$0xff] %v4664_v30 }
 0x1b7   : > { %1090 = vrot.lane.b32.xlu2 %v3682_v27, %s3587_s29 }
 0x1b8   : > { %1056 = vrot.lane.b32.xlu1 %v4667_v4, %s3586_s28  ;;  %1092 = vrot.lane.b32.xlu0 %v3653_v14, %s3587_s29 }
 0x1b9   : > { %v4675_v0 = vpop.permute.xlu2 %960 }
 0x1ba   : > { %7932 = vst [vmem:[#allocation174_spill] sm:$0xff] %v4675_v0  ;;  %v4677_v31 = vpop.permute.xlu1 %940  ;;  %v4679_v47 = vpop.permute.xlu0 %944 }
 0x1bb   : > { %7933 = vst [vmem:[#allocation175_spill] sm:$0xff] %v4679_v47 }
 0x1bf   : > { %1096 = vrot.lane.b32.xlu2 %v3673_v24, %s3587_s29 }
 0x1c0   : > { %1094 = vrot.lane.b32.xlu1 %v3679_v26, %s3587_s29  ;;  %1098 = vrot.lane.b32.xlu0 %v3724_v49, %s3587_s29 }
 0x1c1   : > { %v4687_v1 = vpop.permute.xlu2 %998 }
 0x1c2   : > { %v4689_v12 = vpop.permute.xlu1 %946  ;;  %v4691_v30 = vpop.permute.xlu0 %950 }
 0x1c3   : > { %7934 = vst [vmem:[#allocation176_spill] sm:$0xff] %v4689_v12 }
 0x1c4   : > { %7935 = vst [vmem:[#allocation177_spill] sm:$0xff] %v4691_v30 }
 0x1c7   : > { %1102 = vrot.lane.b32.xlu2 %v3730_v51, %s3587_s29 }
 0x1c8   : > { %1100 = vrot.lane.b32.xlu1 %v3717_v46, %s3587_s29  ;;  %1104 = vrot.lane.b32.xlu0 %v3727_v50, %s3587_s29 }
 0x1c9   : > { %v4699_v0 = vpop.permute.xlu2 %1004 }
 0x1ca   : > { %v4701_v47 = vpop.permute.xlu1 %952  ;;  %v4703_v22 = vpop.permute.xlu0 %956 }
 0x1cb   : > { %7936 = vst [vmem:[#allocation178_spill] sm:$0xff] %v4701_v47 }
 0x1cc   : > { %7937 = vst [vmem:[#allocation179_spill] sm:$0xff] %v4703_v22 }
 0x1cf   : > { %1108 = vrot.lane.b32.xlu2 %v3754_v63, %s3587_s29 }
 0x1d0   : > { %1106 = vrot.lane.b32.xlu1 %v3757_v2, %s3587_s29  ;;  %1110 = vrot.lane.b32.xlu0 %v3783_v23, %s3587_s29 }
 0x1d1   : > { %v4711_v30 = vpop.permute.xlu2 %1010 }
 0x1d2   : > { %7938 = vst [vmem:[#allocation180_spill] sm:$0xff] %v4711_v30  ;;  %v4713_v12 = vpop.permute.xlu1 %958  ;;  %v4715_v50 = vpop.permute.xlu0 %994 }
 0x1d3   : > { %7939 = vst [vmem:[#allocation181_spill] sm:$0xff] %v4713_v12 }
 0x1d7   : > { %1114 = vrot.lane.b32.xlu2 %v3801_v36, %s3587_s29 }
 0x1d8   : > { %1112 = vrot.lane.b32.xlu1 %v3792_v33, %s3587_s29  ;;  %1116 = vrot.lane.b32.xlu0 %v3798_v35, %s3587_s29 }
 0x1d9   : > { %v4723_v22 = vpop.permute.xlu2 %1016 }
 0x1da   : > { %7940 = vst [vmem:[#allocation182_spill] sm:$0xff] %v4723_v22  ;;  %v4725_v47 = vpop.permute.xlu1 %996  ;;  %v4727_v51 = vpop.permute.xlu0 %1000 }
 0x1df   : > { %1120 = vrot.lane.b32.xlu2 %v3829_v58, %s3587_s29 }
 0x1e0   : > { %1118 = vrot.lane.b32.xlu1 %v3832_v59, %s3587_s29  ;;  %1122 = vrot.lane.b32.xlu0 %v3867_v52, %s3587_s29 }
 0x1e1   : > { %v4735_v12 = vpop.permute.xlu2 %1022 }
 0x1e2   : > { %v4737_v46 = vpop.permute.xlu1 %1002  ;;  %v4739_v35 = vpop.permute.xlu0 %1006 }
 0x1e7   : > { %1126 = vrot.lane.b32.xlu2 %v3873_v6, %s3587_s29 }
 0x1e8   : > { %1124 = vrot.lane.b32.xlu1 %v3861_v41, %s3587_s29  ;;  %1128 = vrot.lane.b32.xlu0 %v3870_v53, %s3587_s29 }
 0x1e9   : > { %v4747_v22 = vpop.permute.xlu2 %1028 }
 0x1ea   : > { %7941 = vst [vmem:[#allocation183_spill] sm:$0xff] %v4747_v22  ;;  %v4749_v58 = vpop.permute.xlu1 %1008  ;;  %v4751_v52 = vpop.permute.xlu0 %1012 }
 0x1eb   : > { %7942 = vst [vmem:[#allocation184_spill] sm:$0xff] %v4751_v52  ;;  %v7969_v52 = vld [vmem:[#allocation20_spill] sm:$0xff] }
 0x1ef   : > { %1132 = vrot.lane.b32.xlu2 %v3898_v40, %s3587_s29 }
 0x1f0   : > { %1130 = vrot.lane.b32.xlu1 %v3901_v39, %s3587_s29  ;;  %1134 = vrot.lane.b32.xlu0 %v3939_v7, %s3587_s29 }
 0x1f1   : > { %v4759_v59 = vpop.permute.xlu2 %1034 }
 0x1f2   : > { %7943 = vst [vmem:[#allocation185_spill] sm:$0xff] %v4759_v59  ;;  %v4761_v30 = vpop.permute.xlu1 %1014  ;;  %v4763_v53 = vpop.permute.xlu0 %1018  ;;  %v7949_v59 = vmov 0.0  }
 0x1f3   : > { %7944 = vst [vmem:[#allocation186_spill] sm:$0xff] %v4761_v30 }
 0x1f7   : > { %1138 = vrot.lane.b32.xlu2 %v3945_v8, %s3587_s29 }
 0x1f8   : > { %1136 = vrot.lane.b32.xlu1 %v3933_v28, %s3587_s29  ;;  %1140 = vrot.lane.b32.xlu0 %v3942_v9, %s3587_s29 }
 0x1f9   : > { %v4771_v40 = vpop.permute.xlu2 %1040 }
 0x1fa   : > { %7945 = vst [vmem:[#allocation187_spill] sm:$0xff] %v4771_v40  ;;  %v4773_v39 = vpop.permute.xlu1 %1020  ;;  %v4775_v7 = vpop.permute.xlu0 %1024  ;;  %v7964_v40 = vld [vmem:[#allocation15_spill] sm:$0xff] }
 0x1ff   : > { %1144 = vrot.lane.b32.xlu2 %v3970_v62, %s3587_s29 }
 0x200   : > { %1142 = vrot.lane.b32.xlu1 %v3973_v61, %s3587_s29  ;;  %1146 = vrot.lane.b32.xlu0 %v4375_v3, %s3587_s29 }
 0x201   : > { %v4783_v8 = vpop.permute.xlu2 %1046 }
 0x202   : > { %7946 = vst [vmem:[#allocation188_spill] sm:$0xff] %v4783_v8  ;;  %v4785_v28 = vpop.permute.xlu1 %1026  ;;  %v4787_v9 = vpop.permute.xlu0 %1030  ;;  %v7955_v8 = vld [vmem:[#allocation9_spill] sm:$0xff] }
 0x203   : > { %7947 = vst [vmem:[#allocation189_spill] sm:$0xff] %v4785_v28 }
 0x204   : > { %7948 = vst [vmem:[#allocation190_spill] sm:$0xff] %v4787_v9  ;;  %v7959_v9 = vld [vmem:[#allocation11_spill] sm:$0xff] }
 0x207   : > { %1150 = vrot.lane.b32.xlu2 %v7949_v59, %s3587_s29 }
 0x208   : > { %1148 = vrot.lane.b32.xlu1 %v4380_v16, %s3587_s29  ;;  %1183 = vrot.lane.b32.xlu0 %v3711_v44, %s3588_s30 }
 0x209   : > { %v4795_v62 = vpop.permute.xlu2 %1052 }
 0x20a   : > { %7950 = vst [vmem:[#allocation191_spill] sm:$0xff] %v4795_v62  ;;  %v4797_v61 = vpop.permute.xlu1 %1032  ;;  %v4799_v3 = vpop.permute.xlu0 %1036  ;;  %v7954_v62 = vld [vmem:[#allocation8_spill] sm:$0xff] }
 0x20b   : > { %7951 = vst [vmem:[#allocation192_spill] sm:$0xff] %v4797_v61 }
 0x20f   : > { %1187 = vrot.lane.b32.xlu2 %v3708_v43, %s3588_s30  ;;  %v7956_v43 = vld [vmem:[#allocation10_spill] sm:$0xff] }
 0x210   : > { %1185 = vrot.lane.b32.xlu1 %v3676_v25, %s3588_s30  ;;  %1189 = vrot.lane.b32.xlu0 %v3714_v45, %s3588_s30 }
 0x211   : > { %v4807_v16 = vpop.permute.xlu2 %1090 }
 0x212   : > { %v4809_v59 = vpop.permute.xlu1 %1038  ;;  %v4811_v44 = vpop.permute.xlu0 %1042 }
 0x213   : > { %7952 = vst [vmem:[#allocation193_spill] sm:$0xff] %v4809_v59  ;;  %v7975_v59 = vld [vmem:[#allocation32_spill] sm:$0xff] }
 0x214   : > { %7953 = vst [vmem:[#allocation194_spill] sm:$0xff] %v4811_v44  ;;  %v7960_v44 = vld [vmem:[#allocation12_spill] sm:$0xff] }
 0x217   : > { %1193 = vrot.lane.b32.xlu2 %v7954_v62, %s3588_s30  ;;  %v7961_v62 = vld [vmem:[#allocation13_spill] sm:$0xff] }
 0x218   : > { %1191 = vrot.lane.b32.xlu1 %v7955_v8, %s3588_s30  ;;  %1195 = vrot.lane.b32.xlu0 %v7956_v43, %s3588_s30 }
 0x219   : > { %v4819_v61 = vpop.permute.xlu2 %1096 }
 0x21a   : > { %v4821_v25 = vpop.permute.xlu1 %1044  ;;  %v4823_v45 = vpop.permute.xlu0 %1048 }
 0x21b   : > { %7957 = vst [vmem:[#allocation8_spill] sm:$0xff] %v4821_v25 }
 0x21c   : > { %7958 = vst [vmem:[#allocation9_spill] sm:$0xff] %v4823_v45  ;;  %v7965_v45 = vld [vmem:[#allocation16_spill] sm:$0xff] }
 0x21f   : > { %1199 = vrot.lane.b32.xlu2 %v7959_v9, %s3588_s30  ;;  %v7966_v9 = vld [vmem:[#allocation17_spill] sm:$0xff] }
 0x220   : > { %1197 = vrot.lane.b32.xlu1 %v7960_v44, %s3588_s30  ;;  %1201 = vrot.lane.b32.xlu0 %v7961_v62, %s3588_s30 }
 0x221   : > { %v4831_v30 = vpop.permute.xlu2 %1102 }
 0x222   : > { %v4833_v8 = vpop.permute.xlu1 %1050  ;;  %v4835_v43 = vpop.permute.xlu0 %1054 }
 0x223   : > { %7962 = vst [vmem:[#allocation10_spill] sm:$0xff] %v4833_v8 }
 0x224   : > { %7963 = vst [vmem:[#allocation11_spill] sm:$0xff] %v4835_v43  ;;  %v7970_v43 = vld [vmem:[#allocation21_spill] sm:$0xff] }
 0x227   : > { %1205 = vrot.lane.b32.xlu2 %v7964_v40, %s3588_s30  ;;  %v7971_v40 = vld [vmem:[#allocation22_spill] sm:$0xff] }
 0x228   : > { %1203 = vrot.lane.b32.xlu1 %v7965_v45, %s3588_s30  ;;  %1207 = vrot.lane.b32.xlu0 %v7966_v9, %s3588_s30 }
 0x229   : > { %v4843_v25 = vpop.permute.xlu2 %1108 }
 0x22a   : > { %7967 = vst [vmem:[#allocation12_spill] sm:$0xff] %v4843_v25  ;;  %v4845_v44 = vpop.permute.xlu1 %1056  ;;  %v4847_v62 = vpop.permute.xlu0 %1092  ;;  %v7972_v25 = vld [vmem:[#allocation26_spill] sm:$0xff] }
 0x22b   : > { %7968 = vst [vmem:[#allocation13_spill] sm:$0xff] %v4845_v44  ;;  %v7973_v44 = vld [vmem:[#allocation27_spill] sm:$0xff] }
 0x22f   : > { %1211 = vrot.lane.b32.xlu2 %v7969_v52, %s3588_s30  ;;  %v7974_v52 = vld [vmem:[#allocation28_spill] sm:$0xff] }
 0x230   : > { %1209 = vrot.lane.b32.xlu1 %v7970_v43, %s3588_s30  ;;  %1213 = vrot.lane.b32.xlu0 %v7971_v40, %s3588_s30 }
 0x231   : > { %v4855_v8 = vpop.permute.xlu2 %1114 }
 0x232   : > { %v4857_v45 = vpop.permute.xlu1 %1094  ;;  %v4859_v9 = vpop.permute.xlu0 %1098 }
 0x237   : > { %1217 = vrot.lane.b32.xlu2 %v7972_v25, %s3588_s30  ;;  %v7976_v25 = vld [vmem:[#allocation33_spill] sm:$0xff] }
 0x238   : > { %1215 = vrot.lane.b32.xlu1 %v7973_v44, %s3588_s30  ;;  %1219 = vrot.lane.b32.xlu0 %v7974_v52, %s3588_s30 }
 0x239   : > { %v4867_v22 = vpop.permute.xlu2 %1120 }
 0x23a   : > { %v4869_v43 = vpop.permute.xlu1 %1100  ;;  %v4871_v40 = vpop.permute.xlu0 %1104 }
 0x23f   : > { %1223 = vrot.lane.b32.xlu2 %v7868_v42, %s3588_s30 }
 0x240   : > { %1221 = vrot.lane.b32.xlu1 %v7975_v59, %s3588_s30  ;;  %1225 = vrot.lane.b32.xlu0 %v7976_v25, %s3588_s30 }
 0x241   : > { %v4879_v28 = vpop.permute.xlu2 %1126 }
 0x242   : > { %7977 = vst [vmem:[#allocation15_spill] sm:$0xff] %v4879_v28  ;;  %v4881_v44 = vpop.permute.xlu1 %1106  ;;  %v4883_v52 = vpop.permute.xlu0 %1110  ;;  %v7981_v28 = vld [vmem:[#allocation42_spill] sm:$0xff] }
 0x243   : > { %7978 = vst [vmem:[#allocation16_spill] sm:$0xff] %v4881_v44  ;;  %v7985_v44 = vld [vmem:[#allocation150_spill] sm:$0xff] }
 0x244   : > { %7979 = vst [vmem:[#allocation17_spill] sm:$0xff] %v4883_v52  ;;  %v7982_v52 = vld [vmem:[#allocation43_spill] sm:$0xff] }
 0x247   : > { %1229 = vrot.lane.b32.xlu2 %v3961_v29, %s3588_s30 }
 0x248   : > { %1227 = vrot.lane.b32.xlu1 %v7874_v32, %s3588_s30  ;;  %1231 = vrot.lane.b32.xlu0 %v7875_v10, %s3588_s30 }
 0x249   : > { %v4891_v42 = vpop.permute.xlu2 %1132 }
 0x24a   : > { %v4893_v59 = vpop.permute.xlu1 %1112  ;;  %v4895_v25 = vpop.permute.xlu0 %1116 }
 0x24b   : > { %7980 = vst [vmem:[#allocation20_spill] sm:$0xff] %v4893_v59  ;;  %v7986_v59 = vld [vmem:[#allocation151_spill] sm:$0xff] }
 0x24f   : > { %1235 = vrot.lane.b32.xlu2 %v7981_v28, %s3588_s30  ;;  %v7987_v28 = vld [vmem:[#allocation2_spill] sm:$0xff] }
 0x250   : > { %1233 = vrot.lane.b32.xlu1 %v7982_v52, %s3588_s30  ;;  %1237 = vrot.lane.b32.xlu0 %v3998_v13, %s3588_s30 }
 0x251   : > { %v4903_v29 = vpop.permute.xlu2 %1138 }
 0x252   : > { %7983 = vst [vmem:[#allocation21_spill] sm:$0xff] %v4903_v29  ;;  %v4905_v32 = vpop.permute.xlu1 %1118  ;;  %v4907_v10 = vpop.permute.xlu0 %1122  ;;  %v8002_v29 = vld [vmem:[#allocation58_spill] sm:$0xff] }
 0x253   : > { %7984 = vst [vmem:[#allocation22_spill] sm:$0xff] %v4907_v10 }
 0x257   : > { %1241 = vrot.lane.b32.xlu2 %v7985_v44, %s3588_s30 }
 0x258   : > { %1239 = vrot.lane.b32.xlu1 %v7986_v59, %s3588_s30  ;;  %1243 = vrot.lane.b32.xlu0 %v7987_v28, %s3588_s30 }
 0x259   : > { %v4915_v6 = vpop.permute.xlu2 %1144 }
 0x25a   : > { %7988 = vst [vmem:[#allocation26_spill] sm:$0xff] %v4915_v6  ;;  %v4917_v52 = vpop.permute.xlu1 %1124  ;;  %v4919_v13 = vpop.permute.xlu0 %1128  ;;  %v7994_v6 = vld [vmem:[#allocation49_spill] sm:$0xff] }
 0x25b   : > { %7989 = vst [vmem:[#allocation27_spill] sm:$0xff] %v4917_v52  ;;  %v8028_v52 = vld [vmem:[#allocation103_spill] sm:$0xff] }
 0x25c   : > { %7990 = vst [vmem:[#allocation28_spill] sm:$0xff] %v4919_v13  ;;  %v7995_v13 = vld [vmem:[#allocation50_spill] sm:$0xff] }
 0x25f   : > { %1278 = vrot.lane.b32.xlu2 %v7890_v19, %s3589_s6 }
 0x260   : > { %1276 = vrot.lane.b32.xlu1 %v7888_v48, %s3589_s6  ;;  %1280 = vrot.lane.b32.xlu0 %v4037_v18, %s3589_s6 }
 0x261   : > { %v4927_v44 = vpop.permute.xlu2 %1150 }
 0x262   : > { %7991 = vst [vmem:[#allocation32_spill] sm:$0xff] %v4927_v44  ;;  %v4929_v59 = vpop.permute.xlu1 %1130  ;;  %v4931_v28 = vpop.permute.xlu0 %1134  ;;  %v7998_v44 = vld [vmem:[#allocation54_spill] sm:$0xff] }
 0x263   : > { %7992 = vst [vmem:[#allocation33_spill] sm:$0xff] %v4929_v59 }
 0x264   : > { %7993 = vst [vmem:[#allocation42_spill] sm:$0xff] %v4931_v28 }
 0x267   : > { %1284 = vrot.lane.b32.xlu2 %v7994_v6, %s3589_s6  ;;  %v7999_v6 = vld [vmem:[#allocation55_spill] sm:$0xff] }
 0x268   : > { %1282 = vrot.lane.b32.xlu1 %v7995_v13, %s3589_s6  ;;  %1286 = vrot.lane.b32.xlu0 %v7898_v57, %s3589_s6 }
 0x269   : > { %v4939_v19 = vpop.permute.xlu2 %1187 }
 0x26a   : > { %v4941_v48 = vpop.permute.xlu1 %1136  ;;  %v4943_v18 = vpop.permute.xlu0 %1140 }
 0x26b   : > { %7996 = vst [vmem:[#allocation43_spill] sm:$0xff] %v4941_v48 }
 0x26c   : > { %7997 = vst [vmem:[#allocation150_spill] sm:$0xff] %v4943_v18  ;;  %v8003_v18 = vld [vmem:[#allocation59_spill] sm:$0xff] }
 0x26f   : > { %1290 = vrot.lane.b32.xlu2 %v7899_v11, %s3589_s6 }
 0x270   : > { %1288 = vrot.lane.b32.xlu1 %v7998_v44, %s3589_s6  ;;  %1292 = vrot.lane.b32.xlu0 %v7999_v6, %s3589_s6 }
 0x271   : > { %v4951_v59 = vpop.permute.xlu2 %1193 }
 0x272   : > { %v4953_v13 = vpop.permute.xlu1 %1142  ;;  %v4955_v57 = vpop.permute.xlu0 %1146 }
 0x273   : > { %8000 = vst [vmem:[#allocation151_spill] sm:$0xff] %v4953_v13  ;;  %v8009_v13 = vld [vmem:[#allocation71_spill] sm:$0xff] }
 0x274   : > { %8001 = vst [vmem:[#allocation49_spill] sm:$0xff] %v4955_v57  ;;  %v8006_v57 = vld [vmem:[#allocation65_spill] sm:$0xff] }
 0x277   : > { %1296 = vrot.lane.b32.xlu2 %v8002_v29, %s3589_s6 }
 0x278   : > { %1294 = vrot.lane.b32.xlu1 %v8003_v18, %s3589_s6  ;;  %1298 = vrot.lane.b32.xlu0 %v7908_v20, %s3589_s6 }
 0x279   : > { %v4967_v6 = vpop.permute.xlu2 %1199 }
 0x27a   : > { %v4963_v11 = vpop.permute.xlu1 %1148  ;;  %v4965_v44 = vpop.permute.xlu0 %1183  ;;  %8005 = vst [vmem:[#allocation54_spill] sm:$0xff] %v4967_v6 }
 0x27b   : > { %8004 = vst [vmem:[#allocation50_spill] sm:$0xff] %v4963_v11  ;;  %v8008_v11 = vld [vmem:[#allocation70_spill] sm:$0xff] }
 0x27f   : > { %1302 = vrot.lane.b32.xlu2 %v7909_v37, %s3589_s6 }
 0x280   : > { %1300 = vrot.lane.b32.xlu1 %v8006_v57, %s3589_s6  ;;  %1304 = vrot.lane.b32.xlu0 %v7913_v34, %s3589_s6 }
 0x281   : > { %v4979_v20 = vpop.permute.xlu2 %1205 }
 0x282   : > { %v4975_v29 = vpop.permute.xlu1 %1185  ;;  %v4977_v18 = vpop.permute.xlu0 %1189  ;;  %8007 = vst [vmem:[#allocation55_spill] sm:$0xff] %v4979_v20  ;;  %v8010_v20 = vld [vmem:[#allocation77_spill] sm:$0xff] }
 0x287   : > { %1308 = vrot.lane.b32.xlu2 %v8008_v11, %s3589_s6 }
 0x288   : > { %1306 = vrot.lane.b32.xlu1 %v8009_v13, %s3589_s6  ;;  %1310 = vrot.lane.b32.xlu0 %v7917_v21, %s3589_s6 }
 0x289   : > { %v4991_v34 = vpop.permute.xlu2 %1211 }
 0x28a   : > { %v4987_v37 = vpop.permute.xlu1 %1191  ;;  %v4989_v57 = vpop.permute.xlu0 %1195 }
 0x28f   : > { %1314 = vrot.lane.b32.xlu2 %v7918_v54, %s3589_s6 }
 0x290   : > { %1312 = vrot.lane.b32.xlu1 %v8010_v20, %s3589_s6  ;;  %1316 = vrot.lane.b32.xlu0 %v7922_v56, %s3589_s6  ;;  %v8014_v56 = vld [vmem:[#allocation85_spill] sm:$0xff] }
 0x291   : > { %v5009_v54 = vpop.permute.xlu2 %1217 }
 0x292   : > { %v4999_v11 = vpop.permute.xlu1 %1197  ;;  %v5001_v13 = vpop.permute.xlu0 %1201  ;;  %8012 = vst [vmem:[#allocation59_spill] sm:$0xff] %v5009_v54 }
 0x293   : > { %8011 = vst [vmem:[#allocation58_spill] sm:$0xff] %v5001_v13  ;;  %v8015_v13 = vld [vmem:[#allocation86_spill] sm:$0xff] }
 0x297   : > { %1320 = vrot.lane.b32.xlu2 %v4199_v17, %s3589_s6 }
 0x298   : > { %1318 = vrot.lane.b32.xlu1 %v4202_v55, %s3589_s6  ;;  %1322 = vrot.lane.b32.xlu0 %v4205_v38, %s3589_s6 }
 0x299   : > { %v5025_v38 = vpop.permute.xlu2 %1223 }
 0x29a   : > { %v5011_v21 = vpop.permute.xlu1 %1203  ;;  %v5013_v20 = vpop.permute.xlu0 %1207  ;;  %8016 = vst [vmem:[#allocation70_spill] sm:$0xff] %v5025_v38  ;;  %v1632_v38 = vld [vmem:[%s7476_s1 + $0x8] sm:$0xff] }
 0x29b   : > { %8013 = vst [vmem:[#allocation65_spill] sm:$0xff] %v5011_v21 }
 0x29f   : > { %1326 = vrot.lane.b32.xlu2 %v8014_v56, %s3589_s6 }
 0x2a0   : > { %1324 = vrot.lane.b32.xlu1 %v8015_v13, %s3589_s6  ;;  %1328 = vrot.lane.b32.xlu0 %v4231_v60, %s3589_s6  ;;  %v1635_v60 = vld [vmem:[%s7476_s1 + $0x20] sm:$0xf] }
 0x2a1   : > { %3463 = vmatpush.msk.msra.mxu0 %vm1737_vm3, %v1635_v60  ;;  %3534 = vmatpush.msk.msra.mxu1 %vm1737_vm3, %v1635_v60 }
 0x2a2   : > { %v5021_v17 = vpop.permute.xlu1 %1209  ;;  %v5023_v55 = vpop.permute.xlu0 %1213  ;;  %3535 = vmatpush.msk.msra.mxu3 %vm1737_vm3, %v1635_v60 }
 0x2a7   : > { %1332 = vrot.lane.b32.xlu2 %v4651_v15, %s3589_s6  ;;  %v1634_v15 = vld [vmem:[%s7476_s1 + $0x18] sm:$0xff] }
 0x2a8   : > { %1330 = vrot.lane.b32.xlu1 %v4247_v5, %s3589_s6  ;;  %1334 = vrot.lane.b32.xlu0 %v4667_v4, %s3589_s6  ;;  %v1633_v5 = vld [vmem:[%s7476_s1 + $0x10] sm:$0xff]  ;;  %v5046_v4 = vpop.permute.xlu2 %1229 }
 0x2a9   : > { %8019 = vst [vmem:[#allocation85_spill] sm:$0xff] %v5046_v4  ;;  %1753 = vmatpush.msra.mxu0 %v1634_v15  ;;  %3536 = vmatpush.msra.mxu1 %v1634_v15  ;;  %v1631_v4 = vld [vmem:[%s7476_s1] sm:$0xff] }
 0x2aa   : > { %v5033_v56 = vpop.permute.xlu1 %1215  ;;  %v5035_v13 = vpop.permute.xlu0 %1219  ;;  %3537 = vmatpush.msra.mxu3 %v1634_v15 }
 0x2ab   : > { %8017 = vst [vmem:[#allocation71_spill] sm:$0xff] %v5033_v56  ;;  %1754 = vmatpush.msra.mxu0 %v1633_v5  ;;  %3538 = vmatpush.msra.mxu1 %v1633_v5  ;;  %v3569_v56 = vunpack.i.l.bf16 %v8028_v52 }
 0x2ac   : > { %8018 = vst [vmem:[#allocation77_spill] sm:$0xff] %v5035_v13  ;;  %v8020_v13 = vld [vmem:[#allocation44_spill] sm:$0xff]  ;;  %3539 = vmatpush.msra.mxu3 %v1633_v5 }
 0x2ad   : > { %1755 = vmatpush.msra.mxu0 %v1632_v38  ;;  %3540 = vmatpush.msra.mxu1 %v1632_v38 }
 0x2ae   : > { %3541 = vmatpush.msra.mxu3 %v1632_v38 }
 0x2af   : > { %1756 = vmatpush.msra.mxu0 %v1631_v4  ;;  %3542 = vmatpush.msra.mxu1 %v1631_v4 }
 0x2b0   : > { %1336 = vrot.lane.b32.xlu1 %v8020_v13, %s3589_s6  ;;  %3543 = vmatpush.msra.mxu3 %v1631_v4  ;;  %v5060_v15 = vpop.permute.xlu2 %1235 }
 0x2b1   : > { %8022 = vst [vmem:[#allocation195_spill] sm:$0xff] %v5060_v15  ;;  %v8031_v15 = vld [vmem:[#allocation56_spill] sm:$0xff] }
 0x2b2   : > { %v5053_v21 = vpop.permute.xlu1 %1221  ;;  %v5055_v60 = vpop.permute.xlu0 %1225 }
 0x2b3   : > { %8021 = vst [vmem:[#allocation86_spill] sm:$0xff] %v5053_v21 }
 0x2b8   : > { %v5066_v5 = vpop.permute.xlu2 %1241 }
 0x2b9   : > { %8025 = vst [vmem:[#allocation198_spill] sm:$0xff] %v5066_v5  ;;  %v8032_v5 = vld [vmem:[#allocation123_spill] sm:$0xff] }
 0x2ba   : > { %v5062_v54 = vpop.permute.xlu1 %1227  ;;  %v5064_v13 = vpop.permute.xlu0 %1231 }
 0x2bb   : > { %8023 = vst [vmem:[#allocation196_spill] sm:$0xff] %v5062_v54  ;;  %v1370_v54 = vsel %vm1369_vm4, 0.0, %v8031_v15 }
 0x2bc   : > { %8024 = vst [vmem:[#allocation197_spill] sm:$0xff] %v5064_v13  ;;  %v1402_v13 = vsel %vm1401_vm6, %v1370_v54, %v3569_v56 }
 0x2c0   : > { %v1279_v4 = vpop.permute.xlu2 %1278 }
 0x2c2   : > { %v5068_v48 = vpop.permute.xlu1 %1233  ;;  %v5070_v21 = vpop.permute.xlu0 %1237 }
 0x2c3   : > { %8026 = vst [vmem:[#allocation199_spill] sm:$0xff] %v5068_v48  ;;  %v1434_v48 = vsel %vm1433_vm5, %v1402_v13, %v8032_v5 }
 0x2c4   : > { %8027 = vst [vmem:[#allocation200_spill] sm:$0xff] %v5070_v21  ;;  %v8033_v21 = vld [vmem:[#allocation160_spill] sm:$0xff] }
 0x2c5   : > { %v1467_v52 = vsel %vm1466_vm7, %v1434_v48, %v8033_v21  ;;  %v8034_v21 = vld [vmem:[#allocation134_spill] sm:$0xff] }
 0x2c6   : > { %v1435_v28 = vsel %vm1433_vm5, %v1402_v13, %v8034_v21  ;;  %v8038_v13 = vld [vmem:[#allocation93_spill] sm:$0xff] }
 0x2c8   : > { %v1285_v48 = vpop.permute.xlu2 %1284 }
 0x2ca   : > { %v5073_v6 = vpop.permute.xlu1 %1239  ;;  %v5075_v38 = vpop.permute.xlu0 %1243 }
 0x2cb   : > { %8029 = vst [vmem:[#allocation201_spill] sm:$0xff] %v5073_v6 }
 0x2cc   : > { %8030 = vst [vmem:[#allocation202_spill] sm:$0xff] %v5075_v38  ;;  %v1500_v38 = vsel %vm1499_vm9, %v1467_v52, %v4715_v50  ;;  %v8035_v50 = vld [vmem:[#allocation47_spill] sm:$0xff] }
 0x2cd   : > { %v1533_v6 = vsel %vm1532_vm8, %v1500_v38, %v4807_v16  ;;  %v1468_v52 = vsel %vm1466_vm7, %v1435_v28, %v8035_v50 }
 0x2ce   : > { %v1566_v54 = vsel %vm1565_vm10, %v1533_v6, %v4965_v44  ;;  %v1501_v16 = vsel %vm1499_vm9, %v1468_v52, %v4725_v47  ;;  %v8039_v47 = vld [vmem:[#allocation136_spill] sm:$0xff] }
 0x2cf   : > { %v1534_v44 = vsel %vm1532_vm8, %v1501_v16, %v4847_v62  ;;  %v8040_v62 = vld [vmem:[#allocation161_spill] sm:$0xff] }
 0x2d0   : > { %v1567_v6 = vsel %vm1565_vm10, %v1534_v44, %v4975_v29  ;;  %v5113_v29 = vpop.permute.xlu2 %1290 }
 0x2d2   : > { %v1277_v56 = vpop.permute.xlu1 %1276  ;;  %v1281_v15 = vpop.permute.xlu0 %1280 }
 0x2d3   : > { %v1599_v5 = vsel %vm1598_vm12, %v1566_v54, %v1277_v56  ;;  %v1600_v54 = vsel %vm1598_vm12, %v1567_v6, %v1279_v4  ;;  %v8036_v56 = vld [vmem:[#allocation63_spill] sm:$0xff] }
 0x2d4   : > { %3464 = vmatmul.msk.f32.vlgmr.msra.gmra.mxu0 %vm1640_vm11, %v1599_v5  ;;  %v8037_v5 = vld [vmem:[#allocation3_spill] sm:$0xff] }
 0x2d5   : > { %v1371_v10 = vsel %vm1369_vm4, %v8037_v5, %v8036_v56  ;;  %v8042_v56 = vld [vmem:[#allocation4_spill] sm:$0xff] }
 0x2d6   : > { %v1403_v28 = vsel %vm1401_vm6, %v1371_v10, %v8038_v13  ;;  %v8043_v13 = vld [vmem:[#allocation104_spill] sm:$0xff] }
 0x2d7   : > { %v1436_v50 = vsel %vm1433_vm5, %v1403_v28, %v8039_v47 }
 0x2d8   : > { %v1469_v52 = vsel %vm1466_vm7, %v1436_v50, %v8040_v62 }
 0x2d9   : > { %v1502_v4 = vsel %vm1499_vm9, %v1469_v52, %v4687_v1  ;;  %v8044_v1 = vld [vmem:[#allocation126_spill] sm:$0xff]  ;;  %v5140_v52 = vpop.permute.xlu2 %1296 }
 0x2da   : > { %v1283_v38 = vpop.permute.xlu1 %1282  ;;  %v1287_v21 = vpop.permute.xlu0 %1286  ;;  %v1535_v16 = vsel %vm1532_vm8, %v1502_v4, %v4857_v45  ;;  %v8045_v45 = vld [vmem:[#allocation64_spill] sm:$0xff] }
 0x2db   : > { %v1568_v44 = vsel %vm1565_vm10, %v1535_v16, %v4939_v19 }
 0x2dc   : > { %3465 = vmatmul.msk.f32.gmra.mxu0 %vm1640_vm11, %v1600_v54  ;;  %v1601_v10 = vsel %vm1598_vm12, %v1568_v44, %v1281_v15  ;;  %v8041_v54 = vld [vmem:[#allocation62_spill] sm:$0xff] }
 0x2dd   : > { %v1372_v5 = vsel %vm1369_vm4, %v8042_v56, %v8041_v54  ;;  %v8047_v56 = vld [vmem:[#allocation68_spill] sm:$0xff] }
 0x2de   : > { %v1404_v28 = vsel %vm1401_vm6, %v1372_v5, %v8043_v13  ;;  %v8049_v13 = vld [vmem:[#allocation113_spill] sm:$0xff] }
 0x2df   : > { %v1437_v47 = vsel %vm1433_vm5, %v1404_v28, %v8044_v1  ;;  %v8050_v28 = vld [vmem:[#allocation135_spill] sm:$0xff] }
 0x2e0   : > { %v1470_v50 = vsel %vm1466_vm7, %v1437_v47, %v8045_v45  ;;  %v8052_v45 = vld [vmem:[#allocation155_spill] sm:$0xff] }
 0x2e1   : > { %v1503_v15 = vsel %vm1499_vm9, %v1470_v50, %v4727_v51  ;;  %v1373_v51 = vsel %vm1369_vm4, %v3682_v27, %v8047_v56  ;;  %v8053_v50 = vld [vmem:[#allocation166_spill] sm:$0xff] }
 0x2e2   : > { %v5121_v6 = vpop.permute.xlu1 %1288  ;;  %v5134_v19 = vpop.permute.xlu0 %1292  ;;  %v1536_v62 = vsel %vm1532_vm8, %v1503_v15, %v4819_v61  ;;  %v8048_v61 = vld [vmem:[#allocation106_spill] sm:$0xff] }
 0x2e3   : > { %v1569_v4 = vsel %vm1565_vm10, %v1536_v62, %v4977_v18  ;;  %v1405_v5 = vsel %vm1401_vm6, %v1373_v51, %v8048_v61  ;;  %v1303_v61 = vpop.permute.xlu2 %1302 }
 0x2e4   : > { %3466 = vmatmul.msk.f32.gmra.mxu0 %vm1640_vm11, %v1601_v10  ;;  %v1602_v44 = vsel %vm1598_vm12, %v1569_v4, %v1283_v38  ;;  %v8046_v10 = vld [vmem:[#allocation61_spill] sm:$0xff] }
 0x2e5   : > { %v1381_v54 = vsel %vm1369_vm4, %v3757_v2, %v8046_v10  ;;  %v8051_v38 = vld [vmem:[#allocation137_spill] sm:$0xff] }
 0x2e6   : > { %v1413_v18 = vsel %vm1401_vm6, %v1381_v54, %v8049_v13  ;;  %v1438_v47 = vsel %vm1433_vm5, %v1405_v5, %v8051_v38  ;;  %v8054_v5 = vld [vmem:[#allocation48_spill] sm:$0xff]  ;;  %v8055_v13 = vld [vmem:[#allocation81_spill] sm:$0xff] }
 0x2e7   : > { %v1446_v1 = vsel %vm1433_vm5, %v1413_v18, %v8050_v28  ;;  %v1471_v2 = vsel %vm1466_vm7, %v1438_v47, %v8052_v45  ;;  %v8057_v18 = vld [vmem:[#allocation115_spill] sm:$0xff]  ;;  %v8059_v38 = vld [vmem:[#allocation145_spill] sm:$0xff]  ;;  %v8060_v47 = vld [vmem:[#allocation60_spill] sm:$0xff] }
 0x2e8   : > { %v1479_v27 = vsel %vm1466_vm7, %v1446_v1, %v8053_v50  ;;  %v1504_v15 = vsel %vm1499_vm9, %v1471_v2, %v4737_v46  ;;  %v8058_v28 = vld [vmem:[#allocation139_spill] sm:$0xff] }
 0x2e9   : > { %v1512_v62 = vsel %vm1499_vm9, %v1479_v27, %v4763_v53 }
 0x2ea   : > { %v5144_v16 = vpop.permute.xlu1 %1294  ;;  %v1545_v4 = vsel %vm1532_vm8, %v1512_v62, %v4855_v8  ;;  %v5174_v10 = vpop.permute.xlu0 %1298  ;;  %v1374_v8 = vsel %vm1369_vm4, %v3653_v14, %v8054_v5 }
 0x2eb   : > { %v1578_v56 = vsel %vm1565_vm10, %v1545_v4, %v5013_v20  ;;  %v5228_v5 = vpop.permute.xlu2 %1308 }
 0x2ec   : > { %3467 = vmatmul.msk.f32.gmra.mxu0 %vm1640_vm11, %v1602_v44  ;;  %v1537_v44 = vsel %vm1532_vm8, %v1504_v15, %v4859_v9  ;;  %v1382_v9 = vsel %vm1369_vm4, %v3754_v63, %v8055_v13  ;;  %v8061_v63 = vld [vmem:[#allocation162_spill] sm:$0xff] }
 0x2ed   : > { %v1570_v54 = vsel %vm1565_vm10, %v1537_v44, %v4987_v37  ;;  %v8056_v37 = vld [vmem:[#allocation96_spill] sm:$0xff] }
 0x2ee   : > { %v1603_v46 = vsel %vm1598_vm12, %v1570_v54, %v1285_v48  ;;  %v1406_v20 = vsel %vm1401_vm6, %v1374_v8, %v8056_v37  ;;  %v1414_v48 = vsel %vm1401_vm6, %v1382_v9, %v8057_v18  ;;  %v8068_v9 = vld [vmem:[#allocation163_spill] sm:$0xff] }
 0x2ef   : > { %v1439_v1 = vsel %vm1433_vm5, %v1406_v20, %v8058_v28  ;;  %v1447_v14 = vsel %vm1433_vm5, %v1414_v48, %v8059_v38  ;;  %v8069_v37 = vld [vmem:[#allocation167_spill] sm:$0xff] }
 0x2f0   : > { %v1480_v45 = vsel %vm1466_vm7, %v1447_v14, %v8060_v47  ;;  %v1472_v2 = vsel %vm1466_vm7, %v1439_v1, %v8061_v63  ;;  %v8071_v63 = vld [vmem:[#allocation69_spill] sm:$0xff] }
 0x2f1   : > { %v1505_v50 = vsel %vm1499_vm9, %v1472_v2, %v4699_v0  ;;  %v1513_v27 = vsel %vm1499_vm9, %v1480_v45, %v4773_v39  ;;  %v8072_v2 = vld [vmem:[#allocation79_spill] sm:$0xff] }
 0x2f2   : > { %v1301_v51 = vpop.permute.xlu1 %1300  ;;  %v1538_v15 = vsel %vm1532_vm8, %v1505_v50, %v4869_v43  ;;  %v1546_v62 = vsel %vm1532_vm8, %v1513_v27, %v4895_v25  ;;  %v8063_v43 = vld [vmem:[#allocation83_spill] sm:$0xff]  ;;  %v8074_v50 = vld [vmem:[#allocation116_spill] sm:$0xff] }
 0x2f3   : > { %v1611_v53 = vsel %vm1598_vm12, %v1578_v56, %v1301_v51  ;;  %v1571_v4 = vsel %vm1565_vm10, %v1538_v15, %v4951_v59  ;;  %v1579_v44 = vsel %vm1565_vm10, %v1546_v62, %v5021_v17  ;;  %v1305_v56 = vpop.permute.xlu0 %1304  ;;  %v1383_v25 = vsel %vm1369_vm4, %v3783_v23, %v8063_v43  ;;  %v8064_v59 = vld [vmem:[#allocation105_spill] sm:$0xff]  ;;  %v8075_v15 = vld [vmem:[#allocation122_spill] sm:$0xff] }
 0x2f4   : > { %3468 = vmatmul.msk.f32.gmra.mxu0 %vm1640_vm11, %v1603_v46  ;;  %3476 = vmatmul.msk.f32.vlgmr.msra.gmra.mxu1 %vm1640_vm11, %v1611_v53  ;;  %v1604_v51 = vsel %vm1598_vm12, %v1571_v4, %v1287_v21  ;;  %v1612_v0 = vsel %vm1598_vm12, %v1579_v44, %v1303_v61  ;;  %v8062_v46 = vld [vmem:[#allocation52_spill] sm:$0xff]  ;;  %v1415_v17 = vsel %vm1401_vm6, %v1383_v25, %v8064_v59  ;;  %v8065_v53 = vld [vmem:[#allocation107_spill] sm:$0xff]  ;;  %v8066_v61 = vld [vmem:[#allocation129_spill] sm:$0xff]  ;;  %v5286_v59 = vpop.permute.xlu2 %1314 }
 0x2f5   : > { %v1375_v39 = vsel %vm1369_vm4, %v3679_v26, %v8062_v46  ;;  %v8067_v26 = vld [vmem:[#allocation39_spill] sm:$0xff]  ;;  %v8077_v44 = vld [vmem:[#allocation140_spill] sm:$0xff] }
 0x2f6   : > { %v1407_v21 = vsel %vm1401_vm6, %v1375_v39, %v8065_v53  ;;  %v1448_v13 = vsel %vm1433_vm5, %v1415_v17, %v8067_v26  ;;  %v8080_v39 = vld [vmem:[#allocation169_spill] sm:$0xff] }
 0x2f7   : > { %v1440_v8 = vsel %vm1433_vm5, %v1407_v21, %v8066_v61  ;;  %v1481_v20 = vsel %vm1466_vm7, %v1448_v13, %v8069_v37  ;;  %v8085_v37 = vld [vmem:[#allocation99_spill] sm:$0xff] }
 0x2f8   : > { %v1473_v23 = vsel %vm1466_vm7, %v1440_v8, %v8068_v9  ;;  %v1514_v18 = vsel %vm1499_vm9, %v1481_v20, %v4735_v12  ;;  %v8081_v9 = vld [vmem:[#allocation74_spill] sm:$0xff] }
 0x2f9   : > { %v1506_v48 = vsel %vm1499_vm9, %v1473_v23, %v4739_v35  ;;  %v1547_v1 = vsel %vm1532_vm8, %v1514_v18, %v4905_v32  ;;  %v8070_v35 = vld [vmem:[#allocation67_spill] sm:$0xff]  ;;  %v1376_v32 = vsel %vm1369_vm4, %v3673_v24, %v8071_v63  ;;  %v8076_v24 = vld [vmem:[#allocation138_spill] sm:$0xff]  ;;  %v8082_v23 = vld [vmem:[#allocation84_spill] sm:$0xff] }
 0x2fa   : > { %v1307_v54 = vpop.permute.xlu1 %1306  ;;  %v1539_v28 = vsel %vm1532_vm8, %v1506_v48, %v4831_v30  ;;  %v1580_v38 = vsel %vm1565_vm10, %v1547_v1, %v4991_v34  ;;  %v1384_v30 = vsel %vm1369_vm4, %v3792_v33, %v8070_v35  ;;  %v1390_v34 = vsel %vm1369_vm4, %v3861_v41, %v8072_v2  ;;  %v8086_v20 = vld [vmem:[#allocation118_spill] sm:$0xff] }
 0x2fb   : > { %v1572_v14 = vsel %vm1565_vm10, %v1539_v28, %v4989_v57  ;;  %v1613_v45 = vsel %vm1598_vm12, %v1580_v38, %v1305_v56  ;;  %v8073_v57 = vld [vmem:[#allocation109_spill] sm:$0xff]  ;;  %v1416_v27 = vsel %vm1401_vm6, %v1384_v30, %v8074_v50  ;;  %v1422_v33 = vsel %vm1401_vm6, %v1390_v34, %v8075_v15  ;;  %v5272_v62 = vpop.permute.xlu0 %1310  ;;  %v8078_v56 = vld [vmem:[#allocation31_spill] sm:$0xff]  ;;  %v8089_v1 = vld [vmem:[#allocation146_spill] sm:$0xff] }
 0x2fc   : > { %3469 = vmatmul.msk.f32.gmra.mxu0 %vm1640_vm11, %v1604_v51  ;;  %3477 = vmatmul.msk.f32.gmra.mxu1 %vm1640_vm11, %v1612_v0  ;;  %v1605_v12 = vsel %vm1598_vm12, %v1572_v14, %v5121_v6  ;;  %v1408_v6 = vsel %vm1401_vm6, %v1376_v32, %v8073_v57  ;;  %v1449_v4 = vsel %vm1433_vm5, %v1416_v27, %v8076_v24  ;;  %v8079_v0 = vld [vmem:[#allocation51_spill] sm:$0xff]  ;;  %v8090_v14 = vld [vmem:[#allocation154_spill] sm:$0xff]  ;;  %v8092_v30 = vld [vmem:[#allocation164_spill] sm:$0xff] }
 0x2fd   : > { %v1441_v41 = vsel %vm1433_vm5, %v1408_v6, %v8077_v44  ;;  %v1455_v51 = vsel %vm1433_vm5, %v1422_v33, %v8078_v56  ;;  %v1482_v43 = vsel %vm1466_vm7, %v1449_v4, %v8080_v39  ;;  %v8093_v2 = vld [vmem:[#allocation78_spill] sm:$0xff]  ;;  %v8094_v57 = vld [vmem:[#allocation180_spill] sm:$0xff]  ;;  %v8095_v50 = vld [vmem:[#allocation189_spill] sm:$0xff]  ;;  %v1321_v56 = vpop.permute.xlu2 %1320 }
 0x2fe   : > { %v1474_v46 = vsel %vm1466_vm7, %v1441_v41, %v8079_v0  ;;  %v1488_v25 = vsel %vm1466_vm7, %v1455_v51, %v4677_v31  ;;  %v1515_v53 = vsel %vm1499_vm9, %v1482_v43, %v4775_v7  ;;  %v8096_v15 = vld [vmem:[#allocation193_spill] sm:$0xff]  ;;  %v8097_v24 = vld [vmem:[#allocation16_spill] sm:$0xff]  ;;  %v8098_v44 = vld [vmem:[#allocation22_spill] sm:$0xff] }
 0x2ff   : > { %v1507_v17 = vsel %vm1499_vm9, %v1474_v46, %v4749_v58  ;;  %v1521_v21 = vsel %vm1499_vm9, %v1488_v25, %v4799_v3  ;;  %v1548_v61 = vsel %vm1532_vm8, %v1515_v53, %v4867_v22  ;;  %v8099_v51 = vld [vmem:[#allocation42_spill] sm:$0xff]  ;;  %v8101_v43 = vld [vmem:[#allocation71_spill] sm:$0xff] }
 0x300   : > { %v1540_v8 = vsel %vm1532_vm8, %v1507_v17, %v4871_v40  ;;  %v1554_v31 = vsel %vm1532_vm8, %v1521_v21, %v4891_v42  ;;  %v1581_v58 = vsel %vm1565_vm10, %v1548_v61, %v5023_v55  ;;  %v1377_v42 = vsel %vm1369_vm4, %v3724_v49, %v8081_v9  ;;  %v8083_v55 = vld [vmem:[#allocation92_spill] sm:$0xff]  ;;  %v8100_v46 = vld [vmem:[#allocation54_spill] sm:$0xff] }
 0x301   : > { %v1573_v26 = vsel %vm1565_vm10, %v1540_v8, %v4999_v11  ;;  %v1587_v7 = vsel %vm1565_vm10, %v1554_v31, %v5055_v60  ;;  %v1614_v22 = vsel %vm1598_vm12, %v1581_v58, %v1307_v54  ;;  %v1385_v11 = vsel %vm1369_vm4, %v3801_v36, %v8082_v23  ;;  %v8084_v60 = vld [vmem:[#allocation25_spill] sm:$0xff]  ;;  %v8087_v49 = vld [vmem:[#allocation124_spill] sm:$0xff]  ;;  %v8088_v36 = vld [vmem:[#allocation142_spill] sm:$0xff] }
 0x302   : > { %v5250_v47 = vpop.permute.xlu1 %1312  ;;  %v1606_v3 = vsel %vm1598_vm12, %v1573_v26, %v5113_v29  ;;  %v1391_v29 = vsel %vm1369_vm4, %v8084_v60, %v8083_v55  ;;  %v1409_v54 = vsel %vm1401_vm6, %v1377_v42, %v8085_v37  ;;  %v1417_v18 = vsel %vm1401_vm6, %v1385_v11, %v8086_v20  ;;  %v8102_v17 = vld [vmem:[#allocation196_spill] sm:$0xff]  ;;  %v8103_v8 = vld [vmem:[#allocation57_spill] sm:$0xff]  ;;  %v8110_v42 = vld [vmem:[#allocation110_spill] sm:$0xff] }
 0x303   : > { %v1423_v48 = vsel %vm1401_vm6, %v1391_v29, %v8087_v49  ;;  %v1442_v28 = vsel %vm1433_vm5, %v1409_v54, %v8088_v36  ;;  %v1450_v38 = vsel %vm1433_vm5, %v1417_v18, %v8089_v1  ;;  %v5338_v32 = vpop.permute.xlu0 %1316  ;;  %v8104_v31 = vld [vmem:[#allocation5_spill] sm:$0xff]  ;;  %v8105_v58 = vld [vmem:[#allocation88_spill] sm:$0xff]  ;;  %v8111_v11 = vld [vmem:[#allocation114_spill] sm:$0xff] }
 0x304   : > { %3470 = vmatmul.msk.f32.gmra.mxu0 %vm1640_vm11, %v1605_v12  ;;  %3478 = vmatmul.msk.f32.gmra.mxu1 %vm1640_vm11, %v1613_v45  ;;  %v1456_v12 = vsel %vm1433_vm5, %v1423_v48, %v8090_v14  ;;  %v8091_v45 = vld [vmem:[#allocation66_spill] sm:$0xff]  ;;  %v1475_v63 = vsel %vm1466_vm7, %v1442_v28, %v8092_v30  ;;  %v1378_v26 = vsel %vm1369_vm4, %v8104_v31, %v8103_v8  ;;  %v8109_v9 = vld [vmem:[#allocation108_spill] sm:$0xff]  ;;  %v8114_v20 = vld [vmem:[#allocation45_spill] sm:$0xff] }
 0x305   : > { %v1483_v35 = vsel %vm1466_vm7, %v1450_v38, %v8091_v45  ;;  %v1489_v34 = vsel %vm1466_vm7, %v1456_v12, %v8093_v2  ;;  %v1508_v6 = vsel %vm1499_vm9, %v1475_v63, %v8094_v57  ;;  %v1410_v23 = vsel %vm1401_vm6, %v1378_v26, %v8110_v42  ;;  %v8112_v60 = vld [vmem:[#allocation132_spill] sm:$0xff]  ;;  %v8116_v36 = vld [vmem:[#allocation170_spill] sm:$0xff]  ;;  %v8117_v1 = vld [vmem:[#allocation175_spill] sm:$0xff] }
 0x306   : > { %v1516_v27 = vsel %vm1499_vm9, %v1483_v35, %v8095_v50  ;;  %v1522_v33 = vsel %vm1499_vm9, %v1489_v34, %v8096_v15  ;;  %v1541_v4 = vsel %vm1532_vm8, %v1508_v6, %v8097_v24  ;;  %v1443_v29 = vsel %vm1433_vm5, %v1410_v23, %v8112_v60  ;;  %v8113_v37 = vld [vmem:[#allocation148_spill] sm:$0xff]  ;;  %v8118_v14 = vld [vmem:[#allocation183_spill] sm:$0xff]  ;;  %v8132_v8 = vld [vmem:[#allocation30_spill] sm:$0xff] }
 0x307   : > { %v1549_v41 = vsel %vm1532_vm8, %v1516_v27, %v8098_v44  ;;  %v1555_v0 = vsel %vm1532_vm8, %v1522_v33, %v8099_v51  ;;  %v1574_v39 = vsel %vm1565_vm10, %v1541_v4, %v8100_v46  ;;  %v8115_v49 = vld [vmem:[#allocation76_spill] sm:$0xff]  ;;  %v8120_v30 = vld [vmem:[#allocation187_spill] sm:$0xff]  ;;  %v8125_v4 = vld [vmem:[#allocation58_spill] sm:$0xff] }
 0x308   : > { %v1582_v25 = vsel %vm1565_vm10, %v1549_v41, %v8101_v43  ;;  %v1588_v53 = vsel %vm1565_vm10, %v1555_v0, %v8102_v17  ;;  %v1607_v21 = vsel %vm1598_vm12, %v1574_v39, %v5134_v19  ;;  %v1476_v48 = vsel %vm1466_vm7, %v1443_v29, %v8115_v49  ;;  %v8119_v45 = vld [vmem:[#allocation184_spill] sm:$0xff]  ;;  %v8122_v57 = vld [vmem:[#allocation27_spill] sm:$0xff]  ;;  %v8126_v41 = vld [vmem:[#allocation85_spill] sm:$0xff] }
 0x309   : > { %v1615_v61 = vsel %vm1598_vm12, %v1582_v25, %v5228_v5  ;;  %v1509_v35 = vsel %vm1499_vm9, %v1476_v48, %v8119_v45  ;;  %v8121_v2 = vld [vmem:[#allocation12_spill] sm:$0xff]  ;;  %v8123_v27 = vld [vmem:[#allocation43_spill] sm:$0xff]  ;;  %v8127_v46 = vld [vmem:[#allocation73_spill] sm:$0xff] }
 0x30a   : > { %v1319_v13 = vpop.permute.xlu1 %1318  ;;  %v1542_v34 = vsel %vm1532_vm8, %v1509_v35, %v8121_v2  ;;  %v8124_v33 = vld [vmem:[#allocation59_spill] sm:$0xff]  ;;  %v8133_v31 = vld [vmem:[#allocation112_spill] sm:$0xff]  ;;  %v8144_v49 = vld [vmem:[#allocation194_spill] sm:$0xff] }
 0x30b   : > { %v1620_v40 = vsel %vm1598_vm12, %v1587_v7, %v1319_v13  ;;  %v8106_v7 = vld [vmem:[#allocation14_spill] sm:$0xff]  ;;  %v1323_v50 = vpop.permute.xlu0 %1322  ;;  %v1575_v44 = vsel %vm1565_vm10, %v1542_v34, %v8125_v4  ;;  %v8128_v39 = vld [vmem:[#allocation19_spill] sm:$0xff]  ;;  %v8141_v60 = vld [vmem:[#allocation176_spill] sm:$0xff] }
 0x30c   : > { %3471 = vmatmul.msk.f32.gmra.mxu0 %vm1640_vm11, %v1606_v3  ;;  %3479 = vmatmul.msk.f32.gmra.mxu1 %vm1640_vm11, %v1614_v22  ;;  %v1386_v13 = vsel %vm1369_vm4, %v8106_v7, %v8105_v58  ;;  %v1621_v3 = vsel %vm1598_vm12, %v1588_v53, %v1321_v56  ;;  %v8107_v22 = vld [vmem:[#allocation94_spill] sm:$0xff]  ;;  %v1608_v51 = vsel %vm1598_vm12, %v1575_v44, %v5144_v16  ;;  %v8129_v25 = vld [vmem:[#allocation75_spill] sm:$0xff]  ;;  %v8135_v7 = vld [vmem:[#allocation125_spill] sm:$0xff] }
 0x30d   : > { %3485 = vmatmul.msk.f32.vlgmr.msra.gmra.mxu3 %vm1640_vm11, %v1620_v40  ;;  %v8108_v40 = vld [vmem:[#allocation24_spill] sm:$0xff]  ;;  %v1418_v5 = vsel %vm1401_vm6, %v1386_v13, %v8109_v9  ;;  %v1387_v43 = vsel %vm1369_vm4, %v8128_v39, %v8127_v46  ;;  %v8130_v17 = vld [vmem:[#allocation7_spill] sm:$0xff]  ;;  %v8138_v9 = vld [vmem:[#allocation38_spill] sm:$0xff] }
 0x30e   : > { %v1392_v19 = vsel %vm1369_vm4, %v8108_v40, %v8107_v22  ;;  %v1451_v54 = vsel %vm1433_vm5, %v1418_v5, %v8113_v37  ;;  %v1379_v53 = vsel %vm1369_vm4, %v8130_v17, %v8129_v25  ;;  %v8134_v26 = vld [vmem:[#allocation119_spill] sm:$0xff]  ;;  %v8142_v37 = vld [vmem:[#allocation186_spill] sm:$0xff]  ;;  %v8148_v35 = vld [vmem:[#allocation65_spill] sm:$0xff] }
 0x30f   : > { %v1424_v55 = vsel %vm1401_vm6, %v1392_v19, %v8111_v11  ;;  %v1484_v28 = vsel %vm1466_vm7, %v1451_v54, %v8116_v36  ;;  %v1419_v58 = vsel %vm1401_vm6, %v1387_v43, %v8134_v26  ;;  %v8137_v40 = vld [vmem:[#allocation143_spill] sm:$0xff]  ;;  %v8140_v11 = vld [vmem:[#allocation172_spill] sm:$0xff]  ;;  %v8150_v34 = vld [vmem:[#allocation197_spill] sm:$0xff] }
 0x310   : > { %v1457_v18 = vsel %vm1433_vm5, %v1424_v55, %v8114_v20  ;;  %v1517_v12 = vsel %vm1499_vm9, %v1484_v28, %v8118_v14  ;;  %v8139_v42 = vld [vmem:[#allocation159_spill] sm:$0xff]  ;;  %v8143_v20 = vld [vmem:[#allocation190_spill] sm:$0xff]  ;;  %v8158_v46 = vld [vmem:[#allocation121_spill] sm:$0xff] }
 0x311   : > { %v1490_v38 = vsel %vm1466_vm7, %v1457_v18, %v8117_v1  ;;  %v1550_v6 = vsel %vm1532_vm8, %v1517_v12, %v8122_v57  ;;  %v8145_v36 = vld [vmem:[#allocation15_spill] sm:$0xff]  ;;  %v8146_v1 = vld [vmem:[#allocation17_spill] sm:$0xff]  ;;  %v8154_v4 = vld [vmem:[#allocation18_spill] sm:$0xff] }
 0x312   : > { %v1523_v63 = vsel %vm1499_vm9, %v1490_v38, %v8120_v30  ;;  %v1583_v24 = vsel %vm1565_vm10, %v1550_v6, %v8124_v33  ;;  %v1325_v14 = vpop.permute.xlu1 %1324  ;;  %v8147_v12 = vld [vmem:[#allocation21_spill] sm:$0xff]  ;;  %v8159_v43 = vld [vmem:[#allocation127_spill] sm:$0xff]  ;;  %v8160_v17 = vld [vmem:[#allocation144_spill] sm:$0xff] }
 0x313   : > { %v1556_v15 = vsel %vm1532_vm8, %v1523_v63, %v8123_v27  ;;  %v1616_v0 = vsel %vm1598_vm12, %v1583_v24, %v5272_v62  ;;  %v1411_v62 = vsel %vm1401_vm6, %v1379_v53, %v8133_v31  ;;  %v8149_v63 = vld [vmem:[#allocation77_spill] sm:$0xff]  ;;  %v8151_v27 = vld [vmem:[#allocation80_spill] sm:$0xff] }
 0x314   : > { %3472 = vmatmul.msk.f32.gmra.mxu0 %vm1640_vm11, %v1607_v21  ;;  %3480 = vmatmul.msk.f32.gmra.mxu1 %vm1640_vm11, %v1615_v61  ;;  %v1589_v56 = vsel %vm1565_vm10, %v1556_v15, %v8126_v41  ;;  %v8131_v61 = vld [vmem:[#allocation82_spill] sm:$0xff]  ;;  %v1444_v19 = vsel %vm1433_vm5, %v1411_v62, %v8137_v40  ;;  %v8153_v24 = vld [vmem:[#allocation89_spill] sm:$0xff]  ;;  %v8163_v31 = vld [vmem:[#allocation72_spill] sm:$0xff] }
 0x315   : > { %3486 = vmatmul.msk.f32.gmra.mxu3 %vm1640_vm11, %v1621_v3  ;;  %v1622_v21 = vsel %vm1598_vm12, %v1589_v56, %v1323_v50  ;;  %v1393_v16 = vsel %vm1369_vm4, %v8132_v8, %v8131_v61  ;;  %v8136_v3 = vld [vmem:[#allocation141_spill] sm:$0xff]  ;;  %v1477_v23 = vsel %vm1466_vm7, %v1444_v19, %v8139_v42  ;;  %v8152_v15 = vld [vmem:[#allocation6_spill] sm:$0xff]  ;;  %v1388_v44 = vsel %vm1369_vm4, %v8154_v4, %v8153_v24  ;;  %v8155_v56 = vld [vmem:[#allocation95_spill] sm:$0xff] }
 0x316   : > { %v1425_v13 = vsel %vm1401_vm6, %v1393_v16, %v8135_v7  ;;  %v1452_v22 = vsel %vm1433_vm5, %v1419_v58, %v8136_v3  ;;  %v1510_v54 = vsel %vm1499_vm9, %v1477_v23, %v8142_v37  ;;  %v1380_v33 = vsel %vm1369_vm4, %v8152_v15, %v8151_v27  ;;  %v8162_v8 = vld [vmem:[#allocation46_spill] sm:$0xff]  ;;  %v8164_v26 = vld [vmem:[#allocation165_spill] sm:$0xff]  ;;  %v8165_v7 = vld [vmem:[#allocation168_spill] sm:$0xff] }
 0x317   : > { %v1458_v5 = vsel %vm1433_vm5, %v1425_v13, %v8138_v9  ;;  %v1485_v55 = vsel %vm1466_vm7, %v1452_v22, %v8140_v11  ;;  %v1543_v38 = vsel %vm1532_vm8, %v1510_v54, %v8146_v1  ;;  %v1420_v39 = vsel %vm1401_vm6, %v1388_v44, %v8158_v46  ;;  %v8166_v3 = vld [vmem:[#allocation182_spill] sm:$0xff]  ;;  %v8167_v40 = vld [vmem:[#allocation192_spill] sm:$0xff]  ;;  %v8172_v54 = vld [vmem:[#allocation55_spill] sm:$0xff] }
 0x318   : > { %v1491_v29 = vsel %vm1466_vm7, %v1458_v5, %v8141_v60  ;;  %v1518_v18 = vsel %vm1499_vm9, %v1485_v55, %v8143_v20  ;;  %v1576_v30 = vsel %vm1565_vm10, %v1543_v38, %v8148_v35  ;;  %v8168_v9 = vld [vmem:[#allocation8_spill] sm:$0xff]  ;;  %v1327_v60 = vpop.permute.xlu2 %1326  ;;  %v8175_v38 = vld [vmem:[#allocation91_spill] sm:$0xff]  ;;  %v8177_v35 = vld [vmem:[#allocation97_spill] sm:$0xff] }
 0x319   : > { %v1524_v48 = vsel %vm1499_vm9, %v1491_v29, %v8144_v49  ;;  %v1551_v28 = vsel %vm1532_vm8, %v1518_v18, %v8145_v36  ;;  %v1609_v6 = vsel %vm1598_vm12, %v1576_v30, %v5140_v52  ;;  %v8169_v42 = vld [vmem:[#allocation20_spill] sm:$0xff]  ;;  %v8171_v29 = vld [vmem:[#allocation150_spill] sm:$0xff]  ;;  %v8178_v30 = vld [vmem:[#allocation35_spill] sm:$0xff] }
 0x31a   : > { %v1557_v45 = vsel %vm1532_vm8, %v1524_v48, %v8147_v12  ;;  %v1584_v2 = vsel %vm1565_vm10, %v1551_v28, %v8149_v63  ;;  %v8170_v11 = vld [vmem:[#allocation28_spill] sm:$0xff]  ;;  %v8173_v18 = vld [vmem:[#allocation86_spill] sm:$0xff]  ;;  %v8174_v48 = vld [vmem:[#allocation199_spill] sm:$0xff]  ;;  %v1395_v63 = vsel %vm1369_vm4, %v8178_v30, %v8177_v35 }
 0x31b   : > { %v1590_v57 = vsel %vm1565_vm10, %v1557_v45, %v8150_v34  ;;  %v1617_v50 = vsel %vm1598_vm12, %v1584_v2, %v5250_v47  ;;  %v8179_v2 = vld [vmem:[#allocation111_spill] sm:$0xff]  ;;  %v8183_v15 = vld [vmem:[#allocation173_spill] sm:$0xff]  ;;  %v8207_v35 = vld [vmem:[#allocation100_spill] sm:$0xff] }
 0x31c   : > { %3473 = vmatmul.msk.f32.gmra.mxu0 %vm1640_vm11, %v1608_v51  ;;  %3481 = vmatmul.msk.f32.gmra.mxu1 %vm1640_vm11, %v1616_v0  ;;  %v1623_v41 = vsel %vm1598_vm12, %v1590_v57, %v1325_v14  ;;  %v8156_v51 = vld [vmem:[#allocation29_spill] sm:$0xff]  ;;  %v8157_v0 = vld [vmem:[#allocation102_spill] sm:$0xff]  ;;  %v8176_v14 = vld [vmem:[#allocation23_spill] sm:$0xff] }
 0x31d   : > { %3487 = vmatmul.msk.f32.gmra.mxu3 %vm1640_vm11, %v1622_v21  ;;  %v1394_v52 = vsel %vm1369_vm4, %v8156_v51, %v8155_v56  ;;  %v1412_v47 = vsel %vm1401_vm6, %v1380_v33, %v8157_v0  ;;  %v8161_v21 = vld [vmem:[#allocation149_spill] sm:$0xff]  ;;  %v1389_v12 = vsel %vm1369_vm4, %v8176_v14, %v8175_v38  ;;  %v8186_v56 = vld [vmem:[#allocation188_spill] sm:$0xff]  ;;  %v8188_v46 = vld [vmem:[#allocation151_spill] sm:$0xff] }
 0x31e   : > { %v1426_v25 = vsel %vm1401_vm6, %v1394_v52, %v8159_v43  ;;  %v1445_v53 = vsel %vm1433_vm5, %v1412_v47, %v8160_v17  ;;  %v1453_v61 = vsel %vm1433_vm5, %v1420_v39, %v8161_v21  ;;  %v8181_v57 = vld [vmem:[#allocation153_spill] sm:$0xff]  ;;  %v1329_v47 = vpop.permute.xlu0 %1328  ;;  %v8189_v43 = vld [vmem:[#allocation70_spill] sm:$0xff]  ;;  %v8190_v17 = vld [vmem:[#allocation195_spill] sm:$0xff] }
 0x31f   : > { %v1459_v16 = vsel %vm1433_vm5, %v1426_v25, %v8162_v8  ;;  %v1486_v62 = vsel %vm1466_vm7, %v1453_v61, %v8163_v31  ;;  %v1478_v58 = vsel %vm1466_vm7, %v1445_v53, %v8164_v26  ;;  %v8184_v24 = vld [vmem:[#allocation177_spill] sm:$0xff]  ;;  %v8191_v8 = vld [vmem:[#allocation87_spill] sm:$0xff]  ;;  %v8208_v30 = vld [vmem:[#allocation36_spill] sm:$0xff] }
 0x320   : > { %v1492_v13 = vsel %vm1466_vm7, %v1459_v16, %v8165_v7  ;;  %v1511_v22 = vsel %vm1499_vm9, %v1478_v58, %v8166_v3  ;;  %v1519_v19 = vsel %vm1499_vm9, %v1486_v62, %v8167_v40  ;;  %v8185_v44 = vld [vmem:[#allocation185_spill] sm:$0xff]  ;;  %v8192_v16 = vld [vmem:[#allocation34_spill] sm:$0xff]  ;;  %v8193_v62 = vld [vmem:[#allocation128_spill] sm:$0xff]  ;;  %v1331_v40 = vpop.permute.xlu1 %1330 }
 0x321   : > { %v1525_v5 = vsel %vm1499_vm9, %v1492_v13, %v8168_v9  ;;  %v1544_v23 = vsel %vm1532_vm8, %v1511_v22, %v8169_v42  ;;  %v1552_v55 = vsel %vm1532_vm8, %v1519_v19, %v8170_v11  ;;  %v8187_v52 = vld [vmem:[#allocation33_spill] sm:$0xff]  ;;  %v1396_v31 = vsel %vm1369_vm4, %v8192_v16, %v8191_v8  ;;  %v8194_v58 = vld [vmem:[#allocation147_spill] sm:$0xff]  ;;  %v8195_v13 = vld [vmem:[#allocation178_spill] sm:$0xff] }
 0x322   : > { %v1558_v37 = vsel %vm1532_vm8, %v1525_v5, %v8171_v29  ;;  %v1577_v20 = vsel %vm1565_vm10, %v1544_v23, %v8172_v54  ;;  %v1585_v49 = vsel %vm1565_vm10, %v1552_v55, %v8173_v18  ;;  %v1428_v26 = vsel %vm1401_vm6, %v1396_v31, %v8193_v62  ;;  %v8197_v19 = vld [vmem:[#allocation26_spill] sm:$0xff]  ;;  %v8198_v5 = vld [vmem:[#allocation200_spill] sm:$0xff]  ;;  %v8200_v55 = vld [vmem:[#allocation37_spill] sm:$0xff] }
 0x323   : > { %v1591_v36 = vsel %vm1565_vm10, %v1558_v37, %v8174_v48  ;;  %v1610_v28 = vsel %vm1598_vm12, %v1577_v20, %v5174_v10  ;;  %v1618_v1 = vsel %vm1598_vm12, %v1585_v49, %v5286_v59  ;;  %v1421_v10 = vsel %vm1401_vm6, %v1389_v12, %v8179_v2  ;;  %v8180_v59 = vld [vmem:[#allocation117_spill] sm:$0xff]  ;;  %v8199_v11 = vld [vmem:[#allocation98_spill] sm:$0xff]  ;;  %v8203_v18 = vld [vmem:[#allocation171_spill] sm:$0xff] }
 0x324   : > { %3474 = vmatmul.msk.f32.gmra.mxu0 %vm1640_vm11, %v1609_v6  ;;  %3482 = vmatmul.msk.f32.gmra.mxu1 %vm1640_vm11, %v1617_v50  ;;  %v1624_v45 = vsel %vm1598_vm12, %v1591_v36, %v1327_v60  ;;  %v1427_v34 = vsel %vm1401_vm6, %v1395_v63, %v8180_v59  ;;  %v1454_v6 = vsel %vm1433_vm5, %v1421_v10, %v8181_v57  ;;  %v8182_v50 = vld [vmem:[#allocation156_spill] sm:$0xff]  ;;  %v8201_v29 = vld [vmem:[#allocation130_spill] sm:$0xff]  ;;  %v8202_v54 = vld [vmem:[#allocation157_spill] sm:$0xff] }
 0x325   : > { %3488 = vmatmul.msk.f32.gmra.mxu3 %vm1640_vm11, %v1623_v41  ;;  %v1460_v27 = vsel %vm1433_vm5, %v1427_v34, %v8182_v50  ;;  %v1487_v33 = vsel %vm1466_vm7, %v1454_v6, %v8183_v15  ;;  %v1461_v7 = vsel %vm1433_vm5, %v1428_v26, %v8194_v58  ;;  %v1397_v60 = vsel %vm1369_vm4, %v8200_v55, %v8199_v11  ;;  %v8204_v48 = vld [vmem:[#allocation10_spill] sm:$0xff]  ;;  %v8206_v14 = vld [vmem:[#allocation201_spill] sm:$0xff]  ;;  %v8209_v2 = vld [vmem:[#allocation120_spill] sm:$0xff] }
 0x326   : > { %v1493_v4 = vsel %vm1466_vm7, %v1460_v27, %v8184_v24  ;;  %v1520_v41 = vsel %vm1499_vm9, %v1487_v33, %v8185_v44  ;;  %v1494_v3 = vsel %vm1466_vm7, %v1461_v7, %v8195_v13  ;;  %v1429_v37 = vsel %vm1401_vm6, %v1397_v60, %v8201_v29  ;;  %v8210_v59 = vld [vmem:[#allocation53_spill] sm:$0xff]  ;;  %v8211_v57 = vld [vmem:[#allocation179_spill] sm:$0xff]  ;;  %v1335_v15 = vpop.permute.xlu0 %1334  ;;  %v8213_v33 = vld [vmem:[#allocation50_spill] sm:$0xff] }
 0x327   : > { %v1526_v51 = vsel %vm1499_vm9, %v1493_v4, %v8186_v56  ;;  %v1553_v0 = vsel %vm1532_vm8, %v1520_v41, %v8187_v52  ;;  %v1462_v20 = vsel %vm1433_vm5, %v1429_v37, %v8202_v54  ;;  %v1398_v63 = vsel %vm1369_vm4, %v8208_v30, %v8207_v35  ;;  %v8212_v50 = vld [vmem:[#allocation191_spill] sm:$0xff]  ;;  %v8214_v4 = vld [vmem:[#allocation198_spill] sm:$0xff]  ;;  %v8221_v16 = vld [vmem:[#allocation32_spill] sm:$0xff] }
 0x328   : > { %v1559_v39 = vsel %vm1532_vm8, %v1526_v51, %v8188_v46  ;;  %v1586_v25 = vsel %vm1565_vm10, %v1553_v0, %v8189_v43  ;;  %v1495_v49 = vsel %vm1466_vm7, %v1462_v20, %v8203_v18  ;;  %v1430_v10 = vsel %vm1401_vm6, %v1398_v63, %v8209_v2  ;;  %v8215_v56 = vld [vmem:[#allocation90_spill] sm:$0xff]  ;;  %v8216_v51 = vld [vmem:[#allocation41_spill] sm:$0xff]  ;;  %v8217_v0 = vld [vmem:[#allocation131_spill] sm:$0xff] }
 0x329   : > { %v1592_v53 = vsel %vm1565_vm10, %v1559_v39, %v8190_v17  ;;  %v1619_v21 = vsel %vm1598_vm12, %v1586_v25, %v5338_v32  ;;  %v8196_v32 = vld [vmem:[#allocation9_spill] sm:$0xff]  ;;  %v1528_v36 = vsel %vm1499_vm9, %v1495_v49, %v8204_v48  ;;  %v1463_v34 = vsel %vm1433_vm5, %v1430_v10, %v8210_v59  ;;  %v5621_v46 = vld [vmem:[%s7477_s2] ss:$0 sm:$0xff]  ;;  %v8218_v39 = vld [vmem:[#allocation152_spill] sm:$0xff] }
 0x32a   : > { %v1625_v61 = vsel %vm1598_vm12, %v1592_v53, %v1329_v47  ;;  %v1527_v22 = vsel %vm1499_vm9, %v1494_v3, %v8196_v32  ;;  %v1496_v6 = vsel %vm1466_vm7, %v1463_v34, %v8211_v57  ;;  %v1399_v52 = vsel %vm1369_vm4, %v8216_v51, %v8215_v56  ;;  %v8219_v25 = vld [vmem:[#allocation181_spill] sm:$0xff]  ;;  %v8220_v53 = vld [vmem:[#allocation11_spill] sm:$0xff]  ;;  %v8222_v26 = vld [vmem:[#allocation202_spill] sm:$0xff] }
 0x32b   : > { %v1560_v9 = vsel %vm1532_vm8, %v1527_v22, %v8197_v19  ;;  %v1529_v27 = vsel %vm1499_vm9, %v1496_v6, %v8212_v50  ;;  %v1431_v47 = vsel %vm1401_vm6, %v1399_v52, %v8217_v0  ;;  %v8223_v13 = vld [vmem:[#allocation101_spill] sm:$0xff]  ;;  %v8224_v3 = vld [vmem:[#allocation40_spill] sm:$0xff] }
 0x32c   : > { %3475 = vmatmul.msk.f32.gmra.mxu0 %vm1640_vm11, %v1610_v28  ;;  %3483 = vmatmul.msk.f32.gmra.mxu1 %vm1640_vm11, %v1618_v1  ;;  %v1593_v42 = vsel %vm1565_vm10, %v1560_v9, %v8198_v5  ;;  %v1333_v28 = vpop.permute.xlu2 %1332  ;;  %v8205_v1 = vld [vmem:[#allocation49_spill] sm:$0xff]  ;;  %v1562_v24 = vsel %vm1532_vm8, %v1529_v27, %v8213_v33  ;;  %v1464_v43 = vsel %vm1433_vm5, %v1431_v47, %v8218_v39  ;;  %v8226_v9 = vld [vmem:[#allocation158_spill] sm:$0xff] }
 0x32d   : > { %3489 = vmatmul.msk.f32.gmra.mxu3 %vm1640_vm11, %v1624_v45  ;;  %v1626_v23 = vsel %vm1598_vm12, %v1593_v42, %v1331_v40  ;;  %v1561_v38 = vsel %vm1532_vm8, %v1528_v36, %v8205_v1  ;;  %v1595_v44 = vsel %vm1565_vm10, %v1562_v24, %v8214_v4  ;;  %v1497_v17 = vsel %vm1466_vm7, %v1464_v43, %v8219_v25  ;;  %v8225_v22 = vld [vmem:[#allocation133_spill] sm:$0xff]  ;;  %v8227_v42 = vld [vmem:[#allocation174_spill] sm:$0xff] }
 0x32e   : > { %v1594_v12 = vsel %vm1565_vm10, %v1561_v38, %v8206_v14  ;;  %v1628_v41 = vsel %vm1598_vm12, %v1595_v44, %v1335_v15  ;;  %v1400_v32 = vsel %vm1369_vm4, %v8224_v3, %v8223_v13  ;;  %v8228_v11 = vld [vmem:[#allocation13_spill] sm:$0xff] }
 0x32f   : > { %v1627_v45 = vsel %vm1598_vm12, %v1594_v12, %v1333_v28  ;;  %v1432_v40 = vsel %vm1401_vm6, %v1400_v32, %v8225_v22 }
 0x330   : > { %v1465_v5 = vsel %vm1433_vm5, %v1432_v40, %v8226_v9 }
 0x334   : > { %3484 = vmatmul.msk.f32.gmra.mxu1 %vm1640_vm11, %v1619_v21  ;;  %v1530_v21 = vsel %vm1499_vm9, %v1497_v17, %v8220_v53 }
 0x335   : > { %3490 = vmatmul.msk.f32.gmra.mxu3 %vm1640_vm11, %v1625_v61  ;;  %v1337_v61 = vpop.permute.xlu1 %1336  ;;  %v1563_v31 = vsel %vm1532_vm8, %v1530_v21, %v8221_v16 }
 0x336   : > { %v1596_v58 = vsel %vm1565_vm10, %v1563_v31, %v8222_v26 }
 0x337   : > { %v1629_v7 = vsel %vm1598_vm12, %v1596_v58, %v1337_v61 }
 0x33d   : > { %3491 = vmatmul.msk.f32.gmra.mxu3 %vm1640_vm11, %v1626_v23  ;;  %v1498_v23 = vsel %vm1466_vm7, %v1465_v5, %v8227_v42 }
 0x33e   : > { %v1531_v55 = vsel %vm1499_vm9, %v1498_v23, %v8228_v11 }
 0x33f   : > { %v1564_v29 = vsel %vm1532_vm8, %v1531_v55, %v8221_v16 }
 0x340   : > { %v1597_v20 = vsel %vm1565_vm10, %v1564_v29, %v8222_v26 }
 0x341   : > { %v1630_v49 = vsel %vm1598_vm12, %v1597_v20, %v1337_v61 }
 0x345   : > { %3492 = vmatmul.msk.f32.gmra.mxu3 %vm1640_vm11, %v1627_v45 }
 0x34d   : > { %3493 = vmatmul.msk.f32.gmra.mxu3 %vm1640_vm11, %v1628_v41 }
 0x351   : > { %v1758_v8 = vpop.f32.mrf.mxu0 }
 0x352   : > { %v1759_v62 = vadd.f32 %v5621_v46, %v1758_v8 }
 0x354   : > { %v1854_v19 = vmax.f32 %v1759_v62, 0.0 }
 0x355   : > { %3494 = vmatmul.msk.f32.gmra.mxu3 %vm1640_vm11, %v1629_v7 }
 0x356   : > { %v1918_v37 = vrot.slane %v1854_v19, 7 }
 0x358   : > { %v5655_v48 = vsel %vm289_vm0, 0.0, %v1918_v37 }
 0x359   : > { %v1761_v60 = vpop.f32.mrf.mxu0  ;;  %8229 = vst [vmem:[#allocation56_spill] sm:$0xff] %v5655_v48  ;;  %v2075_v38 = vrot.slane %v5655_v48, 1 }
 0x35a   : > { %v1762_v54 = vadd.f32 %v5621_v46, %v1761_v60 }
 0x35c   : > { %v1855_v18 = vmax.f32 %v1762_v54, 0.0 }
 0x35d   : > { %3495 = vmatmul.msk.f32.gmra.mxu3 %vm1640_vm11, %v1630_v49 }
 0x35e   : > { %v1919_v36 = vrot.slane %v1855_v18, 7 }
 0x360   : > { %v5658_v28 = vsel %vm289_vm0, %v1918_v37, %v1919_v36  ;;  %v5661_v1 = vsel %vm289_vm0, %v1919_v36, 0.0 }
 0x361   : > { %8230 = vst [vmem:[#allocation123_spill] sm:$0xff] %v5658_v28  ;;  %v2078_v14 = vrot.slane %v5661_v1, 1  ;;  %v1764_v12 = vpop.f32.mrf.mxu0  ;;  %v2076_v45 = vrot.slane %v5658_v28, 1 }
 0x362   : > { %v1765_v35 = vadd.f32 %v5621_v46, %v1764_v12 }
 0x363   : > { %v5668_v30 = vsel %vm448_vm1, %v2076_v45, %v2078_v14  ;;  %v5671_v63 = vsel %vm448_vm1, %v2075_v38, %v2076_v45 }
 0x364   : > { %2241 = vrot.lane.b32.xlu0 %v5668_v30, %s3583_s25  ;;  %2239 = vrot.lane.b32.xlu2 %v5671_v63, %s3583_s25  ;;  %v1856_v2 = vmax.f32 %v1765_v35, 0.0 }
 0x366   : > { %v1921_v59 = vrot.slane %v1856_v2, 7 }
 0x368   : > { %v5679_v6 = vsel %vm289_vm0, 0.0, %v1921_v59 }
 0x369   : > { %v1767_v10 = vpop.f32.mrf.mxu0  ;;  %8231 = vst [vmem:[#allocation160_spill] sm:$0xff] %v5679_v6  ;;  %v2080_v41 = vrot.slane %v5679_v6, 1 }
 0x36a   : > { %v1768_v34 = vadd.f32 %v5621_v46, %v1767_v10 }
 0x36c   : > { %v1857_v57 = vmax.f32 %v1768_v34, 0.0 }
 0x36e   : > { %v1922_v50 = vrot.slane %v1857_v57, 7 }
 0x370   : > { %v5682_v27 = vsel %vm289_vm0, %v1921_v59, %v1922_v50  ;;  %v5685_v15 = vsel %vm289_vm0, %v1922_v50, 0.0 }
 0x371   : > { %v2083_v33 = vrot.slane %v5685_v15, 1  ;;  %v1770_v24 = vpop.f32.mrf.mxu0  ;;  %v1794_v4 = vpop.f32.mrf.mxu1  ;;  %v2081_v44 = vrot.slane %v5682_v27, 1 }
 0x372   : > { %v1771_v56 = vadd.f32 %v5621_v46, %v1770_v24  ;;  %v1795_v59 = vadd.f32 %v5621_v46, %v1794_v4 }
 0x373   : > { %v5692_v51 = vsel %vm448_vm1, %v2081_v44, %v2083_v33  ;;  %v5695_v52 = vsel %vm448_vm1, %v2080_v41, %v2081_v44 }
 0x374   : > { %8232 = vst [vmem:[#allocation134_spill] sm:$0xff] %v5692_v51  ;;  %2245 = vrot.lane.b32.xlu2 %v5692_v51, %s3583_s25  ;;  %2243 = vrot.lane.b32.xlu1 %v5695_v52, %s3583_s25  ;;  %v1858_v0 = vmax.f32 %v1771_v56, 0.0  ;;  %v1866_v24 = vmax.f32 %v1795_v59, 0.0 }
 0x375   : > { %8233 = vst [vmem:[#allocation47_spill] sm:$0xff] %v5695_v52 }
 0x376   : > { %v1924_v25 = vrot.slane %v1858_v0, 7 }
 0x378   : > { %v5703_v21 = vsel %vm289_vm0, 0.0, %v1924_v25 }
 0x379   : > { %v1773_v47 = vpop.f32.mrf.mxu0  ;;  %v1797_v39 = vpop.f32.mrf.mxu1  ;;  %8234 = vst [vmem:[#allocation63_spill] sm:$0xff] %v5703_v21  ;;  %v2085_v58 = vrot.slane %v5703_v21, 1 }
 0x37a   : > { %v1774_v43 = vadd.f32 %v5621_v46, %v1773_v47  ;;  %v1798_v45 = vadd.f32 %v5621_v46, %v1797_v39 }
 0x37c   : > { %v1859_v17 = vmax.f32 %v1774_v43, 0.0  ;;  %v1867_v50 = vmax.f32 %v1798_v45, 0.0 }
 0x37e   : > { %v1925_v53 = vrot.slane %v1859_v17, 7  ;;  %v1937_v47 = vrot.slane %v1867_v50, 7 }
 0x380   : > { %v5706_v61 = vsel %vm289_vm0, %v1924_v25, %v1925_v53  ;;  %v5709_v8 = vsel %vm289_vm0, %v1925_v53, 0.0  ;;  %v1936_v53 = vrot.slane %v1866_v24, 7 }
 0x381   : > { %8235 = vst [vmem:[#allocation3_spill] sm:$0xff] %v5706_v61  ;;  %v2088_v16 = vrot.slane %v5709_v8, 1  ;;  %v1776_v31 = vpop.f32.mrf.mxu0  ;;  %v1800_v62 = vpop.f32.mrf.mxu1  ;;  %v2086_v26 = vrot.slane %v5706_v61, 1 }
 0x382   : > { %v1777_v7 = vadd.f32 %v5621_v46, %v1776_v31 }
 0x383   : > { %v5716_v13 = vsel %vm448_vm1, %v2086_v26, %v2088_v16  ;;  %v5719_v3 = vsel %vm448_vm1, %v2085_v58, %v2086_v26  ;;  %v1801_v26 = vadd.f32 %v5621_v46, %v1800_v62 }
 0x384   : > { %8236 = vst [vmem:[#allocation93_spill] sm:$0xff] %v5716_v13  ;;  %2249 = vrot.lane.b32.xlu1 %v5716_v13, %s3583_s25  ;;  %2247 = vrot.lane.b32.xlu0 %v5719_v3, %s3583_s25  ;;  %v1860_v32 = vmax.f32 %v1777_v7, 0.0  ;;  %v5779_v7 = vsel %vm289_vm0, %v1936_v53, %v1937_v47 }
 0x385   : > { %8237 = vst [vmem:[#allocation136_spill] sm:$0xff] %v5719_v3 }
 0x386   : > { %v1927_v9 = vrot.slane %v1860_v32, 7 }
 0x388   : > { %v5727_v23 = vsel %vm289_vm0, 0.0, %v1927_v9 }
 0x389   : > { %v1779_v22 = vpop.f32.mrf.mxu0  ;;  %v1803_v40 = vpop.f32.mrf.mxu1  ;;  %8238 = vst [vmem:[#allocation161_spill] sm:$0xff] %v5727_v23  ;;  %v2090_v20 = vrot.slane %v5727_v23, 1 }
 0x38a   : > { %v1780_v19 = vadd.f32 %v5621_v46, %v1779_v22  ;;  %v1804_v25 = vadd.f32 %v5621_v46, %v1803_v40  ;;  %v5789_v40 = vsel %vm289_vm0, 0.0, %v1936_v53 }
 0x38c   : > { %v1861_v5 = vmax.f32 %v1780_v19, 0.0  ;;  %v1869_v22 = vmax.f32 %v1804_v25, 0.0  ;;  %v1868_v19 = vmax.f32 %v1801_v26, 0.0 }
 0x38e   : > { %v1928_v42 = vrot.slane %v1861_v5, 7  ;;  %v2106_v5 = vrot.slane %v5779_v7, 1  ;;  %v1939_v45 = vrot.slane %v1868_v19, 7 }
 0x390   : > { %v5730_v11 = vsel %vm289_vm0, %v1927_v9, %v1928_v42  ;;  %v5733_v55 = vsel %vm289_vm0, %v1928_v42, 0.0  ;;  %v5735_v60 = vpop.f32.mrf.mxu3 }
 0x391   : > { %8239 = vst [vmem:[#allocation62_spill] sm:$0xff] %v5730_v11  ;;  %v2093_v29 = vrot.slane %v5733_v55, 1  ;;  %v1782_v37 = vpop.f32.mrf.mxu0  ;;  %v5738_v54 = vpop.f32.mrf.mxu1  ;;  %v2091_v18 = vrot.slane %v5730_v11, 1 }
 0x392   : > { %v1783_v49 = vadd.f32 %v5621_v46, %v1782_v37  ;;  %v1940_v37 = vrot.slane %v1869_v22, 7 }
 0x393   : > { %v5744_v36 = vsel %vm448_vm1, %v2090_v20, %v2091_v18  ;;  %v5749_v38 = vsel %vm448_vm1, %v2091_v18, %v2093_v29 }
 0x394   : > { %8240 = vst [vmem:[#allocation4_spill] sm:$0xff] %v5744_v36  ;;  %2251 = vrot.lane.b32.xlu2 %v5744_v36, %s3583_s25  ;;  %2253 = vrot.lane.b32.xlu0 %v5749_v38, %s3583_s25  ;;  %v1862_v14 = vmax.f32 %v1783_v49, 0.0  ;;  %v2105_v49 = vrot.slane %v5789_v40, 1 }
 0x395   : > { %8241 = vst [vmem:[#allocation104_spill] sm:$0xff] %v5749_v38 }
 0x396   : > { %v1930_v34 = vrot.slane %v1862_v14, 7  ;;  %v5797_v59 = vsel %vm448_vm1, %v2105_v49, %v2106_v5  ;;  %v5834_v49 = vsel %vm289_vm0, %v1937_v47, 0.0  ;;  %v5849_v47 = vsel %vm289_vm0, 0.0, %v1939_v45 }
 0x397   : > { %8245 = vst [vmem:[#allocation68_spill] sm:$0xff] %v5797_v59 }
 0x398   : > { %v5753_v12 = vpop.f32.mrf.mxu3  ;;  %v5759_v44 = vsel %vm289_vm0, 0.0, %v1930_v34 }
 0x399   : > { %v1785_v35 = vpop.f32.mrf.mxu0  ;;  %v1809_v2 = vpop.f32.mrf.mxu1  ;;  %8242 = vst [vmem:[#allocation126_spill] sm:$0xff] %v5759_v44  ;;  %v2095_v31 = vrot.slane %v5759_v44, 1 }
 0x39a   : > { %v1786_v10 = vadd.f32 %v5621_v46, %v1785_v35  ;;  %v1810_v53 = vadd.f32 %v5621_v46, %v1809_v2 }
 0x39c   : > { %v1863_v57 = vmax.f32 %v1786_v10, 0.0 }
 0x39e   : > { %v1931_v33 = vrot.slane %v1863_v57, 7  ;;  %v5805_v57 = vsel %vm289_vm0, %v1940_v37, 0.0 }
 0x3a0   : > { %v5762_v41 = vsel %vm289_vm0, %v1930_v34, %v1931_v33  ;;  %v5765_v56 = vsel %vm289_vm0, %v1931_v33, 0.0  ;;  %v5767_v0 = vpop.f32.mrf.mxu3  ;;  %v5802_v34 = vsel %vm289_vm0, %v1939_v45, %v1940_v37  ;;  %v1822_v37 = vadd.f32 %v5621_v46, %v5735_v60 }
 0x3a1   : > { %v2098_v39 = vrot.slane %v5765_v56, 1  ;;  %v1788_v4 = vpop.f32.mrf.mxu0  ;;  %v1812_v43 = vpop.f32.mrf.mxu1  ;;  %v2096_v17 = vrot.slane %v5762_v41, 1  ;;  %v2111_v26 = vrot.slane %v5802_v34, 1 }
 0x3a2   : > { %v1789_v16 = vadd.f32 %v5621_v46, %v1788_v4  ;;  %v1813_v35 = vadd.f32 %v5621_v46, %v1812_v43 }
 0x3a3   : > { %v5776_v58 = vsel %vm448_vm1, %v2096_v17, %v2098_v39  ;;  %v5784_v32 = vsel %vm448_vm1, %v2095_v31, %v2096_v17  ;;  %v2113_v17 = vrot.slane %v5805_v57, 1 }
 0x3a4   : > { %8243 = vst [vmem:[#allocation64_spill] sm:$0xff] %v5776_v58  ;;  %2257 = vrot.lane.b32.xlu2 %v5776_v58, %s3583_s25  ;;  %2255 = vrot.lane.b32.xlu1 %v5784_v32, %s3583_s25  ;;  %v1864_v62 = vmax.f32 %v1789_v16, 0.0  ;;  %v1872_v39 = vmax.f32 %v1813_v35, 0.0 }
 0x3a5   : > { %8244 = vst [vmem:[#allocation61_spill] sm:$0xff] %v5784_v32 }
 0x3a6   : > { %v1933_v14 = vrot.slane %v1864_v62, 7 }
 0x3a8   : > { %v1830_v9 = vpop.f32.mrf.mxu3  ;;  %v5808_v24 = vsel %vm289_vm0, 0.0, %v1933_v14 }
 0x3a9   : > { %v1791_v42 = vpop.f32.mrf.mxu0  ;;  %v1815_v29 = vpop.f32.mrf.mxu1 }
 0x3aa   : > { %v1792_v20 = vadd.f32 %v5621_v46, %v1791_v42  ;;  %v1816_v18 = vadd.f32 %v5621_v46, %v1815_v29  ;;  %v2100_v42 = vrot.slane %v5808_v24, 1  ;;  %v1807_v29 = vadd.f32 %v5621_v46, %v5738_v54 }
 0x3ab   : > { %v5841_v54 = vsel %vm448_vm1, %v2111_v26, %v2113_v17 }
 0x3ac   : > { %v1865_v10 = vmax.f32 %v1792_v20, 0.0  ;;  %2263 = vrot.lane.b32.xlu2 %v5797_v59, %s3583_s25  ;;  %v1873_v33 = vmax.f32 %v1816_v18, 0.0  ;;  %v1945_v20 = vrot.slane %v1872_v39, 7  ;;  %8248 = vst [vmem:[#allocation135_spill] sm:$0xff] %v5841_v54 }
 0x3ae   : > { %v1934_v50 = vrot.slane %v1865_v10, 7  ;;  %v1946_v22 = vrot.slane %v1873_v33, 7  ;;  %v1870_v10 = vmax.f32 %v1807_v29, 0.0  ;;  %v1875_v33 = vmax.f32 %v1822_v37, 0.0 }
 0x3af   : > { %v5853_v39 = vsel %vm289_vm0, 0.0, %v1945_v20  ;;  %v1831_v29 = vadd.f32 %v5621_v46, %v1830_v9 }
 0x3b0   : > { %v5811_v4 = vsel %vm289_vm0, %v1933_v14, %v1934_v50  ;;  %v5814_v43 = vsel %vm289_vm0, %v1934_v50, 0.0  ;;  %v1833_v25 = vpop.f32.mrf.mxu3  ;;  %v1871_v14 = vmax.f32 %v1810_v53, 0.0  ;;  %v5844_v60 = vsel %vm289_vm0, %v1945_v20, %v1946_v22  ;;  %8250 = vst [vmem:[#allocation155_spill] sm:$0xff] %v5853_v39 }
 0x3b1   : > { %v2103_v16 = vrot.slane %v5814_v43, 1  ;;  %v1818_v31 = vpop.f32.mrf.mxu1  ;;  %v2101_v19 = vrot.slane %v5811_v4, 1  ;;  %8249 = vst [vmem:[#allocation137_spill] sm:$0xff] %v5844_v60  ;;  %v2108_v50 = vrot.slane %v5834_v49, 1  ;;  %v2120_v45 = vrot.slane %v5853_v39, 1 }
 0x3b2   : > { %v1819_v62 = vadd.f32 %v5621_v46, %v1818_v31  ;;  %v1943_v17 = vrot.slane %v1871_v14, 7  ;;  %v1834_v31 = vadd.f32 %v5621_v46, %v1833_v25 }
 0x3b3   : > { %v5828_v2 = vsel %vm448_vm1, %v2101_v19, %v2103_v16  ;;  %v5831_v18 = vsel %vm448_vm1, %v2100_v42, %v2101_v19  ;;  %v2121_v16 = vrot.slane %v5844_v60, 1  ;;  %v2110_v19 = vrot.slane %v5849_v47, 1 }
 0x3b4   : > { %8246 = vst [vmem:[#allocation106_spill] sm:$0xff] %v5828_v2  ;;  %2261 = vrot.lane.b32.xlu1 %v5828_v2, %s3583_s25  ;;  %2259 = vrot.lane.b32.xlu0 %v5831_v18, %s3583_s25  ;;  %v1874_v35 = vmax.f32 %v1819_v62, 0.0  ;;  %v1942_v42 = vrot.slane %v1870_v10, 7  ;;  %v5861_v37 = vsel %vm448_vm1, %v2106_v5, %v2108_v50  ;;  %v5870_v25 = vsel %vm289_vm0, %v1943_v17, 0.0 }
 0x3b5   : > { %8247 = vst [vmem:[#allocation113_spill] sm:$0xff] %v5831_v18  ;;  %2269 = vrot.lane.b32.xlu2 %v5841_v54, %s3583_s25  ;;  %v1949_v54 = vrot.slane %v1875_v33, 7  ;;  %v5864_v20 = vsel %vm448_vm1, %v2110_v19, %v2111_v26  ;;  %v5877_v9 = vsel %vm448_vm1, %v2120_v45, %v2121_v16  ;;  %v1879_v5 = vmax.f32 %v1834_v31, 0.0 }
 0x3b6   : > { %v1948_v62 = vrot.slane %v1874_v35, 7  ;;  %8251 = vst [vmem:[#allocation166_spill] sm:$0xff] %v5861_v37  ;;  %v5867_v14 = vsel %vm289_vm0, %v1942_v42, %v1943_v17  ;;  %v5885_v26 = vsel %vm289_vm0, 0.0, %v1942_v42  ;;  %v2118_v50 = vrot.slane %v5870_v25, 1 }
 0x3b7   : > { %8252 = vst [vmem:[#allocation48_spill] sm:$0xff] %v5864_v20  ;;  %v5888_v10 = vsel %vm289_vm0, %v1949_v54, 0.0  ;;  %v1878_v33 = vmax.f32 %v1831_v29, 0.0  ;;  %v2116_v19 = vrot.slane %v5867_v14, 1  ;;  %v1828_v31 = vadd.f32 %v5621_v46, %v5767_v0 }
 0x3b8   : > { %v1836_v53 = vpop.f32.mrf.mxu3  ;;  %8253 = vst [vmem:[#allocation81_spill] sm:$0xff] %v5877_v9  ;;  %v5880_v35 = vsel %vm289_vm0, %v1948_v62, %v1949_v54  ;;  %v2115_v42 = vrot.slane %v5885_v26, 1  ;;  %v1825_v54 = vadd.f32 %v5621_v46, %v5753_v12 }
 0x3b9   : > { %8254 = vst [vmem:[#allocation96_spill] sm:$0xff] %v5880_v35  ;;  %v2126_v45 = vrot.slane %v5880_v35, 1  ;;  %v1954_v18 = vrot.slane %v1878_v33, 7  ;;  %v1837_v29 = vadd.f32 %v5621_v46, %v1836_v53  ;;  %v5902_v2 = vsel %vm448_vm1, %v2116_v19, %v2118_v50 }
 0x3ba   : > { %8255 = vst [vmem:[#allocation115_spill] sm:$0xff] %v5902_v2  ;;  %v5905_v0 = vsel %vm448_vm1, %v2115_v42, %v2116_v19  ;;  %v1877_v59 = vmax.f32 %v1828_v31, 0.0 }
 0x3bb   : > { %8256 = vst [vmem:[#allocation139_spill] sm:$0xff] %v5905_v0  ;;  %v1880_v19 = vmax.f32 %v1837_v29, 0.0 }
 0x3bc   : > { %2265 = vrot.lane.b32.xlu0 %v5861_v37, %s3583_s25  ;;  %2267 = vrot.lane.b32.xlu1 %v5864_v20, %s3583_s25  ;;  %v1955_v37 = vrot.slane %v1879_v5, 7  ;;  %v2128_v20 = vrot.slane %v5888_v10, 1  ;;  %v5908_v5 = vsel %vm289_vm0, %v1946_v22, 0.0  ;;  %v1876_v22 = vmax.f32 %v1825_v54, 0.0 }
 0x3bd   : > { %2275 = vrot.lane.b32.xlu2 %v5877_v9, %s3583_s25  ;;  %v2123_v33 = vrot.slane %v5908_v5, 1  ;;  %v1957_v32 = vrot.slane %v1880_v19, 7 }
 0x3be   : > { %v5918_v12 = vsel %vm448_vm1, %v2126_v45, %v2128_v20  ;;  %v5921_v53 = vsel %vm289_vm0, %v1954_v18, %v1955_v37  ;;  %v1951_v38 = vrot.slane %v1876_v22, 7 }
 0x3bf   : > { %8258 = vst [vmem:[#allocation60_spill] sm:$0xff] %v5918_v12  ;;  %v2136_v20 = vrot.slane %v5921_v53, 1 }
 0x3c0   : > { %v1839_v17 = vpop.f32.mrf.mxu3  ;;  %8259 = vst [vmem:[#allocation162_spill] sm:$0xff] %v5921_v53 }
 0x3c1   : > { %v1840_v9 = vadd.f32 %v5621_v46, %v1839_v17  ;;  %v5911_v17 = vsel %vm289_vm0, 0.0, %v1948_v62  ;;  %v5926_v62 = vsel %vm289_vm0, 0.0, %v1954_v18 }
 0x3c2   : > { %8257 = vst [vmem:[#allocation145_spill] sm:$0xff] %v5911_v17  ;;  %v2125_v42 = vrot.slane %v5911_v17, 1 }
 0x3c3   : > { %v1881_v50 = vmax.f32 %v1840_v9, 0.0  ;;  %8260 = vst [vmem:[#allocation52_spill] sm:$0xff] %v5926_v62  ;;  %v2135_v9 = vrot.slane %v5926_v62, 1 }
 0x3c4   : > { %2273 = vrot.lane.b32.xlu1 %v5902_v2, %s3583_s25  ;;  %2271 = vrot.lane.b32.xlu0 %v5905_v0, %s3583_s25  ;;  %v1952_v0 = vrot.slane %v1877_v59, 7  ;;  %v5936_v18 = vsel %vm448_vm1, %v2125_v42, %v2126_v45 }
 0x3c5   : > { %2281 = vrot.lane.b32.xlu2 %v5918_v12, %s3583_s25  ;;  %v1958_v2 = vrot.slane %v1881_v50, 7  ;;  %v5933_v12 = vsel %vm448_vm1, %v2121_v16, %v2123_v33  ;;  %8262 = vst [vmem:[#allocation105_spill] sm:$0xff] %v5936_v18  ;;  %v5949_v59 = vsel %vm448_vm1, %v2135_v9, %v2136_v20 }
 0x3c6   : > { %8261 = vst [vmem:[#allocation83_spill] sm:$0xff] %v5933_v12  ;;  %v5939_v54 = vsel %vm289_vm0, %v1951_v38, %v1952_v0  ;;  %v5942_v29 = vsel %vm289_vm0, %v1952_v0, 0.0  ;;  %v5960_v0 = vsel %vm289_vm0, 0.0, %v1951_v38 }
 0x3c7   : > { %8263 = vst [vmem:[#allocation107_spill] sm:$0xff] %v5949_v59  ;;  %v5952_v16 = vsel %vm289_vm0, %v1957_v32, %v1958_v2  ;;  %v5955_v45 = vsel %vm289_vm0, %v1958_v2, 0.0  ;;  %v2133_v50 = vrot.slane %v5942_v29, 1  ;;  %v2131_v33 = vrot.slane %v5939_v54, 1 }
 0x3c8   : > { %v1842_v31 = vpop.f32.mrf.mxu3  ;;  %8264 = vst [vmem:[#allocation129_spill] sm:$0xff] %v5952_v16  ;;  %v2143_v19 = vrot.slane %v5955_v45, 1  ;;  %v2141_v9 = vrot.slane %v5952_v16, 1  ;;  %v2130_v2 = vrot.slane %v5960_v0, 1 }
 0x3c9   : > { %8265 = vst [vmem:[#allocation39_spill] sm:$0xff] %v5960_v0 }
 0x3ca   : > { %v5973_v38 = vsel %vm448_vm1, %v2130_v2, %v2131_v33 }
 0x3cb   : > { %8267 = vst [vmem:[#allocation167_spill] sm:$0xff] %v5973_v38 }
 0x3cc   : > { %2277 = vrot.lane.b32.xlu0 %v5933_v12, %s3583_s25  ;;  %2279 = vrot.lane.b32.xlu1 %v5936_v18, %s3583_s25  ;;  %v1843_v12 = vadd.f32 %v5621_v46, %v1842_v31  ;;  %v5976_v18 = vsel %vm289_vm0, %v1955_v37, 0.0  ;;  %v5988_v31 = vsel %vm289_vm0, 0.0, %v1957_v32 }
 0x3cd   : > { %2287 = vrot.lane.b32.xlu2 %v5949_v59, %s3583_s25  ;;  %v5970_v59 = vsel %vm448_vm1, %v2131_v33, %v2133_v50  ;;  %8269 = vst [vmem:[#allocation69_spill] sm:$0xff] %v5988_v31  ;;  %v2138_v37 = vrot.slane %v5976_v18, 1 }
 0x3ce   : > { %8266 = vst [vmem:[#allocation163_spill] sm:$0xff] %v5970_v59  ;;  %v1882_v50 = vmax.f32 %v1843_v12, 0.0 }
 0x3d0   : > { %v1845_v22 = vpop.f32.mrf.mxu3  ;;  %v1960_v2 = vrot.slane %v1882_v50, 7 }
 0x3d1   : > { %v1846_v42 = vadd.f32 %v5621_v46, %v1845_v22  ;;  %v5983_v22 = vsel %vm448_vm1, %v2141_v9, %v2143_v19 }
 0x3d2   : > { %8268 = vst [vmem:[#allocation67_spill] sm:$0xff] %v5983_v22  ;;  %v6011_v32 = vsel %vm289_vm0, 0.0, %v1960_v2 }
 0x3d3   : > { %v1883_v58 = vmax.f32 %v1846_v42, 0.0  ;;  %v2140_v42 = vrot.slane %v5988_v31, 1  ;;  %8274 = vst [vmem:[#allocation122_spill] sm:$0xff] %v6011_v32  ;;  %v2145_v50 = vrot.slane %v6011_v32, 1 }
 0x3d4   : > { %2285 = vrot.lane.b32.xlu1 %v5970_v59, %s3583_s25  ;;  %2283 = vrot.lane.b32.xlu0 %v5973_v38, %s3583_s25  ;;  %v5993_v59 = vsel %vm448_vm1, %v2136_v20, %v2138_v37  ;;  %v2155_v37 = vrot.slane %v5679_v6, 2 }
 0x3d5   : > { %2293 = vrot.lane.b32.xlu2 %v5983_v22, %s3583_s25  ;;  %v1961_v33 = vrot.slane %v1883_v58, 7  ;;  %8270 = vst [vmem:[#allocation79_spill] sm:$0xff] %v5993_v59  ;;  %v5996_v38 = vsel %vm448_vm1, %v2140_v42, %v2141_v9  ;;  %v8273_v58 = vld [vmem:[#allocation44_spill] sm:$0xff]  ;;  %v2156_v9 = vrot.slane %v5682_v27, 2 }
 0x3d6   : > { %8271 = vst [vmem:[#allocation109_spill] sm:$0xff] %v5996_v38 }
 0x3d7   : > { %v5999_v19 = vsel %vm289_vm0, %v1960_v2, %v1961_v33  ;;  %v6002_v22 = vsel %vm289_vm0, %v1961_v33, 0.0  ;;  %v6033_v2 = vpop.permute.xlu2 %2239 }
 0x3d8   : > { %8272 = vst [vmem:[#allocation116_spill] sm:$0xff] %v5999_v19  ;;  %v2148_v12 = vrot.slane %v6002_v22, 1  ;;  %v2146_v20 = vrot.slane %v5999_v19, 1 }
 0x3d9   : > { %8278 = vst [vmem:[#allocation51_spill] sm:$0xff] %v6033_v2 }
 0x3da   : > { %v6019_v33 = vsel %vm448_vm1, %v2146_v20, %v2148_v12  ;;  %v6022_v42 = vsel %vm448_vm1, %v2145_v50, %v2146_v20  ;;  %v2153_v12 = vrot.slane %v5661_v1, 2  ;;  %v2163_v20 = vrot.slane %v5709_v8, 2 }
 0x3db   : > { %8275 = vst [vmem:[#allocation138_spill] sm:$0xff] %v6019_v33  ;;  %v2161_v50 = vrot.slane %v5706_v61, 2  ;;  %v2158_v8 = vrot.slane %v5685_v15, 2 }
 0x3dc   : > { %2289 = vrot.lane.b32.xlu0 %v5993_v59, %s3583_s25  ;;  %2291 = vrot.lane.b32.xlu1 %v5996_v38, %s3583_s25  ;;  %8276 = vst [vmem:[#allocation140_spill] sm:$0xff] %v6022_v42  ;;  %v2151_v59 = vrot.slane %v5658_v28, 2 }
 0x3dd   : > { %2330 = vrot.lane.b32.xlu2 %v8273_v58, %s3585_s27  ;;  %v6025_v58 = vsel %vm526_vm2, %v2155_v37, %v2156_v9  ;;  %v2150_v37 = vrot.slane %v5655_v48, 2  ;;  %v6065_v2 = vsel %vm526_vm2, %v2156_v9, %v2158_v8  ;;  %v2178_v9 = vrot.slane %v5814_v43, 2 }
 0x3de   : > { %8277 = vst [vmem:[#allocation31_spill] sm:$0xff] %v6025_v58  ;;  %v2176_v8 = vrot.slane %v5811_v4, 2  ;;  %v2173_v43 = vrot.slane %v5765_v56, 2 }
 0x3df   : > { %v6055_v1 = vpop.permute.xlu2 %2245  ;;  %8283 = vst [vmem:[#allocation25_spill] sm:$0xff] %v6065_v2 }
 0x3e0   : > { %8281 = vst [vmem:[#allocation84_spill] sm:$0xff] %v6055_v1 }
 0x3e4   : > { %2297 = vrot.lane.b32.xlu1 %v6019_v33, %s3583_s25  ;;  %2295 = vrot.lane.b32.xlu0 %v6022_v42, %s3583_s25  ;;  %v6041_v33 = vsel %vm526_vm2, %v2151_v59, %v2153_v12  ;;  %v6044_v42 = vsel %vm526_vm2, %v2150_v37, %v2151_v59  ;;  %v2171_v12 = vrot.slane %v5762_v41, 2  ;;  %v2160_v59 = vrot.slane %v5703_v21, 2 }
 0x3e5   : > { %2336 = vrot.lane.b32.xlu2 %v6025_v58, %s3585_s27  ;;  %8279 = vst [vmem:[#allocation169_spill] sm:$0xff] %v6044_v42  ;;  %v6047_v58 = vsel %vm526_vm2, %v2161_v50, %v2163_v20  ;;  %v2170_v20 = vrot.slane %v5759_v44, 2 }
 0x3e6   : > { %8280 = vst [vmem:[#allocation74_spill] sm:$0xff] %v6047_v58  ;;  %v6062_v37 = vsel %vm526_vm2, %v2160_v59, %v2161_v50  ;;  %v2168_v50 = vrot.slane %v5733_v55, 2  ;;  %v2166_v59 = vrot.slane %v5730_v11, 2 }
 0x3e7   : > { %8282 = vst [vmem:[#allocation92_spill] sm:$0xff] %v6062_v37 }
 0x3e8   : > { %v6084_v1 = vsel %vm526_vm2, %v2166_v59, %v2168_v50  ;;  %v2186_v50 = vrot.slane %v5802_v34, 2 }
 0x3e9   : > { %8286 = vst [vmem:[#allocation124_spill] sm:$0xff] %v6084_v1 }
 0x3ec   : > { %2334 = vrot.lane.b32.xlu1 %v6041_v33, %s3585_s27  ;;  %2332 = vrot.lane.b32.xlu0 %v6044_v42, %s3585_s27  ;;  %v6068_v42 = vsel %vm526_vm2, %v2170_v20, %v2171_v12  ;;  %v2165_v20 = vrot.slane %v5727_v23, 2 }
 0x3ed   : > { %2342 = vrot.lane.b32.xlu2 %v6047_v58, %s3585_s27  ;;  %8284 = vst [vmem:[#allocation99_spill] sm:$0xff] %v6068_v42 }
 0x3ee   : > { %v6076_v15 = vpop.permute.xlu2 %2251  ;;  %v6087_v58 = vsel %vm526_vm2, %v2165_v20, %v2166_v59  ;;  %v2175_v59 = vrot.slane %v5808_v24, 2 }
 0x3ef   : > { %8285 = vst [vmem:[#allocation118_spill] sm:$0xff] %v6076_v15  ;;  %v6108_v15 = vsel %vm526_vm2, %v2171_v12, %v2173_v43  ;;  %v2193_v12 = vrot.slane %v5870_v25, 2  ;;  %v2191_v43 = vrot.slane %v5867_v14, 2  ;;  %v6143_v25 = vpop.permute.xlu1 %2243 }
 0x3f0   : > { %8287 = vst [vmem:[#allocation142_spill] sm:$0xff] %v6087_v58  ;;  %v6105_v20 = vsel %vm526_vm2, %v2175_v59, %v2176_v8  ;;  %v2181_v59 = vrot.slane %v5779_v7, 2 }
 0x3f1   : > { %8290 = vst [vmem:[#allocation66_spill] sm:$0xff] %v6105_v20 }
 0x3f2   : > { %8291 = vst [vmem:[#allocation164_spill] sm:$0xff] %v6108_v15 }
 0x3f3   : > { %8298 = vst [vmem:[#allocation42_spill] sm:$0xff] %v6143_v25 }
 0x3f4   : > { %2340 = vrot.lane.b32.xlu1 %v6062_v37, %s3585_s27  ;;  %2338 = vrot.lane.b32.xlu0 %v6065_v2, %s3585_s27 }
 0x3f5   : > { %2348 = vrot.lane.b32.xlu2 %v6068_v42, %s3585_s27  ;;  %v6090_v42 = vsel %vm526_vm2, %v2176_v8, %v2178_v9  ;;  %v2185_v9 = vrot.slane %v5849_v47, 2  ;;  %v2183_v8 = vrot.slane %v5834_v49, 2  ;;  %v6141_v49 = vpop.permute.xlu0 %2241 }
 0x3f6   : > { %8288 = vst [vmem:[#allocation146_spill] sm:$0xff] %v6090_v42 }
 0x3f7   : > { %8297 = vst [vmem:[#allocation22_spill] sm:$0xff] %v6141_v49 }
 0x3fc   : > { %2346 = vrot.lane.b32.xlu1 %v6084_v1, %s3585_s27  ;;  %2344 = vrot.lane.b32.xlu0 %v6087_v58, %s3585_s27  ;;  %v6111_v58 = vsel %vm526_vm2, %v2185_v9, %v2186_v50  ;;  %v2180_v9 = vrot.slane %v5789_v40, 2 }
 0x3fd   : > { %2354 = vrot.lane.b32.xlu2 %v6090_v42, %s3585_s27  ;;  %8292 = vst [vmem:[#allocation78_spill] sm:$0xff] %v6111_v58  ;;  %v6168_v25 = vpop.permute.xlu0 %2247 }
 0x3fe   : > { %v6098_v55 = vpop.permute.xlu2 %2257  ;;  %v6130_v42 = vsel %vm526_vm2, %v2180_v9, %v2181_v59  ;;  %v2201_v9 = vrot.slane %v5880_v35, 2  ;;  %8302 = vst [vmem:[#allocation57_spill] sm:$0xff] %v6168_v25 }
 0x3ff   : > { %8289 = vst [vmem:[#allocation154_spill] sm:$0xff] %v6098_v55  ;;  %v6127_v55 = vsel %vm526_vm2, %v2181_v59, %v2183_v8  ;;  %v2188_v8 = vrot.slane %v5805_v57, 2  ;;  %v6166_v57 = vpop.permute.xlu1 %2249 }
 0x400   : > { %8294 = vst [vmem:[#allocation189_spill] sm:$0xff] %v6127_v55 }
 0x401   : > { %8295 = vst [vmem:[#allocation193_spill] sm:$0xff] %v6130_v42 }
 0x402   : > { %8301 = vst [vmem:[#allocation196_spill] sm:$0xff] %v6166_v57  ;;  %v2215_v57 = vrot.slane %v5988_v31, 2 }
 0x404   : > { %2352 = vrot.lane.b32.xlu1 %v6105_v20, %s3585_s27  ;;  %2350 = vrot.lane.b32.xlu0 %v6108_v15, %s3585_s27 }
 0x405   : > { %2360 = vrot.lane.b32.xlu2 %v6111_v58, %s3585_s27  ;;  %v6133_v58 = vsel %vm526_vm2, %v2191_v43, %v2193_v12  ;;  %v2200_v12 = vrot.slane %v5911_v17, 2 }
 0x406   : > { %v6119_v56 = vpop.permute.xlu2 %2263  ;;  %8296 = vst [vmem:[#allocation16_spill] sm:$0xff] %v6133_v58 }
 0x407   : > { %8293 = vst [vmem:[#allocation180_spill] sm:$0xff] %v6119_v56  ;;  %v2190_v56 = vrot.slane %v5885_v26, 2  ;;  %v6158_v49 = vsel %vm526_vm2, %v2200_v12, %v2201_v9  ;;  %v2206_v12 = vrot.slane %v5939_v54, 2 }
 0x408   : > { %8300 = vst [vmem:[#allocation71_spill] sm:$0xff] %v6158_v49 }
 0x40c   : > { %2358 = vrot.lane.b32.xlu1 %v6127_v55, %s3585_s27  ;;  %2356 = vrot.lane.b32.xlu0 %v6130_v42, %s3585_s27  ;;  %v6152_v55 = vsel %vm526_vm2, %v2190_v56, %v2191_v43  ;;  %v6155_v42 = vsel %vm526_vm2, %v2186_v50, %v2188_v8  ;;  %v2198_v56 = vrot.slane %v5908_v5, 2  ;;  %v2196_v43 = vrot.slane %v5844_v60, 2  ;;  %v6192_v5 = vpop.permute.xlu0 %2253 }
 0x40d   : > { %2366 = vrot.lane.b32.xlu2 %v6133_v58, %s3585_s27  ;;  %v2208_v8 = vrot.slane %v5942_v29, 2  ;;  %8307 = vst [vmem:[#allocation24_spill] sm:$0xff] %v6192_v5 }
 0x40e   : > { %v6178_v58 = vsel %vm526_vm2, %v2196_v43, %v2198_v56 }
 0x40f   : > { %v6146_v59 = vpop.permute.xlu2 %2269  ;;  %8304 = vst [vmem:[#allocation88_spill] sm:$0xff] %v6178_v58  ;;  %v6184_v25 = vsel %vm526_vm2, %v2206_v12, %v2208_v8  ;;  %v2205_v8 = vrot.slane %v5960_v0, 2 }
 0x410   : > { %8299 = vst [vmem:[#allocation54_spill] sm:$0xff] %v6146_v59  ;;  %v2195_v59 = vrot.slane %v5853_v39, 2 }
 0x411   : > { %8306 = vst [vmem:[#allocation94_spill] sm:$0xff] %v6184_v25 }
 0x414   : > { %2364 = vrot.lane.b32.xlu1 %v6152_v55, %s3585_s27  ;;  %2362 = vrot.lane.b32.xlu0 %v6155_v42, %s3585_s27 }
 0x415   : > { %2372 = vrot.lane.b32.xlu2 %v6158_v49, %s3585_s27  ;;  %v6181_v49 = vsel %vm526_vm2, %v2195_v59, %v2196_v43  ;;  %v2216_v59 = vrot.slane %v5952_v16, 2  ;;  %v2203_v43 = vrot.slane %v5888_v10, 2 }
 0x416   : > { %8305 = vst [vmem:[#allocation14_spill] sm:$0xff] %v6181_v49  ;;  %v6194_v29 = vpop.permute.xlu1 %2255 }
 0x417   : > { %v6171_v50 = vpop.permute.xlu2 %2275  ;;  %8308 = vst [vmem:[#allocation108_spill] sm:$0xff] %v6194_v29  ;;  %v6209_v5 = vsel %vm526_vm2, %v2215_v57, %v2216_v59  ;;  %v2211_v57 = vrot.slane %v5921_v53, 2 }
 0x418   : > { %8303 = vst [vmem:[#allocation5_spill] sm:$0xff] %v6171_v50  ;;  %v6203_v50 = vsel %vm526_vm2, %v2205_v8, %v2206_v12  ;;  %v2213_v12 = vrot.slane %v5976_v18, 2  ;;  %v2221_v8 = vrot.slane %v5999_v19, 2 }
 0x419   : > { %8310 = vst [vmem:[#allocation114_spill] sm:$0xff] %v6203_v50 }
 0x41a   : > { %8312 = vst [vmem:[#allocation148_spill] sm:$0xff] %v6209_v5 }
 0x41c   : > { %2370 = vrot.lane.b32.xlu1 %v6178_v58, %s3585_s27  ;;  %2368 = vrot.lane.b32.xlu0 %v6181_v49, %s3585_s27  ;;  %v6206_v49 = vsel %vm526_vm2, %v2201_v9, %v2203_v43  ;;  %v2223_v43 = vrot.slane %v6002_v22, 2 }
 0x41d   : > { %2378 = vrot.lane.b32.xlu2 %v6184_v25, %s3585_s27  ;;  %8311 = vst [vmem:[#allocation132_spill] sm:$0xff] %v6206_v49  ;;  %v6229_v25 = vsel %vm526_vm2, %v2211_v57, %v2213_v12  ;;  %v2218_v12 = vrot.slane %v5955_v45, 2 }
 0x41e   : > { %8315 = vst [vmem:[#allocation170_spill] sm:$0xff] %v6229_v25 }
 0x41f   : > { %v6196_v56 = vpop.permute.xlu2 %2281 }
 0x420   : > { %8309 = vst [vmem:[#allocation110_spill] sm:$0xff] %v6196_v56  ;;  %v2210_v56 = vrot.slane %v5926_v62, 2 }
 0x424   : > { %2376 = vrot.lane.b32.xlu1 %v6203_v50, %s3585_s27  ;;  %2374 = vrot.lane.b32.xlu0 %v6206_v49, %s3585_s27 }
 0x425   : > { %2384 = vrot.lane.b32.xlu2 %v6209_v5, %s3585_s27  ;;  %v6232_v5 = vsel %vm526_vm2, %v2210_v56, %v2211_v57  ;;  %v2220_v57 = vrot.slane %v6011_v32, 2 }
 0x426   : > { %v6217_v10 = vpop.permute.xlu1 %2261  ;;  %v6219_v29 = vpop.permute.xlu0 %2259  ;;  %8316 = vst [vmem:[#allocation175_spill] sm:$0xff] %v6232_v5 }
 0x427   : > { %8313 = vst [vmem:[#allocation45_spill] sm:$0xff] %v6219_v29  ;;  %v6222_v9 = vpop.permute.xlu2 %2287  ;;  %v6235_v29 = vsel %vm526_vm2, %v2221_v8, %v2223_v43  ;;  %v6252_v43 = vsel %vm526_vm2, %v2220_v57, %v2221_v8 }
 0x428   : > { %8314 = vst [vmem:[#allocation76_spill] sm:$0xff] %v6222_v9  ;;  %v6255_v9 = vsel %vm526_vm2, %v2216_v59, %v2218_v12 }
 0x429   : > { %8319 = vst [vmem:[#allocation187_spill] sm:$0xff] %v6252_v43 }
 0x42a   : > { %8320 = vst [vmem:[#allocation12_spill] sm:$0xff] %v6255_v9 }
 0x42c   : > { %2382 = vrot.lane.b32.xlu1 %v6229_v25, %s3585_s27  ;;  %2380 = vrot.lane.b32.xlu0 %v6232_v5, %s3585_s27 }
 0x42d   : > { %2390 = vrot.lane.b32.xlu2 %v6235_v29, %s3585_s27 }
 0x42e   : > { %v6243_v18 = vpop.permute.xlu1 %2267  ;;  %v6245_v22 = vpop.permute.xlu0 %2265 }
 0x42f   : > { %8317 = vst [vmem:[#allocation183_spill] sm:$0xff] %v6245_v22  ;;  %v6248_v56 = vpop.permute.xlu2 %2293 }
 0x430   : > { %8318 = vst [vmem:[#allocation184_spill] sm:$0xff] %v6248_v56 }
 0x434   : > { %2388 = vrot.lane.b32.xlu1 %v6252_v43, %s3585_s27  ;;  %2386 = vrot.lane.b32.xlu0 %v6255_v9, %s3585_s27 }
 0x435   : > { %2427 = vrot.lane.b32.xlu2 %v5679_v6, %s3587_s29 }
 0x436   : > { %v6263_v45 = vpop.permute.xlu1 %2273  ;;  %v6265_v56 = vpop.permute.xlu0 %2271 }
 0x437   : > { %8321 = vst [vmem:[#allocation27_spill] sm:$0xff] %v6265_v56  ;;  %v6267_v22 = vpop.permute.xlu2 %2330 }
 0x438   : > { %8322 = vst [vmem:[#allocation43_spill] sm:$0xff] %v6267_v22 }
 0x43c   : > { %2425 = vrot.lane.b32.xlu1 %v5658_v28, %s3587_s29  ;;  %2423 = vrot.lane.b32.xlu0 %v5655_v48, %s3587_s29 }
 0x43d   : > { %2433 = vrot.lane.b32.xlu2 %v5706_v61, %s3587_s29 }
 0x43e   : > { %v6275_v59 = vpop.permute.xlu1 %2279  ;;  %v6277_v8 = vpop.permute.xlu0 %2277 }
 0x43f   : > { %8323 = vst [vmem:[#allocation59_spill] sm:$0xff] %v6277_v8  ;;  %v6279_v12 = vpop.permute.xlu2 %2336 }
 0x440   : > { %8324 = vst [vmem:[#allocation58_spill] sm:$0xff] %v6279_v12 }
 0x444   : > { %2431 = vrot.lane.b32.xlu1 %v5703_v21, %s3587_s29  ;;  %2429 = vrot.lane.b32.xlu0 %v5682_v27, %s3587_s29 }
 0x445   : > { %2439 = vrot.lane.b32.xlu2 %v5759_v44, %s3587_s29 }
 0x446   : > { %v6287_v57 = vpop.permute.xlu1 %2285  ;;  %v6289_v28 = vpop.permute.xlu0 %2283 }
 0x447   : > { %8325 = vst [vmem:[#allocation85_spill] sm:$0xff] %v6287_v57  ;;  %v6291_v22 = vpop.permute.xlu2 %2342 }
 0x448   : > { %8326 = vst [vmem:[#allocation73_spill] sm:$0xff] %v6289_v28 }
 0x449   : > { %8327 = vst [vmem:[#allocation19_spill] sm:$0xff] %v6291_v22 }
 0x44c   : > { %2437 = vrot.lane.b32.xlu1 %v5730_v11, %s3587_s29  ;;  %2435 = vrot.lane.b32.xlu0 %v5727_v23, %s3587_s29 }
 0x44d   : > { %2445 = vrot.lane.b32.xlu2 %v5811_v4, %s3587_s29 }
 0x44e   : > { %v6299_v12 = vpop.permute.xlu1 %2291  ;;  %v6301_v8 = vpop.permute.xlu0 %2289 }
 0x44f   : > { %8328 = vst [vmem:[#allocation75_spill] sm:$0xff] %v6299_v12  ;;  %v6303_v48 = vpop.permute.xlu2 %2348 }
 0x450   : > { %8329 = vst [vmem:[#allocation7_spill] sm:$0xff] %v6301_v8 }
 0x451   : > { %8330 = vst [vmem:[#allocation82_spill] sm:$0xff] %v6303_v48 }
 0x454   : > { %2443 = vrot.lane.b32.xlu1 %v5808_v24, %s3587_s29  ;;  %2441 = vrot.lane.b32.xlu0 %v5762_v41, %s3587_s29 }
 0x455   : > { %2451 = vrot.lane.b32.xlu2 %v5849_v47, %s3587_s29 }
 0x456   : > { %v6311_v22 = vpop.permute.xlu1 %2297  ;;  %v6313_v28 = vpop.permute.xlu0 %2295 }
 0x457   : > { %8331 = vst [vmem:[#allocation30_spill] sm:$0xff] %v6311_v22  ;;  %v6315_v56 = vpop.permute.xlu2 %2354 }
 0x458   : > { %8332 = vst [vmem:[#allocation112_spill] sm:$0xff] %v6313_v28 }
 0x45c   : > { %2449 = vrot.lane.b32.xlu1 %v5779_v7, %s3587_s29  ;;  %2447 = vrot.lane.b32.xlu0 %v5789_v40, %s3587_s29 }
 0x45d   : > { %2457 = vrot.lane.b32.xlu2 %v5867_v14, %s3587_s29 }
 0x45e   : > { %v6323_v48 = vpop.permute.xlu1 %2334  ;;  %v6325_v8 = vpop.permute.xlu0 %2332 }
 0x45f   : > { %8333 = vst [vmem:[#allocation119_spill] sm:$0xff] %v6323_v48  ;;  %v6327_v12 = vpop.permute.xlu2 %2360 }
 0x460   : > { %8334 = vst [vmem:[#allocation125_spill] sm:$0xff] %v6325_v8 }
 0x464   : > { %2455 = vrot.lane.b32.xlu1 %v5885_v26, %s3587_s29  ;;  %2453 = vrot.lane.b32.xlu0 %v5802_v34, %s3587_s29 }
 0x465   : > { %2463 = vrot.lane.b32.xlu2 %v5911_v17, %s3587_s29 }
 0x466   : > { %v6335_v28 = vpop.permute.xlu1 %2340  ;;  %v6337_v22 = vpop.permute.xlu0 %2338 }
 0x467   : > { %8335 = vst [vmem:[#allocation141_spill] sm:$0xff] %v6335_v28  ;;  %v6339_v57 = vpop.permute.xlu2 %2366  ;;  %v1848_v28 = vpop.f32.mrf.mxu3 }
 0x468   : > { %8336 = vst [vmem:[#allocation143_spill] sm:$0xff] %v6337_v22 }
 0x46c   : > { %2461 = vrot.lane.b32.xlu1 %v5844_v60, %s3587_s29  ;;  %2459 = vrot.lane.b32.xlu0 %v5853_v39, %s3587_s29 }
 0x46d   : > { %2469 = vrot.lane.b32.xlu2 %v5939_v54, %s3587_s29 }
 0x46e   : > { %v6347_v48 = vpop.permute.xlu1 %2346  ;;  %v6349_v8 = vpop.permute.xlu0 %2344 }
 0x46f   : > { %8337 = vst [vmem:[#allocation38_spill] sm:$0xff] %v6347_v48  ;;  %v6351_v17 = vpop.permute.xlu2 %2372  ;;  %v1851_v48 = vpop.f32.mrf.mxu3 }
 0x470   : > { %8338 = vst [vmem:[#allocation159_spill] sm:$0xff] %v6349_v8 }
 0x474   : > { %2467 = vrot.lane.b32.xlu1 %v5960_v0, %s3587_s29  ;;  %2465 = vrot.lane.b32.xlu0 %v5880_v35, %s3587_s29  ;;  %v1849_v35 = vadd.f32 %v5621_v46, %v1848_v28 }
 0x475   : > { %2475 = vrot.lane.b32.xlu2 %v5988_v31, %s3587_s29  ;;  %v1852_v31 = vadd.f32 %v5621_v46, %v1851_v48 }
 0x476   : > { %v6359_v22 = vpop.permute.xlu1 %2352  ;;  %v6361_v60 = vpop.permute.xlu0 %2350 }
 0x477   : > { %8339 = vst [vmem:[#allocation172_spill] sm:$0xff] %v6359_v22  ;;  %v6363_v39 = vpop.permute.xlu2 %2378  ;;  %v1885_v22 = vmax.f32 %v1852_v31, 0.0 }
 0x478   : > { %8340 = vst [vmem:[#allocation176_spill] sm:$0xff] %v6361_v60 }
 0x479   : > { %8341 = vst [vmem:[#allocation186_spill] sm:$0xff] %v6363_v39  ;;  %v1884_v39 = vmax.f32 %v1849_v35, 0.0 }
 0x47b   : > { %v1963_v28 = vrot.slane %v1884_v39, 7 }
 0x47c   : > { %2473 = vrot.lane.b32.xlu1 %v5921_v53, %s3587_s29  ;;  %2471 = vrot.lane.b32.xlu0 %v5926_v62, %s3587_s29 }
 0x47d   : > { %2481 = vrot.lane.b32.xlu2 %v5999_v19, %s3587_s29  ;;  %v6389_v19 = vrot.slane %v1885_v22, 7  ;;  %v6398_v35 = vsel %vm289_vm0, 0.0, %v1963_v28 }
 0x47e   : > { %v6371_v8 = vpop.permute.xlu1 %2358  ;;  %v6373_v0 = vpop.permute.xlu0 %2356 }
 0x47f   : > { %v6377_v60 = vpop.permute.xlu2 %2384  ;;  %v6395_v48 = vsel %vm289_vm0, %v1963_v28, %v6389_v19 }
 0x484   : > { %2479 = vrot.lane.b32.xlu1 %v6011_v32, %s3587_s29  ;;  %2477 = vrot.lane.b32.xlu0 %v5952_v16, %s3587_s29  ;;  %v8355_v16 = vld [vmem:[#allocation61_spill] sm:$0xff] }
 0x485   : > { %2519 = vrot.lane.b32.xlu2 %v5671_v63, %s3589_s6 }
 0x486   : > { %v6385_v53 = vpop.permute.xlu1 %2364  ;;  %v6387_v62 = vpop.permute.xlu0 %2362 }
 0x487   : > { %8342 = vst [vmem:[#allocation190_spill] sm:$0xff] %v6385_v53  ;;  %v6391_v46 = vpop.permute.xlu2 %2390 }
 0x488   : > { %8343 = vst [vmem:[#allocation194_spill] sm:$0xff] %v6387_v62  ;;  %v6527_v62 = vsel %vm289_vm0, %v6389_v19, 0.0  ;;  %vm3215_vm0 = vcmask 523264  }
 0x489   : > { %8344 = vst [vmem:[#allocation15_spill] sm:$0xff] %v6391_v46 }
 0x48c   : > { %2485 = vrot.lane.b32.xlu1 %v6395_v48, %s3587_s29  ;;  %2483 = vrot.lane.b32.xlu0 %v6398_v35, %s3587_s29  ;;  %s3533_s29 = sshll.u32 %s8602_s19, 4 }
 0x48d   : > { %2525 = vrot.lane.b32.xlu2 %v5692_v51, %s3589_s6  ;;  %s224_s7 = scalar_lea.vmem %s7480_s5, %s3533_s29 }
 0x48e   : > { %v6406_v63 = vpop.permute.xlu1 %2370  ;;  %v6408_v39 = vpop.permute.xlu0 %2368 }
 0x48f   : > { %8345 = vst [vmem:[#allocation17_spill] sm:$0xff] %v6406_v63  ;;  %v6410_v31 = vpop.permute.xlu2 %2427 }
 0x490   : > { %8346 = vst [vmem:[#allocation21_spill] sm:$0xff] %v6408_v39  ;;  %v8379_v39 = vld [vmem:[#allocation107_spill] sm:$0xff] }
 0x491   : > { %8347 = vst [vmem:[#allocation65_spill] sm:$0xff] %v6410_v31 }
 0x494   : > { %2523 = vrot.lane.b32.xlu1 %v5695_v52, %s3589_s6  ;;  %2521 = vrot.lane.b32.xlu0 %v5668_v30, %s3589_s6  ;;  %v8351_v52 = vld [vmem:[#allocation64_spill] sm:$0xff] }
 0x495   : > { %2531 = vrot.lane.b32.xlu2 %v5744_v36, %s3589_s6 }
 0x496   : > { %v6418_v22 = vpop.permute.xlu1 %2376  ;;  %v6420_v28 = vpop.permute.xlu0 %2374 }
 0x497   : > { %8348 = vst [vmem:[#allocation77_spill] sm:$0xff] %v6418_v22  ;;  %v6422_v51 = vpop.permute.xlu2 %2433 }
 0x498   : > { %8349 = vst [vmem:[#allocation197_spill] sm:$0xff] %v6420_v28 }
 0x499   : > { %8350 = vst [vmem:[#allocation80_spill] sm:$0xff] %v6422_v51  ;;  %v8356_v51 = vld [vmem:[#allocation104_spill] sm:$0xff] }
 0x49c   : > { %2529 = vrot.lane.b32.xlu1 %v5716_v13, %s3589_s6  ;;  %2527 = vrot.lane.b32.xlu0 %v5719_v3, %s3589_s6  ;;  %v8357_v13 = vld [vmem:[#allocation68_spill] sm:$0xff] }
 0x49d   : > { %2537 = vrot.lane.b32.xlu2 %v8351_v52, %s3589_s6 }
 0x49e   : > { %v6430_v46 = vpop.permute.xlu1 %2382  ;;  %v6432_v30 = vpop.permute.xlu0 %2380 }
 0x49f   : > { %8352 = vst [vmem:[#allocation6_spill] sm:$0xff] %v6430_v46  ;;  %v6434_v36 = vpop.permute.xlu2 %2439  ;;  %v8360_v46 = vld [vmem:[#allocation106_spill] sm:$0xff] }
 0x4a0   : > { %8353 = vst [vmem:[#allocation89_spill] sm:$0xff] %v6432_v30 }
 0x4a1   : > { %8354 = vst [vmem:[#allocation18_spill] sm:$0xff] %v6434_v36  ;;  %v8361_v36 = vld [vmem:[#allocation113_spill] sm:$0xff] }
 0x4a4   : > { %2535 = vrot.lane.b32.xlu1 %v8355_v16, %s3589_s6  ;;  %2533 = vrot.lane.b32.xlu0 %v8356_v51, %s3589_s6  ;;  %v8362_v16 = vld [vmem:[#allocation135_spill] sm:$0xff] }
 0x4a5   : > { %2543 = vrot.lane.b32.xlu2 %v8357_v13, %s3589_s6 }
 0x4a6   : > { %v6442_v28 = vpop.permute.xlu1 %2388  ;;  %v6444_v3 = vpop.permute.xlu0 %2386 }
 0x4a7   : > { %8358 = vst [vmem:[#allocation95_spill] sm:$0xff] %v6442_v28  ;;  %v6446_v52 = vpop.permute.xlu2 %2445  ;;  %v8365_v28 = vld [vmem:[#allocation48_spill] sm:$0xff] }
 0x4a8   : > { %8359 = vst [vmem:[#allocation29_spill] sm:$0xff] %v6444_v3  ;;  %v8366_v3 = vld [vmem:[#allocation166_spill] sm:$0xff] }
 0x4ac   : > { %2541 = vrot.lane.b32.xlu1 %v8360_v46, %s3589_s6  ;;  %2539 = vrot.lane.b32.xlu0 %v8361_v36, %s3589_s6  ;;  %v8367_v46 = vld [vmem:[#allocation81_spill] sm:$0xff] }
 0x4ad   : > { %2549 = vrot.lane.b32.xlu2 %v8362_v16, %s3589_s6 }
 0x4ae   : > { %v6454_v30 = vpop.permute.xlu1 %2425  ;;  %v6456_v51 = vpop.permute.xlu0 %2423 }
 0x4af   : > { %8363 = vst [vmem:[#allocation102_spill] sm:$0xff] %v6454_v30  ;;  %v6458_v13 = vpop.permute.xlu2 %2451  ;;  %v8371_v30 = vld [vmem:[#allocation115_spill] sm:$0xff] }
 0x4b0   : > { %8364 = vst [vmem:[#allocation121_spill] sm:$0xff] %v6456_v51  ;;  %v8372_v51 = vld [vmem:[#allocation139_spill] sm:$0xff] }
 0x4b4   : > { %2547 = vrot.lane.b32.xlu1 %v8365_v28, %s3589_s6  ;;  %2545 = vrot.lane.b32.xlu0 %v8366_v3, %s3589_s6  ;;  %v8373_v28 = vld [vmem:[#allocation60_spill] sm:$0xff] }
 0x4b5   : > { %2555 = vrot.lane.b32.xlu2 %v8367_v46, %s3589_s6 }
 0x4b6   : > { %v6466_v22 = vpop.permute.xlu1 %2431  ;;  %v6468_v36 = vpop.permute.xlu0 %2429 }
 0x4b7   : > { %8368 = vst [vmem:[#allocation127_spill] sm:$0xff] %v6466_v22  ;;  %v6470_v32 = vpop.permute.xlu2 %2457  ;;  %v8377_v22 = vld [vmem:[#allocation105_spill] sm:$0xff] }
 0x4b8   : > { %8369 = vst [vmem:[#allocation144_spill] sm:$0xff] %v6468_v36  ;;  %v8378_v36 = vld [vmem:[#allocation83_spill] sm:$0xff] }
 0x4b9   : > { %8370 = vst [vmem:[#allocation149_spill] sm:$0xff] %v6470_v32 }
 0x4bc   : > { %2553 = vrot.lane.b32.xlu1 %v8371_v30, %s3589_s6  ;;  %2551 = vrot.lane.b32.xlu0 %v8372_v51, %s3589_s6 }
 0x4bd   : > { %2561 = vrot.lane.b32.xlu2 %v8373_v28, %s3589_s6 }
 0x4be   : > { %v6478_v31 = vpop.permute.xlu1 %2437  ;;  %v6480_v3 = vpop.permute.xlu0 %2435 }
 0x4bf   : > { %8374 = vst [vmem:[#allocation46_spill] sm:$0xff] %v6478_v31  ;;  %v6482_v46 = vpop.permute.xlu2 %2463  ;;  %v8383_v31 = vld [vmem:[#allocation163_spill] sm:$0xff] }
 0x4c0   : > { %8375 = vst [vmem:[#allocation72_spill] sm:$0xff] %v6480_v3  ;;  %v8384_v3 = vld [vmem:[#allocation167_spill] sm:$0xff] }
 0x4c1   : > { %8376 = vst [vmem:[#allocation165_spill] sm:$0xff] %v6482_v46 }
 0x4c4   : > { %2559 = vrot.lane.b32.xlu1 %v8377_v22, %s3589_s6  ;;  %2557 = vrot.lane.b32.xlu0 %v8378_v36, %s3589_s6  ;;  %v8385_v22 = vld [vmem:[#allocation67_spill] sm:$0xff] }
 0x4c5   : > { %2567 = vrot.lane.b32.xlu2 %v8379_v39, %s3589_s6 }
 0x4c6   : > { %v6490_v63 = vpop.permute.xlu1 %2443  ;;  %v6492_v32 = vpop.permute.xlu0 %2441 }
 0x4c7   : > { %8380 = vst [vmem:[#allocation168_spill] sm:$0xff] %v6490_v63  ;;  %v6494_v28 = vpop.permute.xlu2 %2469  ;;  %v2228_v63 = vrot.slane %v6395_v48, 1 }
 0x4c8   : > { %8381 = vst [vmem:[#allocation182_spill] sm:$0xff] %v6492_v32  ;;  %v2227_v32 = vrot.slane %v6398_v35, 1 }
 0x4c9   : > { %8382 = vst [vmem:[#allocation192_spill] sm:$0xff] %v6494_v28 }
 0x4ca   : > { %v6511_v28 = vsel %vm448_vm1, %v2227_v32, %v2228_v63  ;;  %v8390_v32 = vld [vmem:[#allocation138_spill] sm:$0xff] }
 0x4cb   : > { %8387 = vst [vmem:[#allocation20_spill] sm:$0xff] %v6511_v28 }
 0x4cc   : > { %2565 = vrot.lane.b32.xlu1 %v8383_v31, %s3589_s6  ;;  %2563 = vrot.lane.b32.xlu0 %v8384_v3, %s3589_s6  ;;  %v8388_v3 = vld [vmem:[#allocation79_spill] sm:$0xff] }
 0x4cd   : > { %2573 = vrot.lane.b32.xlu2 %v8385_v22, %s3589_s6 }
 0x4ce   : > { %v6502_v46 = vpop.permute.xlu1 %2449  ;;  %v6504_v36 = vpop.permute.xlu0 %2447 }
 0x4cf   : > { %v6506_v39 = vpop.permute.xlu2 %2475 }
 0x4d0   : > { %8386 = vst [vmem:[#allocation8_spill] sm:$0xff] %v6506_v39 }
 0x4d4   : > { %2571 = vrot.lane.b32.xlu1 %v5996_v38, %s3589_s6  ;;  %2569 = vrot.lane.b32.xlu0 %v8388_v3, %s3589_s6  ;;  %v8391_v38 = vld [vmem:[#allocation140_spill] sm:$0xff] }
 0x4d5   : > { %2579 = vrot.lane.b32.xlu2 %v6511_v28, %s3589_s6 }
 0x4d6   : > { %v6519_v31 = vpop.permute.xlu1 %2455  ;;  %v6521_v22 = vpop.permute.xlu0 %2453 }
 0x4d7   : > { %v6523_v39 = vpop.permute.xlu2 %2481 }
 0x4d8   : > { %8389 = vst [vmem:[#allocation28_spill] sm:$0xff] %v6523_v39  ;;  %v2230_v39 = vrot.slane %v6527_v62, 1 }
 0x4da   : > { %v6543_v19 = vsel %vm448_vm1, %v2228_v63, %v2230_v39  ;;  %v8397_v63 = vld [vmem:[#allocation31_spill] sm:$0xff]  ;;  %vm3255_vm1 = vcmask 588800  }
 0x4dc   : > { %2577 = vrot.lane.b32.xlu1 %v8390_v32, %s3589_s6  ;;  %2575 = vrot.lane.b32.xlu0 %v8391_v38, %s3589_s6  ;;  %v8394_v32 = vld [vmem:[#allocation169_spill] sm:$0xff] }
 0x4dd   : > { %2617 = vrot.lane.b32.xlu2 %v6041_v33, %s3590_s21 }
 0x4de   : > { %v6535_v3 = vpop.permute.xlu1 %2461  ;;  %v6537_v28 = vpop.permute.xlu0 %2459 }
 0x4df   : > { %8392 = vst [vmem:[#allocation150_spill] sm:$0xff] %v6537_v28  ;;  %v6540_v53 = vpop.permute.xlu2 %2519 }
 0x4e0   : > { %8393 = vst [vmem:[#allocation55_spill] sm:$0xff] %v6540_v53  ;;  %v8400_v53 = vld [vmem:[#allocation142_spill] sm:$0xff] }
 0x4e4   : > { %2615 = vrot.lane.b32.xlu1 %v8394_v32, %s3590_s21  ;;  %2581 = vrot.lane.b32.xlu0 %v6543_v19, %s3589_s6 }
 0x4e5   : > { %2623 = vrot.lane.b32.xlu2 %v6062_v37, %s3590_s21 }
 0x4e6   : > { %v6551_v33 = vpop.permute.xlu1 %2467  ;;  %v6553_v38 = vpop.permute.xlu0 %2465 }
 0x4e7   : > { %8395 = vst [vmem:[#allocation86_spill] sm:$0xff] %v6553_v38  ;;  %v6555_v28 = vpop.permute.xlu2 %2525  ;;  %v8408_v38 = vld [vmem:[#allocation193_spill] sm:$0xff] }
 0x4e8   : > { %8396 = vst [vmem:[#allocation199_spill] sm:$0xff] %v6555_v28  ;;  %v8401_v28 = vld [vmem:[#allocation74_spill] sm:$0xff] }
 0x4ec   : > { %2621 = vrot.lane.b32.xlu1 %v6065_v2, %s3590_s21  ;;  %2619 = vrot.lane.b32.xlu0 %v8397_v63, %s3590_s21 }
 0x4ed   : > { %2629 = vrot.lane.b32.xlu2 %v6084_v1, %s3590_s21 }
 0x4ee   : > { %v6563_v39 = vpop.permute.xlu1 %2473  ;;  %v6565_v32 = vpop.permute.xlu0 %2471 }
 0x4ef   : > { %8398 = vst [vmem:[#allocation91_spill] sm:$0xff] %v6565_v32  ;;  %v6567_v37 = vpop.permute.xlu2 %2531 }
 0x4f0   : > { %8399 = vst [vmem:[#allocation23_spill] sm:$0xff] %v6567_v37  ;;  %v8404_v37 = vld [vmem:[#allocation99_spill] sm:$0xff] }
 0x4f4   : > { %2627 = vrot.lane.b32.xlu1 %v8400_v53, %s3590_s21  ;;  %2625 = vrot.lane.b32.xlu0 %v8401_v28, %s3590_s21  ;;  %v8405_v53 = vld [vmem:[#allocation189_spill] sm:$0xff] }
 0x4f5   : > { %2635 = vrot.lane.b32.xlu2 %v6105_v20, %s3590_s21 }
 0x4f6   : > { %v6575_v2 = vpop.permute.xlu1 %2479  ;;  %v6577_v63 = vpop.permute.xlu0 %2477 }
 0x4f7   : > { %8402 = vst [vmem:[#allocation97_spill] sm:$0xff] %v6577_v63  ;;  %v6579_v1 = vpop.permute.xlu2 %2537  ;;  %v8415_v63 = vld [vmem:[#allocation14_spill] sm:$0xff] }
 0x4f8   : > { %8403 = vst [vmem:[#allocation35_spill] sm:$0xff] %v6579_v1  ;;  %v8409_v1 = vld [vmem:[#allocation146_spill] sm:$0xff] }
 0x4fc   : > { %2633 = vrot.lane.b32.xlu1 %v6108_v15, %s3590_s21  ;;  %2631 = vrot.lane.b32.xlu0 %v8404_v37, %s3590_s21 }
 0x4fd   : > { %2641 = vrot.lane.b32.xlu2 %v8405_v53, %s3590_s21 }
 0x4fe   : > { %v6587_v32 = vpop.permute.xlu1 %2485  ;;  %v6589_v28 = vpop.permute.xlu0 %2483 }
 0x4ff   : > { %8406 = vst [vmem:[#allocation111_spill] sm:$0xff] %v6587_v32  ;;  %v6591_v20 = vpop.permute.xlu2 %2543 }
 0x500   : > { %8407 = vst [vmem:[#allocation117_spill] sm:$0xff] %v6589_v28  ;;  %v8412_v28 = vld [vmem:[#allocation78_spill] sm:$0xff] }
 0x504   : > { %2639 = vrot.lane.b32.xlu1 %v8408_v38, %s3590_s21  ;;  %2637 = vrot.lane.b32.xlu0 %v8409_v1, %s3590_s21 }
 0x505   : > { %2647 = vrot.lane.b32.xlu2 %v6152_v55, %s3590_s21 }
 0x506   : > { %v6599_v15 = vpop.permute.xlu1 %2523  ;;  %v6601_v37 = vpop.permute.xlu0 %2521 }
 0x507   : > { %8410 = vst [vmem:[#allocation153_spill] sm:$0xff] %v6599_v15  ;;  %v6603_v53 = vpop.permute.xlu2 %2549 }
 0x508   : > { %8411 = vst [vmem:[#allocation156_spill] sm:$0xff] %v6601_v37  ;;  %v8416_v37 = vld [vmem:[#allocation16_spill] sm:$0xff] }
 0x50c   : > { %2645 = vrot.lane.b32.xlu1 %v6155_v42, %s3590_s21  ;;  %2643 = vrot.lane.b32.xlu0 %v8412_v28, %s3590_s21 }
 0x50d   : > { %2653 = vrot.lane.b32.xlu2 %v6178_v58, %s3590_s21 }
 0x50e   : > { %v6611_v32 = vpop.permute.xlu1 %2529  ;;  %v6613_v1 = vpop.permute.xlu0 %2527 }
 0x50f   : > { %8413 = vst [vmem:[#allocation173_spill] sm:$0xff] %v6611_v32  ;;  %v6615_v38 = vpop.permute.xlu2 %2555 }
 0x510   : > { %8414 = vst [vmem:[#allocation177_spill] sm:$0xff] %v6613_v1  ;;  %v8420_v1 = vld [vmem:[#allocation71_spill] sm:$0xff] }
 0x514   : > { %2651 = vrot.lane.b32.xlu1 %v8415_v63, %s3590_s21  ;;  %2649 = vrot.lane.b32.xlu0 %v8416_v37, %s3590_s21 }
 0x515   : > { %2659 = vrot.lane.b32.xlu2 %v6203_v50, %s3590_s21 }
 0x516   : > { %v6623_v15 = vpop.permute.xlu1 %2535  ;;  %v6625_v28 = vpop.permute.xlu0 %2533 }
 0x517   : > { %8417 = vst [vmem:[#allocation185_spill] sm:$0xff] %v6623_v15  ;;  %v6627_v58 = vpop.permute.xlu2 %2561 }
 0x518   : > { %8418 = vst [vmem:[#allocation188_spill] sm:$0xff] %v6625_v28  ;;  %v8423_v28 = vld [vmem:[#allocation94_spill] sm:$0xff] }
 0x519   : > { %8419 = vst [vmem:[#allocation33_spill] sm:$0xff] %v6627_v58 }
 0x51c   : > { %2657 = vrot.lane.b32.xlu1 %v6206_v49, %s3590_s21  ;;  %2655 = vrot.lane.b32.xlu0 %v8420_v1, %s3590_s21 }
 0x51d   : > { %2665 = vrot.lane.b32.xlu2 %v6229_v25, %s3590_s21  ;;  %v2235_v25 = vrot.slane %v6527_v62, 2  ;;  %v2232_v62 = vrot.slane %v6398_v35, 2 }
 0x51e   : > { %v6635_v63 = vpop.permute.xlu1 %2541  ;;  %v6637_v32 = vpop.permute.xlu0 %2539 }
 0x51f   : > { %8421 = vst [vmem:[#allocation151_spill] sm:$0xff] %v6637_v32  ;;  %v6639_v50 = vpop.permute.xlu2 %2567  ;;  %v2233_v32 = vrot.slane %v6395_v48, 2 }
 0x520   : > { %8422 = vst [vmem:[#allocation70_spill] sm:$0xff] %v6639_v50 }
 0x521   : > { %v6654_v50 = vsel %vm526_vm2, %v2233_v32, %v2235_v25  ;;  %v6668_v58 = vsel %vm526_vm2, %v2232_v62, %v2233_v32 }
 0x524   : > { %2663 = vrot.lane.b32.xlu1 %v6232_v5, %s3590_s21  ;;  %2661 = vrot.lane.b32.xlu0 %v8423_v28, %s3590_s21  ;;  %v8425_v28 = vld [vmem:[#allocation148_spill] sm:$0xff] }
 0x525   : > { %2671 = vrot.lane.b32.xlu2 %v6252_v43, %s3590_s21 }
 0x526   : > { %v6647_v49 = vpop.permute.xlu1 %2547  ;;  %v2546_v1 = vpop.permute.xlu0 %2545 }
 0x527   : > { %v6649_v15 = vpop.permute.xlu2 %2573 }
 0x528   : > { %8424 = vst [vmem:[#allocation195_spill] sm:$0xff] %v6649_v15 }
 0x52c   : > { %2669 = vrot.lane.b32.xlu1 %v6255_v9, %s3590_s21  ;;  %2667 = vrot.lane.b32.xlu0 %v8425_v28, %s3590_s21 }
 0x52d   : > { %2677 = vrot.lane.b32.xlu2 %v6654_v50, %s3590_s21 }
 0x52e   : > { %v6662_v5 = vpop.permute.xlu1 %2553  ;;  %v2552_v43 = vpop.permute.xlu0 %2551 }
 0x52f   : > { %v6664_v15 = vpop.permute.xlu2 %2579 }
 0x530   : > { %8426 = vst [vmem:[#allocation87_spill] sm:$0xff] %v6664_v15 }
 0x534   : > { %2675 = vrot.lane.b32.xlu1 %v6668_v58, %s3590_s21  ;;  %2673 = vrot.lane.b32.xlu0 %v6235_v29, %s3590_s21 }
 0x535   : > { %2715 = vrot.lane.b32.xlu2 %v5703_v21, %s3591_s22 }
 0x536   : > { %v6676_v25 = vpop.permute.xlu1 %2559  ;;  %v2558_v28 = vpop.permute.xlu0 %2557 }
 0x537   : > { %v6678_v9 = vpop.permute.xlu2 %2617 }
 0x538   : > { %8427 = vst [vmem:[#allocation34_spill] sm:$0xff] %v6678_v9 }
 0x53c   : > { %2713 = vrot.lane.b32.xlu1 %v5682_v27, %s3591_s22  ;;  %2711 = vrot.lane.b32.xlu0 %v5679_v6, %s3591_s22 }
 0x53d   : > { %2721 = vrot.lane.b32.xlu2 %v5730_v11, %s3591_s22 }
 0x53e   : > { %v6686_v32 = vpop.permute.xlu1 %2565  ;;  %v2564_v62 = vpop.permute.xlu0 %2563 }
 0x53f   : > { %8428 = vst [vmem:[#allocation128_spill] sm:$0xff] %v6686_v32  ;;  %v6688_v15 = vpop.permute.xlu2 %2623 }
 0x540   : > { %8429 = vst [vmem:[#allocation147_spill] sm:$0xff] %v6688_v15 }
 0x544   : > { %2719 = vrot.lane.b32.xlu1 %v5727_v23, %s3591_s22  ;;  %2717 = vrot.lane.b32.xlu0 %v5706_v61, %s3591_s22 }
 0x545   : > { %2727 = vrot.lane.b32.xlu2 %v5808_v24, %s3591_s22 }
 0x546   : > { %v6696_v21 = vpop.permute.xlu1 %2571  ;;  %v6698_v6 = vpop.permute.xlu0 %2569 }
 0x547   : > { %8430 = vst [vmem:[#allocation178_spill] sm:$0xff] %v6696_v21  ;;  %v6700_v9 = vpop.permute.xlu2 %2629  ;;  %v3002_v21 = vsel %vm1401_vm6, %v5811_v4, %v6217_v10 }
 0x548   : > { %8431 = vst [vmem:[#allocation9_spill] sm:$0xff] %v6700_v9 }
 0x54c   : > { %2725 = vrot.lane.b32.xlu1 %v5762_v41, %s3591_s22  ;;  %2723 = vrot.lane.b32.xlu0 %v5759_v44, %s3591_s22  ;;  %v3033_v44 = vsel %vm1466_vm7, %v3002_v21, %v6315_v56  ;;  %v3005_v21 = vsel %vm1401_vm6, %v5849_v47, %v6243_v18 }
 0x54d   : > { %2733 = vrot.lane.b32.xlu2 %v5779_v7, %s3591_s22 }
 0x54e   : > { %v6708_v11 = vpop.permute.xlu1 %2577  ;;  %v6710_v61 = vpop.permute.xlu0 %2575 }
 0x54f   : > { %8432 = vst [vmem:[#allocation26_spill] sm:$0xff] %v6708_v11  ;;  %v6712_v15 = vpop.permute.xlu2 %2635  ;;  %v3065_v11 = vsel %vm1532_vm8, %v3033_v44, %v6502_v46  ;;  %v3036_v44 = vsel %vm1466_vm7, %v3005_v21, %v6327_v12  ;;  %v8435_v12 = vld [vmem:[#allocation2_spill] sm:$0xff] }
 0x550   : > { %8433 = vst [vmem:[#allocation200_spill] sm:$0xff] %v6712_v15  ;;  %v3097_v10 = vsel %vm1598_vm12, %v3065_v11, %v2546_v1  ;;  %v8434_v11 = vld [vmem:[#allocation44_spill] sm:$0xff] }
 0x554   : > { %2731 = vrot.lane.b32.xlu1 %v5789_v40, %s3591_s22  ;;  %2729 = vrot.lane.b32.xlu0 %v5811_v4, %s3591_s22 }
 0x555   : > { %2739 = vrot.lane.b32.xlu2 %v5885_v26, %s3591_s22 }
 0x556   : > { %v6727_v15 = vpop.permute.xlu1 %2615  ;;  %v6729_v9 = vpop.permute.xlu0 %2581 }
 0x557   : > { %v2642_v23 = vpop.permute.xlu2 %2641 }
 0x558   : > { %v6733_v32 = vsel %vm3116_vm13, %v3097_v10, %v2642_v23  ;;  %v3068_v23 = vsel %vm1532_vm8, %v3036_v44, %v6519_v31  ;;  %v8436_v31 = vmov 0.0  }
 0x559   : > { %v3100_v18 = vsel %vm1598_vm12, %v3068_v23, %v2552_v43 }
 0x55c   : > { %2737 = vrot.lane.b32.xlu1 %v5802_v34, %s3591_s22  ;;  %2735 = vrot.lane.b32.xlu0 %v5849_v47, %s3591_s22  ;;  %v3008_v47 = vsel %vm1401_vm6, %v5867_v14, %v6263_v45 }
 0x55d   : > { %2957 = vrot.lane.b32.xlu2 %v8434_v11, %s3592_s23  ;;  %v3039_v10 = vsel %vm1466_vm7, %v3008_v47, %v6339_v57 }
 0x55e   : > { %v6748_v4 = vpop.permute.xlu1 %2621  ;;  %v6750_v1 = vpop.permute.xlu0 %2619  ;;  %v3071_v43 = vsel %vm1532_vm8, %v3039_v10, %v6535_v3  ;;  %v8441_v10 = vld [vmem:[#allocation172_spill] sm:$0xff] }
 0x55f   : > { %v2648_v56 = vpop.permute.xlu2 %2647  ;;  %v3103_v45 = vsel %vm1598_vm12, %v3071_v43, %v2558_v28 }
 0x560   : > { %v6754_v46 = vsel %vm3116_vm13, %v3100_v18, %v2648_v56  ;;  %v8437_v18 = vld [vmem:[#allocation145_spill] sm:$0xff] }
 0x561   : > { %v3011_v57 = vsel %vm1401_vm6, %v8437_v18, %v6275_v59 }
 0x562   : > { %v3042_v3 = vsel %vm1466_vm7, %v3011_v57, %v6351_v17 }
 0x564   : > { %2864 = vrot.lane.b32.xlu1 %v8435_v12, %s3593_s24  ;;  %2771 = vrot.lane.b32.xlu0 %v8436_v31, %s3591_s22  ;;  %v8439_v12 = vld [vmem:[#allocation45_spill] sm:$0xff] }
 0x565   : > { %2769 = vrot.lane.b32.xlu2 %v6395_v48, %s3591_s22  ;;  %v3074_v48 = vsel %vm1532_vm8, %v3042_v3, %v6551_v33  ;;  %v8440_v31 = vld [vmem:[#allocation85_spill] sm:$0xff] }
 0x566   : > { %v6769_v21 = vpop.permute.xlu1 %2627  ;;  %v6771_v44 = vpop.permute.xlu0 %2625  ;;  %v3106_v59 = vsel %vm1598_vm12, %v3074_v48, %v2564_v62  ;;  %v3014_v33 = vsel %vm1401_vm6, %v5939_v54, %v8440_v31  ;;  %v8442_v62 = vld [vmem:[#allocation176_spill] sm:$0xff] }
 0x567   : > { %v2654_v11 = vpop.permute.xlu2 %2653 }
 0x568   : > { %v6775_v23 = vsel %vm3116_vm13, %v3103_v45, %v2654_v11 }
 0x56c   : > { %2834 = vrot.lane.b32.xlu1 %v8371_v30, %s3593_s24  ;;  %2741 = vrot.lane.b32.xlu0 %v5867_v14, %s3591_s22  ;;  %v8438_v14 = vld [vmem:[#allocation154_spill] sm:$0xff] }
 0x56d   : > { %2955 = vrot.lane.b32.xlu2 %v6654_v50, %s3592_s23  ;;  %v3000_v17 = vsel %vm1401_vm6, %v5762_v41, %v8438_v14  ;;  %v3001_v50 = vsel %vm1401_vm6, %v5808_v24, %v8439_v12  ;;  %v8443_v41 = vld [vmem:[#allocation186_spill] sm:$0xff]  ;;  %v8444_v14 = vld [vmem:[#allocation180_spill] sm:$0xff]  ;;  %v8446_v12 = vld [vmem:[#allocation75_spill] sm:$0xff] }
 0x56e   : > { %v6790_v28 = vpop.permute.xlu1 %2633  ;;  %v6792_v56 = vpop.permute.xlu0 %2631  ;;  %v3032_v43 = vsel %vm1466_vm7, %v3001_v50, %v8441_v10  ;;  %v3031_v45 = vsel %vm1466_vm7, %v3000_v17, %v8442_v62  ;;  %v3045_v11 = vsel %vm1466_vm7, %v3014_v33, %v8443_v41  ;;  %v8448_v62 = vld [vmem:[#allocation54_spill] sm:$0xff] }
 0x56f   : > { %v2660_v47 = vpop.permute.xlu2 %2659  ;;  %v3063_v24 = vsel %vm1532_vm8, %v3031_v45, %v6446_v52  ;;  %v3064_v57 = vsel %vm1532_vm8, %v3032_v43, %v6504_v36  ;;  %v3077_v3 = vsel %vm1532_vm8, %v3045_v11, %v6563_v39  ;;  %v8450_v41 = vld [vmem:[#allocation190_spill] sm:$0xff] }
 0x570   : > { %v6796_v30 = vsel %vm3116_vm13, %v3106_v59, %v2660_v47  ;;  %v3109_v52 = vsel %vm1598_vm12, %v3077_v3, %v6698_v6  ;;  %v8447_v6 = vld [vmem:[#allocation69_spill] sm:$0xff]  ;;  %v8451_v11 = vld [vmem:[#allocation194_spill] sm:$0xff] }
 0x571   : > { %v3017_v50 = vsel %vm1401_vm6, %v8447_v6, %v8446_v12  ;;  %v8453_v3 = vld [vmem:[#allocation149_spill] sm:$0xff] }
 0x574   : > { %2862 = vrot.lane.b32.xlu1 %v6543_v19, %s3593_s24  ;;  %2927 = vrot.lane.b32.xlu0 %v8416_v37, %s3592_s23  ;;  %v3096_v19 = vsel %vm1598_vm12, %v3064_v57, %v6591_v20  ;;  %v3095_v37 = vsel %vm1598_vm12, %v3063_v24, %v6635_v63  ;;  %v3003_v20 = vsel %vm1401_vm6, %v5789_v40, %v8444_v14  ;;  %v8445_v63 = vld [vmem:[#allocation183_spill] sm:$0xff]  ;;  %v8452_v57 = vld [vmem:[#allocation20_spill] sm:$0xff] }
 0x575   : > { %2925 = vrot.lane.b32.xlu2 %v6152_v55, %s3592_s23  ;;  %v3004_v17 = vsel %vm1401_vm6, %v5779_v7, %v8445_v63  ;;  %v3034_v33 = vsel %vm1466_vm7, %v3003_v20, %v6373_v0  ;;  %v3048_v40 = vsel %vm1466_vm7, %v3017_v50, %v6377_v60  ;;  %v8456_v63 = vld [vmem:[#allocation51_spill] sm:$0xff]  ;;  %v8458_v50 = vld [vmem:[#allocation5_spill] sm:$0xff] }
 0x576   : > { %v2640_v48 = vpop.permute.xlu1 %2639  ;;  %v2638_v59 = vpop.permute.xlu0 %2637  ;;  %v3035_v31 = vsel %vm1466_vm7, %v3004_v17, %v6371_v8  ;;  %v3066_v7 = vsel %vm1532_vm8, %v3034_v33, %v6458_v13  ;;  %v3080_v0 = vsel %vm1532_vm8, %v3048_v40, %v6575_v2  ;;  %v8457_v17 = vld [vmem:[#allocation56_spill] sm:$0xff]  ;;  %v8460_v33 = vld [vmem:[#allocation59_spill] sm:$0xff] }
 0x577   : > { %v2666_v47 = vpop.permute.xlu2 %2665  ;;  %v6832_v36 = vsel %vm3116_vm13, %v3096_v19, %v2640_v48  ;;  %v6835_v55 = vsel %vm3116_vm13, %v3095_v37, %v2638_v59  ;;  %v3067_v10 = vsel %vm1532_vm8, %v3035_v31, %v6521_v22  ;;  %v3112_v13 = vsel %vm1598_vm12, %v3080_v0, %v6710_v61  ;;  %v8459_v31 = vld [vmem:[#allocation155_spill] sm:$0xff]  ;;  %v8463_v0 = vld [vmem:[#allocation17_spill] sm:$0xff] }
 0x578   : > { %v6838_v39 = vsel %vm3116_vm13, %v3109_v52, %v2666_v47  ;;  %v3099_v8 = vsel %vm1598_vm12, %v3067_v10, %v6603_v53  ;;  %v3006_v53 = vsel %vm1401_vm6, %v5802_v34, %v8448_v62  ;;  %v8454_v34 = vld [vmem:[#allocation150_spill] sm:$0xff]  ;;  %v2991_v12 = vsel %vm1401_vm6, %v8457_v17, %v8456_v63  ;;  %v8467_v62 = vld [vmem:[#allocation165_spill] sm:$0xff]  ;;  %v8474_v63 = vld [vmem:[#allocation96_spill] sm:$0xff] }
 0x579   : > { %v3037_v24 = vsel %vm1466_vm7, %v3006_v53, %v8451_v11 }
 0x57a   : > { %v3069_v19 = vsel %vm1532_vm8, %v3037_v24, %v8453_v3 }
 0x57b   : > { %v3101_v59 = vsel %vm1598_vm12, %v3069_v19, %v6662_v5  ;;  %v8461_v5 = vld [vmem:[#allocation137_spill] sm:$0xff] }
 0x57c   : > { %2767 = vrot.lane.b32.xlu1 %v6398_v35, %s3591_s22  ;;  %2832 = vrot.lane.b32.xlu0 %v8372_v51, %s3593_s24  ;;  %v3098_v51 = vsel %vm1598_vm12, %v3066_v7, %v6647_v49  ;;  %v8449_v49 = vld [vmem:[#allocation27_spill] sm:$0xff]  ;;  %v3010_v40 = vsel %vm1401_vm6, %v8461_v5, %v8460_v33  ;;  %v8462_v7 = vld [vmem:[#allocation125_spill] sm:$0xff] }
 0x57d   : > { %2830 = vrot.lane.b32.xlu2 %v8362_v16, %s3593_s24  ;;  %v3007_v45 = vsel %vm1401_vm6, %v5885_v26, %v8449_v49  ;;  %v8455_v26 = vld [vmem:[#allocation138_spill] sm:$0xff]  ;;  %v3022_v10 = vsel %vm1466_vm7, %v2991_v12, %v8462_v7  ;;  %v8475_v12 = vld [vmem:[#allocation73_spill] sm:$0xff] }
 0x57e   : > { %v2646_v35 = vpop.permute.xlu1 %2645  ;;  %v2644_v60 = vpop.permute.xlu0 %2643  ;;  %v3038_v61 = vsel %vm1466_vm7, %v3007_v45, %v8450_v41  ;;  %v8468_v49 = vld [vmem:[#allocation86_spill] sm:$0xff] }
 0x57f   : > { %v2672_v43 = vpop.permute.xlu2 %2671  ;;  %v6874_v22 = vsel %vm3116_vm13, %v3099_v8, %v2646_v35  ;;  %v6877_v16 = vsel %vm3116_vm13, %v3098_v51, %v2644_v60  ;;  %v3070_v37 = vsel %vm1532_vm8, %v3038_v61, %v8454_v34  ;;  %v3041_v8 = vsel %vm1466_vm7, %v3010_v40, %v8463_v0  ;;  %v8464_v51 = vld [vmem:[#allocation21_spill] sm:$0xff]  ;;  %v8465_v60 = vld [vmem:[#allocation116_spill] sm:$0xff]  ;;  %v8469_v41 = vld [vmem:[#allocation122_spill] sm:$0xff] }
 0x580   : > { %v6880_v2 = vsel %vm3116_vm13, %v3112_v13, %v2672_v43  ;;  %v3102_v48 = vsel %vm1598_vm12, %v3070_v37, %v6615_v38  ;;  %v3009_v38 = vsel %vm1401_vm6, %v8459_v31, %v8458_v50  ;;  %v8466_v13 = vld [vmem:[#allocation65_spill] sm:$0xff]  ;;  %v3073_v45 = vsel %vm1532_vm8, %v3041_v8, %v8468_v49  ;;  %v8480_v8 = vld [vmem:[#allocation48_spill] sm:$0xff] }
 0x581   : > { %v3040_v35 = vsel %vm1466_vm7, %v3009_v38, %v8464_v51  ;;  %v3054_v43 = vsel %vm1532_vm8, %v3022_v10, %v8466_v13  ;;  %v8470_v61 = vld [vmem:[#allocation153_spill] sm:$0xff]  ;;  %v8477_v38 = vld [vmem:[#allocation143_spill] sm:$0xff] }
 0x582   : > { %v3072_v53 = vsel %vm1532_vm8, %v3040_v35, %v8467_v62  ;;  %v3086_v11 = vsel %vm1598_vm12, %v3054_v43, %v8470_v61  ;;  %v8478_v40 = vld [vmem:[#allocation77_spill] sm:$0xff]  ;;  %v8482_v35 = vld [vmem:[#allocation192_spill] sm:$0xff]  ;;  %v8483_v43 = vld [vmem:[#allocation91_spill] sm:$0xff] }
 0x583   : > { %v3119_v34 = vsel %vm3116_vm13, %v3086_v11, %v6750_v1  ;;  %v8476_v1 = vld [vmem:[#allocation39_spill] sm:$0xff]  ;;  %v8479_v10 = vld [vmem:[#allocation197_spill] sm:$0xff]  ;;  %v8486_v61 = vld [vmem:[#allocation70_spill] sm:$0xff] }
 0x584   : > { %2953 = vrot.lane.b32.xlu1 %v6668_v58, %s3592_s23  ;;  %2860 = vrot.lane.b32.xlu0 %v8452_v57, %s3593_s24  ;;  %v3104_v57 = vsel %vm1598_vm12, %v3072_v53, %v6676_v25  ;;  %v8473_v25 = vld [vmem:[#allocation110_spill] sm:$0xff]  ;;  %v3013_v50 = vsel %vm1401_vm6, %v8476_v1, %v8475_v12  ;;  %v8484_v53 = vld [vmem:[#allocation187_spill] sm:$0xff]  ;;  %v8485_v49 = vld [vmem:[#allocation173_spill] sm:$0xff] }
 0x585   : > { %2858 = vrot.lane.b32.xlu2 %v8455_v26, %s3593_s24  ;;  %v3012_v17 = vsel %vm1401_vm6, %v8474_v63, %v8473_v25  ;;  %v3044_v7 = vsel %vm1466_vm7, %v3013_v50, %v8478_v40  ;;  %v8489_v25 = vld [vmem:[#allocation161_spill] sm:$0xff]  ;;  %v8490_v12 = vld [vmem:[#allocation76_spill] sm:$0xff] }
 0x586   : > { %v2652_v52 = vpop.permute.xlu1 %2651  ;;  %v2650_v58 = vpop.permute.xlu0 %2649  ;;  %v3043_v0 = vsel %vm1466_vm7, %v3012_v17, %v8479_v10  ;;  %v3076_v62 = vsel %vm1532_vm8, %v3044_v7, %v8483_v43  ;;  %v8491_v50 = vld [vmem:[#allocation52_spill] sm:$0xff]  ;;  %v8494_v7 = vld [vmem:[#allocation159_spill] sm:$0xff]  ;;  %v8499_v43 = vld [vmem:[#allocation18_spill] sm:$0xff] }
 0x587   : > { %v6906_v47 = vpop.permute.xlu2 %2677  ;;  %v6909_v14 = vsel %vm3116_vm13, %v3102_v48, %v2652_v52  ;;  %v6912_v20 = vsel %vm3116_vm13, %v3101_v59, %v2650_v58  ;;  %v8472_v52 = vld [vmem:[#allocation84_spill] sm:$0xff]  ;;  %v3075_v13 = vsel %vm1532_vm8, %v3043_v0, %v8482_v35  ;;  %v3108_v11 = vsel %vm1598_vm12, %v3076_v62, %v8486_v61  ;;  %v8495_v0 = vld [vmem:[#allocation6_spill] sm:$0xff] }
 0x588   : > { %v2994_v58 = vsel %vm1401_vm6, %v5682_v27, %v8472_v52  ;;  %v8481_v27 = vld [vmem:[#allocation80_spill] sm:$0xff] }
 0x589   : > { %v3025_v33 = vsel %vm1466_vm7, %v2994_v58, %v8477_v38  ;;  %v8488_v58 = vld [vmem:[#allocation118_spill] sm:$0xff]  ;;  %v3015_v38 = vsel %vm1401_vm6, %v8491_v50, %v8490_v12  ;;  %v8497_v35 = vld [vmem:[#allocation140_spill] sm:$0xff] }
 0x58a   : > { %v3057_v51 = vsel %vm1532_vm8, %v3025_v33, %v8481_v27  ;;  %v2997_v17 = vsel %vm1401_vm6, %v8489_v25, %v8488_v58  ;;  %v8492_v33 = vld [vmem:[#allocation7_spill] sm:$0xff]  ;;  %v8496_v27 = vld [vmem:[#allocation89_spill] sm:$0xff] }
 0x58b   : > { %v3028_v10 = vsel %vm1466_vm7, %v2997_v17, %v8494_v7  ;;  %v8506_v7 = vld [vmem:[#allocation129_spill] sm:$0xff] }
 0x58c   : > { %2923 = vrot.lane.b32.xlu1 %v6155_v42, %s3592_s23  ;;  %2765 = vrot.lane.b32.xlu0 %v8465_v60, %s3591_s22  ;;  %v8471_v42 = vld [vmem:[#allocation33_spill] sm:$0xff]  ;;  %v3060_v62 = vsel %vm1532_vm8, %v3028_v10, %v8499_v43  ;;  %v8507_v10 = vld [vmem:[#allocation166_spill] sm:$0xff] }
 0x58d   : > { %2763 = vrot.lane.b32.xlu2 %v8469_v41, %s3591_s22  ;;  %v3105_v24 = vsel %vm1598_vm12, %v3073_v45, %v8471_v42  ;;  %v3089_v45 = vsel %vm1598_vm12, %v3057_v51, %v8485_v49  ;;  %v8487_v42 = vld [vmem:[#allocation128_spill] sm:$0xff]  ;;  %v3046_v51 = vsel %vm1466_vm7, %v3015_v38, %v8496_v27 }
 0x58e   : > { %v2658_v3 = vpop.permute.xlu1 %2657  ;;  %v2656_v19 = vpop.permute.xlu0 %2655 }
 0x58f   : > { %v2716_v37 = vpop.permute.xlu2 %2715  ;;  %v6950_v26 = vsel %vm3116_vm13, %v3105_v24, %v2658_v3  ;;  %v6953_v48 = vsel %vm3116_vm13, %v3104_v57, %v2656_v19  ;;  %v3122_v3 = vsel %vm3116_vm13, %v3089_v45, %v6771_v44  ;;  %v8493_v44 = vld [vmem:[#allocation162_spill] sm:$0xff]  ;;  %v8501_v45 = vld [vmem:[#allocation97_spill] sm:$0xff] }
 0x590   : > { %v6956_v59 = vsel %vm3149_vm14, %v3119_v34, %v2716_v37  ;;  %v3016_v40 = vsel %vm1401_vm6, %v8493_v44, %v8492_v33 }
 0x594   : > { %2828 = vrot.lane.b32.xlu1 %v8480_v8, %s3593_s24  ;;  %2951 = vrot.lane.b32.xlu0 %v6235_v29, %s3592_s23  ;;  %v3107_v29 = vsel %vm1598_vm12, %v3075_v13, %v8487_v42  ;;  %v3047_v8 = vsel %vm1466_vm7, %v3016_v40, %v8495_v0  ;;  %v8498_v13 = vld [vmem:[#allocation78_spill] sm:$0xff]  ;;  %v8503_v42 = vld [vmem:[#allocation185_spill] sm:$0xff]  ;;  %v8508_v0 = vld [vmem:[#allocation68_spill] sm:$0xff] }
 0x595   : > { %2949 = vrot.lane.b32.xlu2 %v8484_v53, %s3592_s23  ;;  %v8500_v53 = vld [vmem:[#allocation8_spill] sm:$0xff]  ;;  %v3079_v61 = vsel %vm1532_vm8, %v3047_v8, %v8501_v45 }
 0x596   : > { %v2664_v24 = vpop.permute.xlu1 %2663  ;;  %v2662_v57 = vpop.permute.xlu0 %2661  ;;  %v3078_v49 = vsel %vm1532_vm8, %v3046_v51, %v8500_v53 }
 0x597   : > { %v2722_v19 = vpop.permute.xlu2 %2721  ;;  %v6994_v34 = vsel %vm3116_vm13, %v3108_v11, %v2664_v24  ;;  %v6997_v37 = vsel %vm3116_vm13, %v3107_v29, %v2662_v57  ;;  %v8502_v11 = vld [vmem:[#allocation189_spill] sm:$0xff]  ;;  %v3092_v29 = vsel %vm1598_vm12, %v3060_v62, %v8503_v42  ;;  %v8504_v24 = vld [vmem:[#allocation195_spill] sm:$0xff]  ;;  %v8513_v42 = vld [vmem:[#allocation12_spill] sm:$0xff] }
 0x598   : > { %v7000_v52 = vsel %vm3149_vm14, %v3122_v3, %v2722_v19  ;;  %v3111_v57 = vsel %vm1598_vm12, %v3079_v61, %v8504_v24  ;;  %v8505_v3 = vld [vmem:[#allocation178_spill] sm:$0xff]  ;;  %v3125_v17 = vsel %vm3116_vm13, %v3092_v29, %v6792_v56  ;;  %v8509_v56 = vld [vmem:[#allocation103_spill] sm:$0xff]  ;;  %v8512_v61 = vld [vmem:[#allocation121_spill] sm:$0xff] }
 0x599   : > { %v3110_v19 = vsel %vm1598_vm12, %v3078_v49, %v8505_v3  ;;  %v3570_v8 = vunpack.i.h.bf16 %v8509_v56  ;;  %v8510_v62 = vld [vmem:[#allocation43_spill] sm:$0xff]  ;;  %v8511_v49 = vld [vmem:[#allocation102_spill] sm:$0xff] }
 0x59a   : > { %v8514_v29 = vld [vmem:[#allocation67_spill] sm:$0xff] }
 0x59b   : > { %v2990_v43 = vsel %vm1401_vm6, 0.0, %v3570_v8  ;;  %v8515_v24 = vld [vmem:[#allocation55_spill] sm:$0xff] }
 0x59c   : > { %2856 = vrot.lane.b32.xlu1 %v8497_v35, %s3593_s24  ;;  %2921 = vrot.lane.b32.xlu0 %v8498_v13, %s3592_s23  ;;  %v3021_v53 = vsel %vm1466_vm7, %v2990_v43, %v8510_v62  ;;  %v8520_v43 = vld [vmem:[#allocation123_spill] sm:$0xff] }
 0x59d   : > { %2919 = vrot.lane.b32.xlu2 %v8502_v11, %s3592_s23  ;;  %v3053_v45 = vsel %vm1532_vm8, %v3021_v53, %v8511_v49  ;;  %v3052_v11 = vsel %vm1532_vm8, %v3021_v53, %v8512_v61  ;;  %v8521_v53 = vld [vmem:[#allocation42_spill] sm:$0xff]  ;;  %v8522_v49 = vld [vmem:[#allocation160_spill] sm:$0xff] }
 0x59e   : > { %v2670_v58 = vpop.permute.xlu1 %2669  ;;  %v2668_v25 = vpop.permute.xlu0 %2667  ;;  %v8523_v61 = vld [vmem:[#allocation58_spill] sm:$0xff] }
 0x59f   : > { %v2728_v12 = vpop.permute.xlu2 %2727  ;;  %v7038_v38 = vsel %vm3116_vm13, %v3111_v57, %v2670_v58  ;;  %v7041_v33 = vsel %vm3116_vm13, %v3110_v19, %v2668_v25  ;;  %v8516_v57 = vld [vmem:[#allocation156_spill] sm:$0xff]  ;;  %v8517_v19 = vld [vmem:[#allocation109_spill] sm:$0xff]  ;;  %v8518_v58 = vld [vmem:[#allocation34_spill] sm:$0xff] }
 0x5a0   : > { %v7044_v40 = vsel %vm3149_vm14, %v3125_v17, %v2728_v12  ;;  %v3085_v3 = vsel %vm1598_vm12, %v3053_v45, %v8516_v57  ;;  %v2993_v45 = vsel %vm1401_vm6, %v8522_v49, %v8521_v53 }
 0x5a1   : > { %v3118_v25 = vsel %vm3116_vm13, %v3085_v3, %v8518_v58  ;;  %v8527_v3 = vld [vmem:[#allocation193_spill] sm:$0xff] }
 0x5a4   : > { %2761 = vrot.lane.b32.xlu1 %v8506_v7, %s3591_s22  ;;  %2826 = vrot.lane.b32.xlu0 %v8507_v10, %s3593_s24 }
 0x5a5   : > { %2824 = vrot.lane.b32.xlu2 %v8508_v0, %s3593_s24 }
 0x5a6   : > { %v7053_v27 = vpop.permute.xlu1 %2675  ;;  %v7055_v51 = vpop.permute.xlu0 %2673 }
 0x5a7   : > { %v2734_v35 = vpop.permute.xlu2 %2733 }
 0x5a8   : > { %v7059_v13 = vsel %vm3149_vm14, %v6835_v55, %v2734_v35  ;;  %v3084_v55 = vsel %vm1598_vm12, %v3052_v11, %v8515_v24  ;;  %v8519_v35 = vld [vmem:[#allocation22_spill] sm:$0xff]  ;;  %v8524_v11 = vld [vmem:[#allocation119_spill] sm:$0xff] }
 0x5a9   : > { %v3117_v17 = vsel %vm3116_vm13, %v3084_v55, %v6727_v15  ;;  %v2992_v62 = vsel %vm1401_vm6, %v8520_v43, %v8519_v35  ;;  %v3024_v15 = vsel %vm1466_vm7, %v2993_v45, %v8523_v61  ;;  %v8526_v55 = vld [vmem:[#allocation144_spill] sm:$0xff]  ;;  %v8532_v61 = vld [vmem:[#allocation3_spill] sm:$0xff] }
 0x5aa   : > { %v8531_v45 = vld [vmem:[#allocation196_spill] sm:$0xff] }
 0x5ac   : > { %2947 = vrot.lane.b32.xlu1 %v8513_v42, %s3592_s23  ;;  %2854 = vrot.lane.b32.xlu0 %v8514_v29, %s3593_s24  ;;  %v3023_v42 = vsel %vm1466_vm7, %v2992_v62, %v8524_v11  ;;  %v8525_v29 = vld [vmem:[#allocation127_spill] sm:$0xff] }
 0x5ad   : > { %2852 = vrot.lane.b32.xlu2 %v8517_v19, %s3593_s24  ;;  %v3056_v24 = vsel %vm1532_vm8, %v3024_v15, %v8525_v29  ;;  %v3055_v57 = vsel %vm1532_vm8, %v3023_v42, %v8526_v55  ;;  %v8528_v19 = vld [vmem:[#allocation199_spill] sm:$0xff]  ;;  %v8533_v15 = vld [vmem:[#allocation57_spill] sm:$0xff] }
 0x5ae   : > { %v2714_v12 = vpop.permute.xlu1 %2713  ;;  %v2712_v10 = vpop.permute.xlu0 %2711  ;;  %v3087_v58 = vsel %vm1598_vm12, %v3055_v57, %v8528_v19  ;;  %v8534_v11 = vld [vmem:[#allocation63_spill] sm:$0xff]  ;;  %v8537_v57 = vld [vmem:[#allocation46_spill] sm:$0xff]  ;;  %v8538_v19 = vld [vmem:[#allocation72_spill] sm:$0xff] }
 0x5af   : > { %v7082_v0 = vpop.permute.xlu2 %2739  ;;  %v7085_v56 = vsel %vm3149_vm14, %v3118_v25, %v2714_v12  ;;  %v7088_v8 = vsel %vm3149_vm14, %v3117_v17, %v2712_v10  ;;  %v8529_v25 = vld [vmem:[#allocation177_spill] sm:$0xff]  ;;  %v8530_v12 = vld [vmem:[#allocation147_spill] sm:$0xff]  ;;  %v3120_v35 = vsel %vm3116_vm13, %v3087_v58, %v6748_v4  ;;  %v2995_v42 = vsel %vm1401_vm6, %v8534_v11, %v8533_v15 }
 0x5b0   : > { %v3088_v17 = vsel %vm1598_vm12, %v3056_v24, %v8529_v25  ;;  %v8535_v29 = vld [vmem:[#allocation19_spill] sm:$0xff]  ;;  %v8536_v24 = vld [vmem:[#allocation141_spill] sm:$0xff]  ;;  %v8539_v25 = vld [vmem:[#allocation106_spill] sm:$0xff] }
 0x5b1   : > { %v3121_v10 = vsel %vm3116_vm13, %v3088_v17, %v8530_v12  ;;  %v3026_v55 = vsel %vm1466_vm7, %v2995_v42, %v8536_v24  ;;  %v8540_v17 = vld [vmem:[#allocation148_spill] sm:$0xff]  ;;  %v8541_v12 = vld [vmem:[#allocation23_spill] sm:$0xff] }
 0x5b2   : > { %v3058_v58 = vsel %vm1532_vm8, %v3026_v55, %v8538_v19  ;;  %v8545_v24 = vld [vmem:[#allocation24_spill] sm:$0xff]  ;;  %v8546_v55 = vld [vmem:[#allocation62_spill] sm:$0xff] }
 0x5b3   : > { %v8548_v19 = vld [vmem:[#allocation126_spill] sm:$0xff] }
 0x5b4   : > { %2917 = vrot.lane.b32.xlu1 %v8527_v3, %s3592_s23  ;;  %2759 = vrot.lane.b32.xlu0 %v8447_v6, %s3591_s22 }
 0x5b5   : > { %2757 = vrot.lane.b32.xlu2 %v8493_v44, %s3591_s22  ;;  %v2996_v44 = vsel %vm1401_vm6, %v8532_v61, %v8531_v45  ;;  %v8544_v45 = vld [vmem:[#allocation9_spill] sm:$0xff] }
 0x5b6   : > { %v2720_v43 = vpop.permute.xlu1 %2719  ;;  %v2718_v62 = vpop.permute.xlu0 %2717  ;;  %v3027_v4 = vsel %vm1466_vm7, %v2996_v44, %v8535_v29 }
 0x5b7   : > { %v7118_v53 = vpop.permute.xlu2 %2957  ;;  %v7121_v6 = vsel %vm3149_vm14, %v3121_v10, %v2720_v43  ;;  %v7124_v49 = vsel %vm3149_vm14, %v3120_v35, %v2718_v62  ;;  %v3059_v3 = vsel %vm1532_vm8, %v3027_v4, %v8537_v57  ;;  %v3090_v10 = vsel %vm1598_vm12, %v3058_v58, %v8541_v12  ;;  %v8542_v35 = vld [vmem:[#allocation188_spill] sm:$0xff]  ;;  %v8543_v62 = vld [vmem:[#allocation170_spill] sm:$0xff] }
 0x5b8   : > { %v3091_v43 = vsel %vm1598_vm12, %v3059_v3, %v8542_v35  ;;  %v3123_v44 = vsel %vm3116_vm13, %v3090_v10, %v6769_v21  ;;  %v2998_v57 = vsel %vm1401_vm6, %v8546_v55, %v8545_v24  ;;  %v8547_v3 = vld [vmem:[#allocation108_spill] sm:$0xff]  ;;  %v8557_v55 = vld [vmem:[#allocation66_spill] sm:$0xff] }
 0x5b9   : > { %v3124_v61 = vsel %vm3116_vm13, %v3091_v43, %v8544_v45  ;;  %v2999_v58 = vsel %vm1401_vm6, %v8548_v19, %v8547_v3  ;;  %v8551_v10 = vld [vmem:[#allocation168_spill] sm:$0xff]  ;;  %v8552_v43 = vld [vmem:[#allocation182_spill] sm:$0xff]  ;;  %v8553_v45 = vld [vmem:[#allocation79_spill] sm:$0xff] }
 0x5bc   : > { %2822 = vrot.lane.b32.xlu1 %v8539_v25, %s3593_s24  ;;  %2945 = vrot.lane.b32.xlu0 %v8540_v17, %s3592_s23  ;;  %v8549_v25 = vld [vmem:[#allocation82_spill] sm:$0xff] }
 0x5bd   : > { %2943 = vrot.lane.b32.xlu2 %v8543_v62, %s3592_s23  ;;  %v3030_v21 = vsel %vm1466_vm7, %v2999_v58, %v8549_v25  ;;  %v8550_v17 = vld [vmem:[#allocation38_spill] sm:$0xff] }
 0x5be   : > { %v2726_v15 = vpop.permute.xlu1 %2725  ;;  %v2724_v11 = vpop.permute.xlu0 %2723  ;;  %v3029_v12 = vsel %vm1466_vm7, %v2998_v57, %v8550_v17  ;;  %v3062_v35 = vsel %vm1532_vm8, %v3030_v21, %v8551_v10  ;;  %v8558_v57 = vld [vmem:[#allocation200_spill] sm:$0xff]  ;;  %v8559_v10 = vld [vmem:[#allocation113_spill] sm:$0xff] }
 0x5bf   : > { %v7154_v42 = vpop.permute.xlu2 %2769  ;;  %v7157_v29 = vsel %vm3149_vm14, %v3124_v61, %v2726_v15  ;;  %v7160_v4 = vsel %vm3149_vm14, %v3123_v44, %v2724_v11  ;;  %v3061_v62 = vsel %vm1532_vm8, %v3029_v12, %v8552_v43  ;;  %v8554_v61 = vld [vmem:[#allocation146_spill] sm:$0xff]  ;;  %v8555_v44 = vld [vmem:[#allocation35_spill] sm:$0xff] }
 0x5c0   : > { %v3093_v15 = vsel %vm1598_vm12, %v3061_v62, %v8555_v44  ;;  %v8556_v11 = vld [vmem:[#allocation151_spill] sm:$0xff]  ;;  %v8562_v44 = vld [vmem:[#allocation112_spill] sm:$0xff] }
 0x5c1   : > { %v3094_v24 = vsel %vm1598_vm12, %v3062_v35, %v8556_v11  ;;  %v3126_v19 = vsel %vm3116_vm13, %v3093_v15, %v6790_v28  ;;  %v8560_v35 = vld [vmem:[#allocation64_spill] sm:$0xff]  ;;  %v3019_v15 = vsel %vm1401_vm6, %v8469_v41, %v8562_v44 }
 0x5c2   : > { %v3127_v3 = vsel %vm3116_vm13, %v3094_v24, %v8558_v57  ;;  %v8564_v24 = vld [vmem:[#allocation95_spill] sm:$0xff] }
 0x5c3   : > { %v8565_v57 = vld [vmem:[#allocation111_spill] sm:$0xff] }
 0x5c4   : > { %2850 = vrot.lane.b32.xlu1 %v8553_v45, %s3593_s24  ;;  %2915 = vrot.lane.b32.xlu0 %v8554_v61, %s3592_s23  ;;  %v8561_v45 = vld [vmem:[#allocation30_spill] sm:$0xff] }
 0x5c5   : > { %2913 = vrot.lane.b32.xlu2 %v8557_v55, %s3592_s23  ;;  %v3020_v61 = vsel %vm1401_vm6, %v8465_v60, %v8561_v45  ;;  %v3050_v55 = vsel %vm1466_vm7, %v3019_v15, %v8564_v24  ;;  %v8568_v60 = vld [vmem:[#allocation107_spill] sm:$0xff] }
 0x5c6   : > { %v2732_v58 = vpop.permute.xlu1 %2731  ;;  %v2730_v25 = vpop.permute.xlu0 %2729  ;;  %v8570_v45 = vld [vmem:[#allocation163_spill] sm:$0xff] }
 0x5c7   : > { %v2956_v21 = vpop.permute.xlu2 %2955  ;;  %v7191_v17 = vsel %vm3149_vm14, %v3127_v3, %v2732_v58  ;;  %v7194_v12 = vsel %vm3149_vm14, %v3126_v19, %v2730_v25  ;;  %v8566_v19 = vld [vmem:[#allocation117_spill] sm:$0xff]  ;;  %v8567_v25 = vld [vmem:[#allocation175_spill] sm:$0xff] }
 0x5c8   : > { %v3082_v58 = vsel %vm1532_vm8, %v3050_v55, %v8566_v19 }
 0x5cc   : > { %2755 = vrot.lane.b32.xlu1 %v8491_v50, %s3591_s22  ;;  %2820 = vrot.lane.b32.xlu0 %v8559_v10, %s3593_s24  ;;  %v8563_v50 = vld [vmem:[#allocation15_spill] sm:$0xff] }
 0x5cd   : > { %2818 = vrot.lane.b32.xlu2 %v8560_v35, %s3593_s24  ;;  %v3051_v11 = vsel %vm1466_vm7, %v3020_v61, %v8563_v50  ;;  %v8569_v10 = vld [vmem:[#allocation87_spill] sm:$0xff] }
 0x5ce   : > { %v7202_v43 = vpop.permute.xlu1 %2737  ;;  %v7204_v28 = vpop.permute.xlu0 %2735  ;;  %v3083_v3 = vsel %vm1532_vm8, %v3051_v11, %v8565_v57  ;;  %v3114_v41 = vsel %vm1598_vm12, %v3082_v58, %v8569_v10 }
 0x5cf   : > { %v2926_v62 = vpop.permute.xlu2 %2925  ;;  %v3115_v35 = vsel %vm1598_vm12, %v3083_v3, %v6729_v9  ;;  %v3147_v44 = vsel %vm3116_vm13, %v3114_v41, %v7053_v27  ;;  %v8571_v27 = vld [vmem:[#allocation164_spill] sm:$0xff]  ;;  %v8573_v41 = vld [vmem:[#allocation29_spill] sm:$0xff] }
 0x5d0   : > { %v3148_v61 = vsel %vm3116_vm13, %v3115_v35, %v6906_v47 }
 0x5d4   : > { %2941 = vrot.lane.b32.xlu1 %v8567_v25, %s3592_s23  ;;  %2848 = vrot.lane.b32.xlu0 %v8568_v60, %s3593_s24  ;;  %v8572_v60 = vld [vmem:[#allocation184_spill] sm:$0xff] }
 0x5d5   : > { %2846 = vrot.lane.b32.xlu2 %v8570_v45, %s3593_s24  ;;  %v3018_v10 = vsel %vm1401_vm6, %v8506_v7, %v8572_v60  ;;  %v8574_v45 = vld [vmem:[#allocation28_spill] sm:$0xff] }
 0x5d6   : > { %v2865_v15 = vpop.permute.xlu1 %2864  ;;  %v2772_v50 = vpop.permute.xlu0 %2771  ;;  %v3049_v35 = vsel %vm1466_vm7, %v3018_v10, %v8573_v41 }
 0x5d7   : > { %v2831_v11 = vpop.permute.xlu2 %2830  ;;  %v3180_v24 = vsel %vm3149_vm14, %v3147_v44, %v2772_v50  ;;  %v3181_v55 = vsel %vm3149_vm14, %v3148_v61, %v2772_v50  ;;  %v8575_v61 = vld [vmem:[#allocation26_spill] sm:$0xff]  ;;  %v8576_v44 = vld [vmem:[#allocation61_spill] sm:$0xff] }
 0x5d8   : > { %v3214_v9 = vsel %vm3182_vm15, %v3181_v55, %v2865_v15  ;;  %v3213_v47 = vsel %vm3182_vm15, %v3180_v24, %v2865_v15  ;;  %v8577_v15 = vld [vmem:[#allocation94_spill] sm:$0xff] }
 0x5d9   : > { %v3247_v57 = vsel %vm3215_vm0, %v3214_v9, %v7118_v53  ;;  %v3246_v3 = vsel %vm3215_vm0, %v3213_v47, %v7118_v53  ;;  %v8578_v50 = vld [vmem:[#allocation114_spill] sm:$0xff] }
 0x5da   : > { %3513 = vmatpush.xpose.msk.msra.mxu2 %vm3255_vm1, %v3247_v57 }
 0x5dc   : > { %2911 = vrot.lane.b32.xlu1 %v8571_v27, %s3592_s23  ;;  %2753 = vrot.lane.b32.xlu0 %v5939_v54, %s3591_s22  ;;  %v3081_v54 = vsel %vm1532_vm8, %v3049_v35, %v8574_v45  ;;  %v8582_v45 = vld [vmem:[#allocation104_spill] sm:$0xff] }
 0x5dd   : > { %2751 = vrot.lane.b32.xlu2 %v8476_v1, %s3591_s22  ;;  %v3113_v53 = vsel %vm1598_vm12, %v3081_v54, %v8575_v61  ;;  %v8583_v54 = vld [vmem:[#allocation4_spill] sm:$0xff] }
 0x5de   : > { %v2835_v19 = vpop.permute.xlu1 %2834  ;;  %3514 = vmatpush.xpose.msk.msra.mxu2 %vm3255_vm1, %v3246_v3  ;;  %v2742_v58 = vpop.permute.xlu0 %2741  ;;  %v3146_v7 = vsel %vm3116_vm13, %v3113_v53, %v7055_v51  ;;  %v8579_v51 = vld [vmem:[#allocation167_spill] sm:$0xff] }
 0x5df   : > { %v2859_v25 = vpop.permute.xlu2 %2858  ;;  %v3165_v1 = vsel %vm3149_vm14, %v6874_v22, %v2742_v58  ;;  %v3179_v24 = vsel %vm3149_vm14, %v3146_v7, %v7154_v42  ;;  %v8580_v42 = vld [vmem:[#allocation99_spill] sm:$0xff]  ;;  %v8581_v58 = vld [vmem:[#allocation124_spill] sm:$0xff] }
 0x5e0   : > { %v3198_v9 = vsel %vm3182_vm15, %v3165_v1, %v2835_v19  ;;  %v3164_v19 = vsel %vm3149_vm14, %v6877_v16, %v7082_v0 }
 0x5e4   : > { %2816 = vrot.lane.b32.xlu1 %v8576_v44, %s3593_s24  ;;  %2939 = vrot.lane.b32.xlu0 %v8577_v15, %s3592_s23  ;;  %v8585_v44 = vld [vmem:[#allocation60_spill] sm:$0xff]  ;;  %v3163_v15 = vsel %vm3149_vm14, %v6733_v32, %v7202_v43 }
 0x5e5   : > { %2937 = vrot.lane.b32.xlu2 %v8578_v50, %s3592_s23  ;;  %v3196_v7 = vsel %vm3182_vm15, %v3163_v15, %v2831_v11  ;;  %v8598_v15 = vld [vmem:[#allocation31_spill] sm:$0xff] }
 0x5e6   : > { %v2863_v55 = vpop.permute.xlu1 %2862  ;;  %v2928_v22 = vpop.permute.xlu0 %2927 }
 0x5e7   : > { %v2764_v57 = vpop.permute.xlu2 %2763  ;;  %v3212_v47 = vsel %vm3182_vm15, %v3179_v24, %v2863_v55  ;;  %v3231_v27 = vsel %vm3215_vm0, %v3198_v9, %v2928_v22 }
 0x5e8   : > { %3496 = vmatpush.xpose.msk.msrb.mxu1 %vm3255_vm1, %v3231_v27  ;;  %v3245_v3 = vsel %vm3215_vm0, %v3212_v47, %v2956_v21  ;;  %v8587_v47 = vld [vmem:[#allocation142_spill] sm:$0xff] }
 0x5e9   : > { %3515 = vmatpush.xpose.msk.msra.mxu2 %vm3255_vm1, %v3245_v3 }
 0x5ec   : > { %2844 = vrot.lane.b32.xlu1 %v8579_v51, %s3593_s24  ;;  %2909 = vrot.lane.b32.xlu0 %v8580_v42, %s3592_s23  ;;  %v8589_v51 = vld [vmem:[#allocation71_spill] sm:$0xff] }
 0x5ed   : > { %2907 = vrot.lane.b32.xlu2 %v8581_v58, %s3592_s23 }
 0x5ee   : > { %v2768_v60 = vpop.permute.xlu1 %2767  ;;  %v2833_v10 = vpop.permute.xlu0 %2832 }
 0x5ef   : > { %v2950_v41 = vpop.permute.xlu2 %2949  ;;  %v3197_v21 = vsel %vm3182_vm15, %v3164_v19, %v2833_v10  ;;  %v3178_v16 = vsel %vm3149_vm14, %v6880_v2, %v2768_v60  ;;  %v8586_v2 = vld [vmem:[#allocation105_spill] sm:$0xff] }
 0x5f0   : > { %v3230_v35 = vsel %vm3215_vm0, %v3197_v21, %v2926_v62 }
 0x5f1   : > { %3497 = vmatpush.xpose.msk.msrb.mxu1 %vm3255_vm1, %v3230_v35 }
 0x5f4   : > { %2749 = vrot.lane.b32.xlu1 %v8474_v63, %s3591_s22  ;;  %2814 = vrot.lane.b32.xlu0 %v8582_v45, %s3593_s24  ;;  %v8584_v63 = vld [vmem:[#allocation132_spill] sm:$0xff] }
 0x5f5   : > { %2812 = vrot.lane.b32.xlu2 %v8583_v54, %s3593_s24 }
 0x5f6   : > { %v2954_v0 = vpop.permute.xlu1 %2953  ;;  %v2861_v1 = vpop.permute.xlu0 %2860 }
 0x5f7   : > { %v2920_v61 = vpop.permute.xlu2 %2919  ;;  %v3211_v53 = vsel %vm3182_vm15, %v3178_v16, %v2861_v1 }
 0x5f8   : > { %v3244_v62 = vsel %vm3215_vm0, %v3211_v53, %v2954_v0  ;;  %v8595_v0 = vld [vmem:[#allocation134_spill] sm:$0xff] }
 0x5f9   : > { %3516 = vmatpush.xpose.msk.msra.mxu2 %vm3255_vm1, %v3244_v62 }
 0x5fc   : > { %2935 = vrot.lane.b32.xlu1 %v8584_v63, %s3592_s23  ;;  %2842 = vrot.lane.b32.xlu0 %v8585_v44, %s3593_s24  ;;  %v8597_v44 = vld [vmem:[#allocation81_spill] sm:$0xff] }
 0x5fd   : > { %2840 = vrot.lane.b32.xlu2 %v8586_v2, %s3593_s24 }
 0x5fe   : > { %v2924_v50 = vpop.permute.xlu1 %2923  ;;  %v2766_v24 = vpop.permute.xlu0 %2765 }
 0x5ff   : > { %v3229_v55 = vsel %vm3215_vm0, %v3196_v7, %v2924_v50  ;;  %v2825_v22 = vpop.permute.xlu2 %2824  ;;  %v3177_v9 = vsel %vm3149_vm14, %v7038_v38, %v2766_v24  ;;  %v8588_v38 = vld [vmem:[#allocation93_spill] sm:$0xff] }
 0x600   : > { %3498 = vmatpush.xpose.msk.msrb.mxu1 %vm3255_vm1, %v3229_v55  ;;  %v3210_v11 = vsel %vm3182_vm15, %v3177_v9, %v2859_v25  ;;  %v3176_v25 = vsel %vm3149_vm14, %v7041_v33, %v2764_v57  ;;  %v8593_v57 = vld [vmem:[#allocation92_spill] sm:$0xff]  ;;  %v8599_v9 = vld [vmem:[#allocation47_spill] sm:$0xff] }
 0x604   : > { %2905 = vrot.lane.b32.xlu1 %v8587_v47, %s3592_s23  ;;  %2747 = vrot.lane.b32.xlu0 %v8437_v18, %s3591_s22  ;;  %v3162_v18 = vsel %vm3149_vm14, %v6832_v36, %v7204_v28  ;;  %v8591_v36 = vld [vmem:[#allocation83_spill] sm:$0xff]  ;;  %v8592_v28 = vld [vmem:[#allocation74_spill] sm:$0xff]  ;;  %v8600_v47 = vld [vmem:[#allocation25_spill] sm:$0xff] }
 0x605   : > { %2745 = vrot.lane.b32.xlu2 %v8461_v5, %s3591_s22  ;;  %v8590_v5 = vld [vmem:[#allocation88_spill] sm:$0xff] }
 0x606   : > { %v2829_v32 = vpop.permute.xlu1 %2828  ;;  %v2952_v43 = vpop.permute.xlu0 %2951 }
 0x607   : > { %v3243_v27 = vsel %vm3215_vm0, %v3210_v11, %v2952_v43  ;;  %v2853_v3 = vpop.permute.xlu2 %2852  ;;  %v3195_v42 = vsel %vm3182_vm15, %v3162_v18, %v2829_v32 }
 0x608   : > { %3517 = vmatpush.xpose.msk.msra.mxu2 %vm3255_vm1, %v3243_v27 }
 0x60c   : > { %2810 = vrot.lane.b32.xlu1 %v8588_v38, %s3593_s24  ;;  %2933 = vrot.lane.b32.xlu0 %v8589_v51, %s3592_s23 }
 0x60d   : > { %2931 = vrot.lane.b32.xlu2 %v8590_v5, %s3592_s23 }
 0x60e   : > { %v2857_v58 = vpop.permute.xlu1 %2856  ;;  %v2922_v19 = vpop.permute.xlu0 %2921 }
 0x60f   : > { %v3209_v60 = vsel %vm3182_vm15, %v3176_v25, %v2857_v58  ;;  %v3228_v10 = vsel %vm3215_vm0, %v3195_v42, %v2922_v19  ;;  %v2758_v33 = vpop.permute.xlu2 %2757 }
 0x610   : > { %3499 = vmatpush.xpose.msk.msrb.mxu1 %vm3255_vm1, %v3228_v10  ;;  %v3242_v21 = vsel %vm3215_vm0, %v3209_v60, %v2950_v41  ;;  %v8594_v41 = vld [vmem:[#allocation136_spill] sm:$0xff]  ;;  %v3173_v27 = vsel %vm3149_vm14, %v6997_v37, %v2758_v33 }
 0x611   : > { %3518 = vmatpush.xpose.msk.msra.mxu2 %vm3255_vm1, %v3242_v21 }
 0x614   : > { %2838 = vrot.lane.b32.xlu1 %v8591_v36, %s3593_s24  ;;  %2903 = vrot.lane.b32.xlu0 %v8592_v28, %s3592_s23 }
 0x615   : > { %2901 = vrot.lane.b32.xlu2 %v8593_v57, %s3592_s23 }
 0x616   : > { %v2762_v35 = vpop.permute.xlu1 %2761  ;;  %v2827_v45 = vpop.permute.xlu0 %2826 }
 0x617   : > { %v3194_v54 = vsel %vm3182_vm15, %v7059_v13, %v2827_v45  ;;  %v3175_v1 = vsel %vm3149_vm14, %v6838_v39, %v2762_v35  ;;  %v2944_v63 = vpop.permute.xlu2 %2943  ;;  %v3193_v39 = vsel %vm3182_vm15, %v7191_v17, %v2825_v22 }
 0x618   : > { %v3227_v16 = vsel %vm3215_vm0, %v3194_v54, %v2920_v61 }
 0x619   : > { %3500 = vmatpush.xpose.msk.msrb.mxu1 %vm3255_vm1, %v3227_v16 }
 0x61c   : > { %2743 = vrot.lane.b32.xlu1 %v8459_v31, %s3591_s22  ;;  %2808 = vrot.lane.b32.xlu0 %v8594_v41, %s3593_s24  ;;  %v8596_v31 = vld [vmem:[#allocation14_spill] sm:$0xff] }
 0x61d   : > { %2806 = vrot.lane.b32.xlu2 %v8595_v0, %s3593_s24 }
 0x61e   : > { %v2948_v53 = vpop.permute.xlu1 %2947  ;;  %v2855_v62 = vpop.permute.xlu0 %2854 }
 0x61f   : > { %v3208_v13 = vsel %vm3182_vm15, %v3175_v1, %v2855_v62  ;;  %v2914_v24 = vpop.permute.xlu2 %2913 }
 0x620   : > { %v3241_v61 = vsel %vm3215_vm0, %v3208_v13, %v2948_v53 }
 0x621   : > { %3519 = vmatpush.xpose.msk.msra.mxu2 %vm3255_vm1, %v3241_v61 }
 0x624   : > { %2929 = vrot.lane.b32.xlu1 %v8596_v31, %s3592_s23  ;;  %2836 = vrot.lane.b32.xlu0 %v8597_v44, %s3593_s24 }
 0x625   : > { %2897 = vrot.lane.b32.xlu2 %v8598_v15, %s3592_s23 }
 0x626   : > { %v2918_v2 = vpop.permute.xlu1 %2917  ;;  %v2760_v7 = vpop.permute.xlu0 %2759 }
 0x627   : > { %v3226_v50 = vsel %vm3215_vm0, %v3193_v39, %v2918_v2  ;;  %v3174_v55 = vsel %vm3149_vm14, %v6994_v34, %v2760_v7  ;;  %v2819_v11 = vpop.permute.xlu2 %2818 }
 0x628   : > { %3501 = vmatpush.xpose.msk.msrb.mxu1 %vm3255_vm1, %v3226_v50  ;;  %v3207_v17 = vsel %vm3182_vm15, %v3174_v55, %v2853_v3  ;;  %v3190_v33 = vsel %vm3182_vm15, %v7157_v29, %v2819_v11 }
 0x62c   : > { %2804 = vrot.lane.b32.xlu1 %v8599_v9, %s3593_s24  ;;  %2899 = vrot.lane.b32.xlu0 %v8600_v47, %s3592_s23 }
 0x62e   : > { %v2823_v32 = vpop.permute.xlu1 %2822  ;;  %v2946_v43 = vpop.permute.xlu0 %2945 }
 0x62f   : > { %v3240_v22 = vsel %vm3215_vm0, %v3207_v17, %v2946_v43  ;;  %v3192_v34 = vsel %vm3182_vm15, %v7194_v12, %v2823_v32  ;;  %v2847_v25 = vpop.permute.xlu2 %2846 }
 0x630   : > { %3520 = vmatpush.xpose.msk.msra.mxu2 %vm3255_vm1, %v3240_v22 }
 0x636   : > { %v2851_v38 = vpop.permute.xlu1 %2850  ;;  %v2916_v51 = vpop.permute.xlu0 %2915 }
 0x637   : > { %v3206_v18 = vsel %vm3182_vm15, %v3173_v27, %v2851_v38  ;;  %v3225_v5 = vsel %vm3215_vm0, %v3192_v34, %v2916_v51  ;;  %v2752_v21 = vpop.permute.xlu2 %2751 }
 0x638   : > { %3502 = vmatpush.xpose.msk.msrb.mxu1 %vm3255_vm1, %v3225_v5  ;;  %v3239_v3 = vsel %vm3215_vm0, %v3206_v18, %v2944_v63  ;;  %v3170_v29 = vsel %vm3149_vm14, %v6953_v48, %v2752_v21 }
 0x639   : > { %3521 = vmatpush.xpose.msk.msra.mxu2 %vm3255_vm1, %v3239_v3  ;;  %v3249_v3 = vld [vmem:[%s7479_s4] sm:$0xff] }
 0x63e   : > { %v2756_v42 = vpop.permute.xlu1 %2755  ;;  %v2821_v58 = vpop.permute.xlu0 %2820 }
 0x63f   : > { %v3191_v37 = vsel %vm3182_vm15, %v7044_v40, %v2821_v58  ;;  %v3172_v19 = vsel %vm3149_vm14, %v6796_v30, %v2756_v42  ;;  %v2938_v45 = vpop.permute.xlu2 %2937  ;;  %v3594_v42 = vmov 0  }
 0x640   : > { %v3224_v12 = vsel %vm3215_vm0, %v3191_v37, %v2914_v24  ;;  %3571 = vset.pattern.permute.xlu0 %v3594_v42 }
 0x641   : > { %3503 = vmatpush.xpose.msk.msrb.mxu1 %vm3255_vm1, %v3224_v12  ;;  %3252 = vperm.xlu0 %3571, %v3249_v3  }
 0x646   : > { %v2942_v60 = vpop.permute.xlu1 %2941  ;;  %v2849_v10 = vpop.permute.xlu0 %2848 }
 0x647   : > { %v3205_v36 = vsel %vm3182_vm15, %v3172_v19, %v2849_v10  ;;  %v2908_v1 = vpop.permute.xlu2 %2907 }
 0x648   : > { %v3238_v28 = vsel %vm3215_vm0, %v3205_v36, %v2942_v60 }
 0x649   : > { %3522 = vmatpush.xpose.msk.msra.mxu2 %vm3255_vm1, %v3238_v28 }
 0x64e   : > { %v2912_v40 = vpop.permute.xlu1 %2911  ;;  %v2754_v57 = vpop.permute.xlu0 %2753 }
 0x64f   : > { %v3223_v35 = vsel %vm3215_vm0, %v3190_v33, %v2912_v40  ;;  %v3171_v30 = vsel %vm3149_vm14, %v6950_v26, %v2754_v57  ;;  %v2813_v31 = vpop.permute.xlu2 %2812 }
 0x650   : > { %3504 = vmatpush.xpose.msk.msrb.mxu1 %vm3255_vm1, %v3223_v35  ;;  %v3204_v41 = vsel %vm3182_vm15, %v3171_v30, %v2847_v25  ;;  %v3187_v9 = vsel %vm3182_vm15, %v7121_v6, %v2813_v31 }
 0x656   : > { %v2817_v54 = vpop.permute.xlu1 %2816  ;;  %v2940_v16 = vpop.permute.xlu0 %2939 }
 0x657   : > { %v3237_v0 = vsel %vm3215_vm0, %v3204_v41, %v2940_v16  ;;  %v3189_v53 = vsel %vm3182_vm15, %v7160_v4, %v2817_v54  ;;  %v2841_v50 = vpop.permute.xlu2 %2840 }
 0x658   : > { %3523 = vmatpush.xpose.msk.msra.mxu2 %vm3255_vm1, %v3237_v0 }
 0x65e   : > { %v2845_v62 = vpop.permute.xlu1 %2844  ;;  %v2910_v63 = vpop.permute.xlu0 %2909 }
 0x65f   : > { %v3203_v13 = vsel %vm3182_vm15, %v3170_v29, %v2845_v62  ;;  %v3222_v26 = vsel %vm3215_vm0, %v3189_v53, %v2910_v63  ;;  %v2746_v43 = vpop.permute.xlu2 %2745 }
 0x660   : > { %3505 = vmatpush.xpose.msk.msrb.mxu1 %vm3255_vm1, %v3222_v26  ;;  %v3236_v61 = vsel %vm3215_vm0, %v3203_v13, %v2938_v45  ;;  %v3167_v6 = vsel %vm3149_vm14, %v6912_v20, %v2746_v43 }
 0x661   : > { %3524 = vmatpush.xpose.msk.msra.mxu2 %vm3255_vm1, %v3236_v61 }
 0x666   : > { %v2750_v44 = vpop.permute.xlu1 %2749  ;;  %v2815_v15 = vpop.permute.xlu0 %2814 }
 0x667   : > { %v3188_v48 = vsel %vm3182_vm15, %v7000_v52, %v2815_v15  ;;  %v3169_v39 = vsel %vm3149_vm14, %v6775_v23, %v2750_v44  ;;  %v2932_v34 = vpop.permute.xlu2 %2931 }
 0x668   : > { %v3221_v4 = vsel %vm3215_vm0, %v3188_v48, %v2908_v1 }
 0x669   : > { %3506 = vmatpush.xpose.msk.msrb.mxu1 %vm3255_vm1, %v3221_v4 }
 0x66e   : > { %v2936_v2 = vpop.permute.xlu1 %2935  ;;  %v2843_v7 = vpop.permute.xlu0 %2842 }
 0x66f   : > { %v3202_v24 = vsel %vm3182_vm15, %v3169_v39, %v2843_v7  ;;  %v2902_v20 = vpop.permute.xlu2 %2901 }
 0x670   : > { %v3235_v55 = vsel %vm3215_vm0, %v3202_v24, %v2936_v2 }
 0x671   : > { %3525 = vmatpush.xpose.msk.msra.mxu2 %vm3255_vm1, %v3235_v55 }
 0x676   : > { %v2906_v52 = vpop.permute.xlu1 %2905  ;;  %v2748_v47 = vpop.permute.xlu0 %2747 }
 0x677   : > { %v3220_v32 = vsel %vm3215_vm0, %v3187_v9, %v2906_v52  ;;  %v3168_v23 = vsel %vm3149_vm14, %v6909_v14, %v2748_v47  ;;  %v2807_v36 = vpop.permute.xlu2 %2806 }
 0x678   : > { %3507 = vmatpush.xpose.msk.msrb.mxu1 %vm3255_vm1, %v3220_v32  ;;  %v3201_v11 = vsel %vm3182_vm15, %v3168_v23, %v2841_v50  ;;  %v3184_v33 = vsel %vm3182_vm15, %v7085_v56, %v2807_v36 }
 0x67e   : > { %v2811_v17 = vpop.permute.xlu1 %2810  ;;  %v2934_v22 = vpop.permute.xlu0 %2933 }
 0x67f   : > { %v3234_v27 = vsel %vm3215_vm0, %v3201_v11, %v2934_v22  ;;  %v3186_v38 = vsel %vm3182_vm15, %v7124_v49, %v2811_v17  ;;  %v2898_v45 = vpop.permute.xlu2 %2897 }
 0x680   : > { %3526 = vmatpush.xpose.msk.msra.mxu2 %vm3255_vm1, %v3234_v27 }
 0x686   : > { %v2839_v51 = vpop.permute.xlu1 %2838  ;;  %v2904_v18 = vpop.permute.xlu0 %2903 }
 0x687   : > { %v3200_v5 = vsel %vm3182_vm15, %v3167_v6, %v2839_v51  ;;  %v3219_v14 = vsel %vm3215_vm0, %v3186_v38, %v2904_v18 }
 0x688   : > { %3508 = vmatpush.xpose.msk.msrb.mxu1 %vm3255_vm1, %v3219_v14  ;;  %v3233_v25 = vsel %vm3215_vm0, %v3200_v5, %v2932_v34 }
 0x689   : > { %3527 = vmatpush.xpose.msk.msra.mxu2 %vm3255_vm1, %v3233_v25 }
 0x68e   : > { %v2744_v49 = vpop.permute.xlu1 %2743  ;;  %v2809_v58 = vpop.permute.xlu0 %2808 }
 0x68f   : > { %v3185_v37 = vsel %vm3182_vm15, %v6956_v59, %v2809_v58  ;;  %v3166_v19 = vsel %vm3149_vm14, %v6754_v46, %v2744_v49  ;;  %v3248_v59 = vld [vmem:[%s7478_s3] sm:$0xff] }
 0x690   : > { %v3218_v12 = vsel %vm3215_vm0, %v3185_v37, %v2902_v20 }
 0x691   : > { %3509 = vmatpush.xpose.msk.msrb.mxu1 %vm3255_vm1, %v3218_v12 }
 0x696   : > { %v2930_v60 = vpop.permute.xlu1 %2929  ;;  %v2837_v10 = vpop.permute.xlu0 %2836 }
 0x697   : > { %v3199_v21 = vsel %vm3182_vm15, %v3166_v19, %v2837_v10 }
 0x698   : > { %v3232_v28 = vsel %vm3215_vm0, %v3199_v21, %v2930_v60 }
 0x699   : > { %3528 = vmatpush.xpose.msk.msra.mxu2 %vm3255_vm1, %v3232_v28 }
 0x69c   : > { %3529 = vmatmul.msk.f32.vlgmr.msra.gmra.mxu2 %vm3255_vm1, %v3248_v59 }
 0x69e   : > { %v2805_v46 = vpop.permute.xlu1 %2804  ;;  %v2900_v40 = vpop.permute.xlu0 %2899 }
 0x69f   : > { %v3217_v57 = vsel %vm3215_vm0, %v3184_v33, %v2900_v40  ;;  %v3183_v35 = vsel %vm3182_vm15, %v7088_v8, %v2805_v46 }
 0x6a0   : > { %3510 = vmatpush.xpose.msk.msrb.mxu1 %vm3255_vm1, %v3217_v57  ;;  %v3216_v30 = vsel %vm3215_vm0, %v3183_v35, %v2898_v45 }
 0x6a4   : > { %3511 = vmatpush.xpose.msk.msrb.mxu1 %vm3255_vm1, %v3216_v30 }
 0x6a7   : > { %3512 = vmatmul.msk.f32.vlgmr.msrb.gmra.mxu1 %vm3255_vm1, %v3248_v59 }
 0x6b3   : > { %v3253_v54 = vpop.permute.xlu0 %3252 }
 0x71f   : > { %v3392_v16 = vpop.f32.mrf.mxu2 }
 0x720   : > { %v3393_v56 = vadd.f32 %v3392_v16, %v3253_v54 }
 0x722   : > { %v3396_v41 = vmax.f32 %v3393_v56, 0.0 }
 0x724   : > { %v3372_v0 = vpop.f32.mrf.mxu1  ;;  %3398 = vst [vmem:[%s224_s7 + $0x8] sm:$0xff] %v3396_v41 }
 0x725   : > { %v3373_v8 = vadd.f32 %v3372_v0, %v3253_v54 }
 0x727   : > { %v3395_v1 = vmax.f32 %v3373_v8, 0.0 }
 0x729   : > { %3397 = vst [vmem:[%s224_s7] sm:$0xff] %v3395_v1 }
 0x72a PF: > { %s15_s18 = sadd.s32 1, %s3579_s18  }
 0x72b   : > { %p12_p4 = scmp.ge.s32.totalorder %s15_s18, 4  }
 0x72d   :  { %14 = sbr.rel (!%p12_p4) target bundleno = 1 (0x1), region = 70 }

</bundles_post_ra>
